<compile_context>
chip_gen: v5e
topology: v5e:2x2
jax: 0.10.0
libtpu: 0.0.40
codegen_flags: <defaults>
</compile_context>

<pallas_src>
import functools
import math

import numpy as np
import jax
import jax.numpy as jnp
from jax.experimental import pallas as pl
from jax.experimental.pallas import tpu as pltpu

_BN_EPS = 1e-5


def _round_up(x, m):
    return ((x + m - 1) // m) * m


# ----------------------------------------------------------------------------
# Fused per-level Pallas kernel: pad + depthwise3x3 + 1x1conv(BN folded) + ReLU
# ----------------------------------------------------------------------------
def _fused_level_kernel(x_ref, dw_ref, pw_ref, b_ref, o_ref, pad_ref, *, stride):
    """One batch element.

    x_ref  : (1, H, W, C)    summed (upsample+add) input, un-padded
    dw_ref : (3, 3, C)       depthwise taps
    pw_ref : (C, C)          pointwise weight, BN scale already folded in
    b_ref  : (1, C)          folded BN bias
    o_ref  : (1, Ho, Wo, C)  Ho/Wo already account for the stride
    pad_ref: VMEM scratch (H+2, W+2, C) in x.dtype
    """
    h, w, c = x_ref.shape[1], x_ref.shape[2], x_ref.shape[3]
    ho, wo = o_ref.shape[1], o_ref.shape[2]

    # In-kernel zero padding: the padded copy never round-trips HBM.
    pad_ref[...] = jnp.zeros_like(pad_ref)
    pad_ref[pl.ds(1, h), pl.ds(1, w), :] = x_ref[0]

    # 9-tap depthwise MAC.  For stride 2 only the kept rows/cols are read
    # (strided VMEM loads), so no wasted MACs.  Taps are read (and cast) one
    # at a time from the scratch ref to keep vreg pressure bounded.
    acc = jnp.zeros((ho, wo, c), jnp.float32)
    for ki in range(3):
        for kj in range(3):
            if stride == 1:
                tap = pad_ref[pl.ds(ki, ho), pl.ds(kj, wo), :]
            else:
                tap = pad_ref[pl.ds(ki, ho, stride=stride),
                              pl.ds(kj, wo, stride=stride), :]
            acc = acc + (tap.astype(jnp.float32)
                         * dw_ref[ki, kj, :].astype(jnp.float32))

    # 1x1 conv as a single lane-dense MXU matmul.  The BN scale was folded
    # into pw in the wrapper, so only bias + ReLU remain here.
    y = jnp.dot(acc.reshape(ho * wo, c),
                pw_ref[...].astype(jnp.float32),
                preferred_element_type=jnp.float32)
    y = jnp.maximum(y + b_ref[...].astype(jnp.float32), 0.0)
    o_ref[0] = y.reshape(ho, wo, c).astype(o_ref.dtype)


def fused_dw_pw_bn_relu(x_nhwc, dw, pw, bias, stride):
    """Fused depthwise3x3(stride, pad=1) + 1x1 conv + folded BN + ReLU."""
    n, h, w, c = x_nhwc.shape
    ho = (h + 2 - 3) // stride + 1
    wo = (w + 2 - 3) // stride + 1

    itemsize = x_nhwc.dtype.itemsize
    flops = 2 * n * ho * wo * c * (9 + c)
    bytes_accessed = itemsize * (x_nhwc.size + dw.size + pw.size + bias.size
                                 + n * ho * wo * c)

    kernel = functools.partial(_fused_level_kernel, stride=stride)
    return pl.pallas_call(
        kernel,
        out_shape=jax.ShapeDtypeStruct((n, ho, wo, c), x_nhwc.dtype),
        grid=(n,),
        in_specs=[
            pl.BlockSpec((1, h, w, c), lambda i: (i, 0, 0, 0)),
            pl.BlockSpec((3, 3, c), lambda i: (0, 0, 0)),
            pl.BlockSpec((c, c), lambda i: (0, 0)),
            pl.BlockSpec((1, c), lambda i: (0, 0)),
        ],
        out_specs=pl.BlockSpec((1, ho, wo, c), lambda i: (i, 0, 0, 0)),
        scratch_shapes=[pltpu.VMEM((h + 2, w + 2, c), x_nhwc.dtype)],
        compiler_params=pltpu.CompilerParams(
            dimension_semantics=("parallel",)),
        cost_estimate=pl.CostEstimate(flops=int(flops), transcendentals=0,
                                      bytes_accessed=int(bytes_accessed)),
    )(x_nhwc, dw, pw, bias)


# ----------------------------------------------------------------------------
# Bilinear upsample (align_corners=False) as dense interpolation matmuls
# ----------------------------------------------------------------------------
def _interp_matrix(out_size, in_size):
    o = np.arange(out_size, dtype=np.float64)
    src = np.clip((o + 0.5) * (in_size / out_size) - 0.5, 0.0, in_size - 1)
    lo = np.floor(src).astype(np.int64)
    hi = np.minimum(lo + 1, in_size - 1)
    frac = src - lo
    m = np.zeros((out_size, in_size), np.float32)
    m[np.arange(out_size), lo] += (1.0 - frac)
    m[np.arange(out_size), hi] += frac
    return jnp.asarray(m, jnp.float32)


def upsample_bilinear(x_nhwc, h_out, w_out):
    """Matches F.interpolate(mode='bilinear', align_corners=False) via matmuls."""
    _, h_in, w_in, _ = x_nhwc.shape
    if h_out == h_in and w_out == w_in:
        return x_nhwc
    wh = _interp_matrix(h_out, h_in)
    ww = _interp_matrix(w_out, w_in)
    t = jnp.einsum('oh,nhwc->nowc', wh, x_nhwc)
    return jnp.einsum('pw,nowc->nopc', ww, t)


# ----------------------------------------------------------------------------
# FPEM parameters + forward
# ----------------------------------------------------------------------------
def init_fpem_params(key, planes):
    """Random FPEM params (layout-equivalent to PyTorch), BatchNorm eval mode."""
    names = ["3_1", "2_1", "1_1", "2_2", "3_2", "4_2"]
    params = {}
    keys = jax.random.split(key, 2 * len(names))
    dw_std = math.sqrt(2.0 / (3 * 3 * planes))
    pw_std = math.sqrt(2.0 / (1 * 1 * planes))      # Conv_BN_ReLU init
    for i, name in enumerate(names):
        params[name] = {
            "dw": dw_std * jax.random.normal(keys[2 * i], (3, 3, planes), jnp.float32),
            "pw": pw_std * jax.random.normal(keys[2 * i + 1], (planes, planes), jnp.float32),
            # BatchNorm2d eval-mode affine + running statistics.
            "gamma": jnp.ones((planes,), jnp.float32),
            "beta": jnp.zeros((planes,), jnp.float32),
            "mean": jnp.zeros((planes,), jnp.float32),
            "var": jnp.ones((planes,), jnp.float32),
        }
    return params


def _fold_and_pad(p, cp):
    """Fold BN into the 1x1 conv weight/bias and pad channels to width cp."""
    c = p["dw"].shape[-1]
    scale = p["gamma"] * jax.lax.rsqrt(p["var"] + _BN_EPS)   # gamma / sqrt(var+eps)
    bias = p["beta"] - p["mean"] * scale
    pw = p["pw"] * scale[None, :]
    dw = jnp.pad(p["dw"], ((0, 0), (0, 0), (0, cp - c)))
    pw = jnp.pad(pw, ((0, cp - c), (0, cp - c)))
    bias = jnp.pad(bias, ((0, cp - c),))[None, :]
    return dw, pw, bias


def fpem_forward(params, f1, f2, f3, f4):
    """FPEM forward.  Inputs/outputs are NCHW (PyTorch convention)."""
    to_nhwc = lambda t: jnp.transpose(t, (0, 2, 3, 1))
    to_nchw = lambda t: jnp.transpose(t, (0, 3, 1, 2))
    c = f1.shape[1]
    cp = _round_up(c, 128)           # lane-dense channel layout

    def prep(t):
        t = to_nhwc(t)
        if cp != c:
            t = jnp.pad(t, ((0, 0), (0, 0), (0, 0), (0, cp - c)))
        return t

    f1, f2, f3, f4 = prep(f1), prep(f2), prep(f3), prep(f4)
    lp = {name: _fold_and_pad(p, cp) for name, p in params.items()}

    def level(x, y, name, stride):
        # TODO(synk): AFF / cg / TripletAttention are not defined in the
        # reference source; the `aff` fusion is approximated by a plain add
        # (identical to _upsample_add).
        s = upsample_bilinear(x, y.shape[1], y.shape[2]) + y
        dw, pw, b = lp[name]
        return fused_dw_pw_bn_relu(s, dw, pw, b, stride)

    # top-down path (stride-1 depthwise)
    f3 = level(f4, f3, "3_1", 1)
    f2 = level(f3, f2, "2_1", 1)
    f1 = level(f2, f1, "1_1", 1)
    # bottom-up path (stride-2 depthwise, computed directly at stride 2)
    f2 = level(f2, f1, "2_2", 2)
    f3 = level(f3, f2, "3_2", 2)
    f4 = level(f4, f3, "4_2", 2)

    def post(t):
        if cp != c:
            t = t[..., :c]
        return to_nchw(t)

    return tuple(post(t) for t in (f1, f2, f3, f4))


# ----------------------------------------------------------------------------
# Main
# ----------------------------------------------------------------------------
if __name__ == "__main__":
    key = jax.random.PRNGKey(0)
    k_p, k1, k2, k3, k4 = jax.random.split(key, 5)

    planes = 8      # out_channels of FPEM (channel count of all pyramid maps)
    n = 2
    f1 = jax.random.normal(k1, (n, planes, 16, 16), jnp.float32)
    f2 = jax.random.normal(k2, (n, planes, 8, 8), jnp.float32)
    f3 = jax.random.normal(k3, (n, planes, 4, 4), jnp.float32)
    f4 = jax.random.normal(k4, (n, planes, 2, 2), jnp.float32)

    params = init_fpem_params(k_p, planes)

    out1, out2, out3, out4 = jax.block_until_ready(
        jax.jit(fpem_forward)(params, f1, f2, f3, f4))

    assert out1.shape == (n, planes, 16, 16)
    assert out2.shape == (n, planes, 8, 8)
    assert out3.shape == (n, planes, 4, 4)
    assert out4.shape == (n, planes, 2, 2)
    assert all(bool(jnp.all(jnp.isfinite(o))) for o in (out1, out2, out3, out4))

    print("KERNEL_OK")
</pallas_src>

<mosaic_0001>
module attributes {stable_mosaic.version = 11 : i64} {
  func.func @_fused_level_kernel(%arg0: i32, %arg1: memref<1x8x8x128xf32, #tpu.memory_space<vmem>>, %arg2: memref<3x3x128xf32, #tpu.memory_space<vmem>>, %arg3: memref<128x128xf32, #tpu.memory_space<vmem>>, %arg4: memref<1x128xf32, #tpu.memory_space<vmem>>, %arg5: memref<1x8x8x128xf32, #tpu.memory_space<vmem>>, %arg6: memref<10x10x128xf32, #tpu.memory_space<vmem>>) attributes {dimension_semantics = [#tpu.dimension_semantics<parallel>], iteration_bounds = array<i64: 2>, scalar_prefetch = 0 : i64, scratch_operands = 1 : i64, tpu.core_type = #tpu.core_type<tc>, window_params = [{transform_indices = @transform_0, window_bounds = array<i64: 1, 8, 8, 128>}, {pipeline_mode = #tpu.pipeline_mode<synchronous>, transform_indices = @transform_1, window_bounds = array<i64: 3, 3, 128>}, {pipeline_mode = #tpu.pipeline_mode<synchronous>, transform_indices = @transform_2, window_bounds = array<i64: 128, 128>}, {pipeline_mode = #tpu.pipeline_mode<synchronous>, transform_indices = @transform_3, window_bounds = array<i64: 1, 128>}, {transform_indices = @transform_4, window_bounds = array<i64: 1, 8, 8, 128>}]} {
    %cst = arith.constant 0.000000e+00 : f32
    %0 = vector.broadcast %cst : f32 to vector<10x10x128xf32>
    %c0 = arith.constant 0 : index
    %c0_0 = arith.constant 0 : index
    %c0_1 = arith.constant 0 : index
    %1 = vector.load %arg6[%c0, %c0_0, %c0_1] : memref<10x10x128xf32, #tpu.memory_space<vmem>>, vector<10x10x128xf32>
    tpu.vector_store %arg6[%c0, %c0_0, %c0_1], %0 {strides = array<i32>} : memref<10x10x128xf32, #tpu.memory_space<vmem>>, vector<10x10x128xf32>,
    %c0_2 = arith.constant 0 : index
    %c0_3 = arith.constant 0 : index
    %c0_4 = arith.constant 0 : index
    %c0_5 = arith.constant 0 : index
    %2 = vector.load %arg1[%c0_2, %c0_3, %c0_4, %c0_5] : memref<1x8x8x128xf32, #tpu.memory_space<vmem>>, vector<1x8x8x128xf32>
    %3 = vector.shape_cast %2 : vector<1x8x8x128xf32> to vector<8x8x128xf32>
    %c1 = arith.constant 1 : index
    %c1_6 = arith.constant 1 : index
    %c0_7 = arith.constant 0 : index
    %4 = vector.load %arg6[%c1, %c1_6, %c0_7] : memref<10x10x128xf32, #tpu.memory_space<vmem>>, vector<8x8x128xf32>
    tpu.vector_store %arg6[%c1, %c1_6, %c0_7], %3 {strides = array<i32>} : memref<10x10x128xf32, #tpu.memory_space<vmem>>, vector<8x8x128xf32>,
    %cst_8 = arith.constant 0.000000e+00 : f32
    %5 = vector.broadcast %cst_8 : f32 to vector<8x8x128xf32>
    %c0_9 = arith.constant 0 : index
    %c0_10 = arith.constant 0 : index
    %c0_11 = arith.constant 0 : index
    %6 = vector.load %arg6[%c0_9, %c0_10, %c0_11] : memref<10x10x128xf32, #tpu.memory_space<vmem>>, vector<8x8x128xf32>
    %c0_12 = arith.constant 0 : index
    %c0_13 = arith.constant 0 : index
    %c0_14 = arith.constant 0 : index
    %7 = vector.load %arg2[%c0_12, %c0_13, %c0_14] : memref<3x3x128xf32, #tpu.memory_space<vmem>>, vector<1x1x128xf32>
    %8 = vector.shape_cast %7 : vector<1x1x128xf32> to vector<128xf32>
    %9 = vector.shape_cast %8 : vector<128xf32> to vector<1x1x128xf32>
    %10 = vector.broadcast %9 : vector<1x1x128xf32> to vector<8x8x128xf32>
    %11 = arith.mulf %6, %10 : vector<8x8x128xf32>
    %12 = arith.addf %5, %11 : vector<8x8x128xf32>
    %c0_15 = arith.constant 0 : index
    %c1_16 = arith.constant 1 : index
    %c0_17 = arith.constant 0 : index
    %13 = vector.load %arg6[%c0_15, %c1_16, %c0_17] : memref<10x10x128xf32, #tpu.memory_space<vmem>>, vector<8x8x128xf32>
    %c0_18 = arith.constant 0 : index
    %c1_19 = arith.constant 1 : index
    %c0_20 = arith.constant 0 : index
    %14 = vector.load %arg2[%c0_18, %c1_19, %c0_20] : memref<3x3x128xf32, #tpu.memory_space<vmem>>, vector<1x1x128xf32>
    %15 = vector.shape_cast %14 : vector<1x1x128xf32> to vector<128xf32>
    %16 = vector.shape_cast %15 : vector<128xf32> to vector<1x1x128xf32>
    %17 = vector.broadcast %16 : vector<1x1x128xf32> to vector<8x8x128xf32>
    %18 = arith.mulf %13, %17 : vector<8x8x128xf32>
    %19 = arith.addf %12, %18 : vector<8x8x128xf32>
    %c0_21 = arith.constant 0 : index
    %c2 = arith.constant 2 : index
    %c0_22 = arith.constant 0 : index
    %20 = vector.load %arg6[%c0_21, %c2, %c0_22] : memref<10x10x128xf32, #tpu.memory_space<vmem>>, vector<8x8x128xf32>
    %c0_23 = arith.constant 0 : index
    %c2_24 = arith.constant 2 : index
    %c0_25 = arith.constant 0 : index
    %21 = vector.load %arg2[%c0_23, %c2_24, %c0_25] : memref<3x3x128xf32, #tpu.memory_space<vmem>>, vector<1x1x128xf32>
    %22 = vector.shape_cast %21 : vector<1x1x128xf32> to vector<128xf32>
    %23 = vector.shape_cast %22 : vector<128xf32> to vector<1x1x128xf32>
    %24 = vector.broadcast %23 : vector<1x1x128xf32> to vector<8x8x128xf32>
    %25 = arith.mulf %20, %24 : vector<8x8x128xf32>
    %26 = arith.addf %19, %25 : vector<8x8x128xf32>
    %c1_26 = arith.constant 1 : index
    %c0_27 = arith.constant 0 : index
    %c0_28 = arith.constant 0 : index
    %27 = vector.load %arg6[%c1_26, %c0_27, %c0_28] : memref<10x10x128xf32, #tpu.memory_space<vmem>>, vector<8x8x128xf32>
    %c1_29 = arith.constant 1 : index
    %c0_30 = arith.constant 0 : index
    %c0_31 = arith.constant 0 : index
    %28 = vector.load %arg2[%c1_29, %c0_30, %c0_31] : memref<3x3x128xf32, #tpu.memory_space<vmem>>, vector<1x1x128xf32>
    %29 = vector.shape_cast %28 : vector<1x1x128xf32> to vector<128xf32>
    %30 = vector.shape_cast %29 : vector<128xf32> to vector<1x1x128xf32>
    %31 = vector.broadcast %30 : vector<1x1x128xf32> to vector<8x8x128xf32>
    %32 = arith.mulf %27, %31 : vector<8x8x128xf32>
    %33 = arith.addf %26, %32 : vector<8x8x128xf32>
    %c1_32 = arith.constant 1 : index
    %c1_33 = arith.constant 1 : index
    %c0_34 = arith.constant 0 : index
    %34 = vector.load %arg6[%c1_32, %c1_33, %c0_34] : memref<10x10x128xf32, #tpu.memory_space<vmem>>, vector<8x8x128xf32>
    %c1_35 = arith.constant 1 : index
    %c1_36 = arith.constant 1 : index
    %c0_37 = arith.constant 0 : index
    %35 = vector.load %arg2[%c1_35, %c1_36, %c0_37] : memref<3x3x128xf32, #tpu.memory_space<vmem>>, vector<1x1x128xf32>
    %36 = vector.shape_cast %35 : vector<1x1x128xf32> to vector<128xf32>
    %37 = vector.shape_cast %36 : vector<128xf32> to vector<1x1x128xf32>
    %38 = vector.broadcast %37 : vector<1x1x128xf32> to vector<8x8x128xf32>
    %39 = arith.mulf %34, %38 : vector<8x8x128xf32>
    %40 = arith.addf %33, %39 : vector<8x8x128xf32>
    %c1_38 = arith.constant 1 : index
    %c2_39 = arith.constant 2 : index
    %c0_40 = arith.constant 0 : index
    %41 = vector.load %arg6[%c1_38, %c2_39, %c0_40] : memref<10x10x128xf32, #tpu.memory_space<vmem>>, vector<8x8x128xf32>
    %c1_41 = arith.constant 1 : index
    %c2_42 = arith.constant 2 : index
    %c0_43 = arith.constant 0 : index
    %42 = vector.load %arg2[%c1_41, %c2_42, %c0_43] : memref<3x3x128xf32, #tpu.memory_space<vmem>>, vector<1x1x128xf32>
    %43 = vector.shape_cast %42 : vector<1x1x128xf32> to vector<128xf32>
    %44 = vector.shape_cast %43 : vector<128xf32> to vector<1x1x128xf32>
    %45 = vector.broadcast %44 : vector<1x1x128xf32> to vector<8x8x128xf32>
    %46 = arith.mulf %41, %45 : vector<8x8x128xf32>
    %47 = arith.addf %40, %46 : vector<8x8x128xf32>
    %c2_44 = arith.constant 2 : index
    %c0_45 = arith.constant 0 : index
    %c0_46 = arith.constant 0 : index
    %48 = vector.load %arg6[%c2_44, %c0_45, %c0_46] : memref<10x10x128xf32, #tpu.memory_space<vmem>>, vector<8x8x128xf32>
    %c2_47 = arith.constant 2 : index
    %c0_48 = arith.constant 0 : index
    %c0_49 = arith.constant 0 : index
    %49 = vector.load %arg2[%c2_47, %c0_48, %c0_49] : memref<3x3x128xf32, #tpu.memory_space<vmem>>, vector<1x1x128xf32>
    %50 = vector.shape_cast %49 : vector<1x1x128xf32> to vector<128xf32>
    %51 = vector.shape_cast %50 : vector<128xf32> to vector<1x1x128xf32>
    %52 = vector.broadcast %51 : vector<1x1x128xf32> to vector<8x8x128xf32>
    %53 = arith.mulf %48, %52 : vector<8x8x128xf32>
    %54 = arith.addf %47, %53 : vector<8x8x128xf32>
    %c2_50 = arith.constant 2 : index
    %c1_51 = arith.constant 1 : index
    %c0_52 = arith.constant 0 : index
    %55 = vector.load %arg6[%c2_50, %c1_51, %c0_52] : memref<10x10x128xf32, #tpu.memory_space<vmem>>, vector<8x8x128xf32>
    %c2_53 = arith.constant 2 : index
    %c1_54 = arith.constant 1 : index
    %c0_55 = arith.constant 0 : index
    %56 = vector.load %arg2[%c2_53, %c1_54, %c0_55] : memref<3x3x128xf32, #tpu.memory_space<vmem>>, vector<1x1x128xf32>
    %57 = vector.shape_cast %56 : vector<1x1x128xf32> to vector<128xf32>
    %58 = vector.shape_cast %57 : vector<128xf32> to vector<1x1x128xf32>
    %59 = vector.broadcast %58 : vector<1x1x128xf32> to vector<8x8x128xf32>
    %60 = arith.mulf %55, %59 : vector<8x8x128xf32>
    %61 = arith.addf %54, %60 : vector<8x8x128xf32>
    %c2_56 = arith.constant 2 : index
    %c2_57 = arith.constant 2 : index
    %c0_58 = arith.constant 0 : index
    %62 = vector.load %arg6[%c2_56, %c2_57, %c0_58] : memref<10x10x128xf32, #tpu.memory_space<vmem>>, vector<8x8x128xf32>
    %c2_59 = arith.constant 2 : index
    %c2_60 = arith.constant 2 : index
    %c0_61 = arith.constant 0 : index
    %63 = vector.load %arg2[%c2_59, %c2_60, %c0_61] : memref<3x3x128xf32, #tpu.memory_space<vmem>>, vector<1x1x128xf32>
    %64 = vector.shape_cast %63 : vector<1x1x128xf32> to vector<128xf32>
    %65 = vector.shape_cast %64 : vector<128xf32> to vector<1x1x128xf32>
    %66 = vector.broadcast %65 : vector<1x1x128xf32> to vector<8x8x128xf32>
    %67 = arith.mulf %62, %66 : vector<8x8x128xf32>
    %68 = arith.addf %61, %67 : vector<8x8x128xf32>
    %69 = vector.shape_cast %68 : vector<8x8x128xf32> to vector<64x128xf32>
    %c0_62 = arith.constant 0 : index
    %c0_63 = arith.constant 0 : index
    %70 = vector.load %arg3[%c0_62, %c0_63] : memref<128x128xf32, #tpu.memory_space<vmem>>, vector<128x128xf32>
    %cst_64 = arith.constant dense<0.000000e+00> : vector<64x128xf32>
    %71 = tpu.matmul %69, %70, %cst_64 {dimension_numbers = #tpu.dot_dimension_numbers<[1], [0], [0], [1], [0, 0, 1, 1], [], []>} : vector<64x128xf32>, vector<128x128xf32>, vector<64x128xf32> -> vector<64x128xf32>
    %c0_65 = arith.constant 0 : index
    %c0_66 = arith.constant 0 : index
    %72 = vector.load %arg4[%c0_65, %c0_66] : memref<1x128xf32, #tpu.memory_space<vmem>>, vector<1x128xf32>
    %73 = vector.broadcast %72 : vector<1x128xf32> to vector<64x128xf32>
    %74 = arith.addf %71, %73 : vector<64x128xf32>
    %cst_67 = arith.constant 0.000000e+00 : f32
    %75 = vector.broadcast %cst_67 : f32 to vector<64x128xf32>
    %76 = arith.maximumf %74, %75 : vector<64x128xf32>
    %77 = vector.shape_cast %76 : vector<64x128xf32> to vector<8x8x128xf32>
    %c0_68 = arith.constant 0 : index
    %c0_69 = arith.constant 0 : index
    %c0_70 = arith.constant 0 : index
    %c0_71 = arith.constant 0 : index
    %78 = vector.load %arg5[%c0_68, %c0_69, %c0_70, %c0_71] : memref<1x8x8x128xf32, #tpu.memory_space<vmem>>, vector<1x8x8x128xf32>
    %79 = vector.shape_cast %78 : vector<1x8x8x128xf32> to vector<8x8x128xf32>
    %80 = vector.shape_cast %77 : vector<8x8x128xf32> to vector<1x8x8x128xf32>
    tpu.vector_store %arg5[%c0_68, %c0_69, %c0_70, %c0_71], %80 {strides = array<i32>} : memref<1x8x8x128xf32, #tpu.memory_space<vmem>>, vector<1x8x8x128xf32>,
    return
  }
  func.func @transform_0(%arg0: i32) -> (i32, i32, i32, i32) {
    %c0_i32 = arith.constant 0 : i32
    %c0_i32_0 = arith.constant 0 : i32
    %c0_i32_1 = arith.constant 0 : i32
    %c0_i32_2 = arith.constant 0 : i32
    return %arg0, %c0_i32, %c0_i32_0, %c0_i32_1 : i32, i32, i32, i32
  }
  func.func @transform_1(%arg0: i32) -> (i32, i32, i32) {
    %c0_i32 = arith.constant 0 : i32
    %c0_i32_0 = arith.constant 0 : i32
    %c0_i32_1 = arith.constant 0 : i32
    %c0_i32_2 = arith.constant 0 : i32
    return %c0_i32, %c0_i32_0, %c0_i32_1 : i32, i32, i32
  }
  func.func @transform_2(%arg0: i32) -> (i32, i32) {
    %c0_i32 = arith.constant 0 : i32
    %c0_i32_0 = arith.constant 0 : i32
    %c0_i32_1 = arith.constant 0 : i32
    return %c0_i32, %c0_i32_0 : i32, i32
  }
  func.func @transform_3(%arg0: i32) -> (i32, i32) {
    %c0_i32 = arith.constant 0 : i32
    %c0_i32_0 = arith.constant 0 : i32
    %c0_i32_1 = arith.constant 0 : i32
    return %c0_i32, %c0_i32_0 : i32, i32
  }
  func.func @transform_4(%arg0: i32) -> (i32, i32, i32, i32) {
    %c0_i32 = arith.constant 0 : i32
    %c0_i32_0 = arith.constant 0 : i32
    %c0_i32_1 = arith.constant 0 : i32
    %c0_i32_2 = arith.constant 0 : i32
    return %arg0, %c0_i32, %c0_i32_0, %c0_i32_1 : i32, i32, i32, i32
  }
}

module attributes {stable_mosaic.version = 11 : i64} {
  func.func @_fused_level_kernel(%arg0: i32, %arg1: memref<1x4x4x128xf32, #tpu.memory_space<vmem>>, %arg2: memref<3x3x128xf32, #tpu.memory_space<vmem>>, %arg3: memref<128x128xf32, #tpu.memory_space<vmem>>, %arg4: memref<1x128xf32, #tpu.memory_space<vmem>>, %arg5: memref<1x4x4x128xf32, #tpu.memory_space<vmem>>, %arg6: memref<6x6x128xf32, #tpu.memory_space<vmem>>) attributes {dimension_semantics = [#tpu.dimension_semantics<parallel>], iteration_bounds = array<i64: 2>, scalar_prefetch = 0 : i64, scratch_operands = 1 : i64, tpu.core_type = #tpu.core_type<tc>, window_params = [{transform_indices = @transform_0, window_bounds = array<i64: 1, 4, 4, 128>}, {pipeline_mode = #tpu.pipeline_mode<synchronous>, transform_indices = @transform_1, window_bounds = array<i64: 3, 3, 128>}, {pipeline_mode = #tpu.pipeline_mode<synchronous>, transform_indices = @transform_2, window_bounds = array<i64: 128, 128>}, {pipeline_mode = #tpu.pipeline_mode<synchronous>, transform_indices = @transform_3, window_bounds = array<i64: 1, 128>}, {transform_indices = @transform_4, window_bounds = array<i64: 1, 4, 4, 128>}]} {
    %cst = arith.constant 0.000000e+00 : f32
    %0 = vector.broadcast %cst : f32 to vector<6x6x128xf32>
    %c0 = arith.constant 0 : index
    %c0_0 = arith.constant 0 : index
    %c0_1 = arith.constant 0 : index
    %1 = vector.load %arg6[%c0, %c0_0, %c0_1] : memref<6x6x128xf32, #tpu.memory_space<vmem>>, vector<6x6x128xf32>
    tpu.vector_store %arg6[%c0, %c0_0, %c0_1], %0 {strides = array<i32>} : memref<6x6x128xf32, #tpu.memory_space<vmem>>, vector<6x6x128xf32>,
    %c0_2 = arith.constant 0 : index
    %c0_3 = arith.constant 0 : index
    %c0_4 = arith.constant 0 : index
    %c0_5 = arith.constant 0 : index
    %2 = vector.load %arg1[%c0_2, %c0_3, %c0_4, %c0_5] : memref<1x4x4x128xf32, #tpu.memory_space<vmem>>, vector<1x4x4x128xf32>
    %3 = vector.shape_cast %2 : vector<1x4x4x128xf32> to vector<4x4x128xf32>
    %c1 = arith.constant 1 : index
    %c1_6 = arith.constant 1 : index
    %c0_7 = arith.constant 0 : index
    %4 = vector.load %arg6[%c1, %c1_6, %c0_7] : memref<6x6x128xf32, #tpu.memory_space<vmem>>, vector<4x4x128xf32>
    tpu.vector_store %arg6[%c1, %c1_6, %c0_7], %3 {strides = array<i32>} : memref<6x6x128xf32, #tpu.memory_space<vmem>>, vector<4x4x128xf32>,
    %cst_8 = arith.constant 0.000000e+00 : f32
    %5 = vector.broadcast %cst_8 : f32 to vector<4x4x128xf32>
    %c0_9 = arith.constant 0 : index
    %c0_10 = arith.constant 0 : index
    %c0_11 = arith.constant 0 : index
    %6 = vector.load %arg6[%c0_9, %c0_10, %c0_11] : memref<6x6x128xf32, #tpu.memory_space<vmem>>, vector<4x4x128xf32>
    %c0_12 = arith.constant 0 : index
    %c0_13 = arith.constant 0 : index
    %c0_14 = arith.constant 0 : index
    %7 = vector.load %arg2[%c0_12, %c0_13, %c0_14] : memref<3x3x128xf32, #tpu.memory_space<vmem>>, vector<1x1x128xf32>
    %8 = vector.shape_cast %7 : vector<1x1x128xf32> to vector<128xf32>
    %9 = vector.shape_cast %8 : vector<128xf32> to vector<1x1x128xf32>
    %10 = vector.broadcast %9 : vector<1x1x128xf32> to vector<4x4x128xf32>
    %11 = arith.mulf %6, %10 : vector<4x4x128xf32>
    %12 = arith.addf %5, %11 : vector<4x4x128xf32>
    %c0_15 = arith.constant 0 : index
    %c1_16 = arith.constant 1 : index
    %c0_17 = arith.constant 0 : index
    %13 = vector.load %arg6[%c0_15, %c1_16, %c0_17] : memref<6x6x128xf32, #tpu.memory_space<vmem>>, vector<4x4x128xf32>
    %c0_18 = arith.constant 0 : index
    %c1_19 = arith.constant 1 : index
    %c0_20 = arith.constant 0 : index
    %14 = vector.load %arg2[%c0_18, %c1_19, %c0_20] : memref<3x3x128xf32, #tpu.memory_space<vmem>>, vector<1x1x128xf32>
    %15 = vector.shape_cast %14 : vector<1x1x128xf32> to vector<128xf32>
    %16 = vector.shape_cast %15 : vector<128xf32> to vector<1x1x128xf32>
    %17 = vector.broadcast %16 : vector<1x1x128xf32> to vector<4x4x128xf32>
    %18 = arith.mulf %13, %17 : vector<4x4x128xf32>
    %19 = arith.addf %12, %18 : vector<4x4x128xf32>
    %c0_21 = arith.constant 0 : index
    %c2 = arith.constant 2 : index
    %c0_22 = arith.constant 0 : index
    %20 = vector.load %arg6[%c0_21, %c2, %c0_22] : memref<6x6x128xf32, #tpu.memory_space<vmem>>, vector<4x4x128xf32>
    %c0_23 = arith.constant 0 : index
    %c2_24 = arith.constant 2 : index
    %c0_25 = arith.constant 0 : index
    %21 = vector.load %arg2[%c0_23, %c2_24, %c0_25] : memref<3x3x128xf32, #tpu.memory_space<vmem>>, vector<1x1x128xf32>
    %22 = vector.shape_cast %21 : vector<1x1x128xf32> to vector<128xf32>
    %23 = vector.shape_cast %22 : vector<128xf32> to vector<1x1x128xf32>
    %24 = vector.broadcast %23 : vector<1x1x128xf32> to vector<4x4x128xf32>
    %25 = arith.mulf %20, %24 : vector<4x4x128xf32>
    %26 = arith.addf %19, %25 : vector<4x4x128xf32>
    %c1_26 = arith.constant 1 : index
    %c0_27 = arith.constant 0 : index
    %c0_28 = arith.constant 0 : index
    %27 = vector.load %arg6[%c1_26, %c0_27, %c0_28] : memref<6x6x128xf32, #tpu.memory_space<vmem>>, vector<4x4x128xf32>
    %c1_29 = arith.constant 1 : index
    %c0_30 = arith.constant 0 : index
    %c0_31 = arith.constant 0 : index
    %28 = vector.load %arg2[%c1_29, %c0_30, %c0_31] : memref<3x3x128xf32, #tpu.memory_space<vmem>>, vector<1x1x128xf32>
    %29 = vector.shape_cast %28 : vector<1x1x128xf32> to vector<128xf32>
    %30 = vector.shape_cast %29 : vector<128xf32> to vector<1x1x128xf32>
    %31 = vector.broadcast %30 : vector<1x1x128xf32> to vector<4x4x128xf32>
    %32 = arith.mulf %27, %31 : vector<4x4x128xf32>
    %33 = arith.addf %26, %32 : vector<4x4x128xf32>
    %c1_32 = arith.constant 1 : index
    %c1_33 = arith.constant 1 : index
    %c0_34 = arith.constant 0 : index
    %34 = vector.load %arg6[%c1_32, %c1_33, %c0_34] : memref<6x6x128xf32, #tpu.memory_space<vmem>>, vector<4x4x128xf32>
    %c1_35 = arith.constant 1 : index
    %c1_36 = arith.constant 1 : index
    %c0_37 = arith.constant 0 : index
    %35 = vector.load %arg2[%c1_35, %c1_36, %c0_37] : memref<3x3x128xf32, #tpu.memory_space<vmem>>, vector<1x1x128xf32>
    %36 = vector.shape_cast %35 : vector<1x1x128xf32> to vector<128xf32>
    %37 = vector.shape_cast %36 : vector<128xf32> to vector<1x1x128xf32>
    %38 = vector.broadcast %37 : vector<1x1x128xf32> to vector<4x4x128xf32>
    %39 = arith.mulf %34, %38 : vector<4x4x128xf32>
    %40 = arith.addf %33, %39 : vector<4x4x128xf32>
    %c1_38 = arith.constant 1 : index
    %c2_39 = arith.constant 2 : index
    %c0_40 = arith.constant 0 : index
    %41 = vector.load %arg6[%c1_38, %c2_39, %c0_40] : memref<6x6x128xf32, #tpu.memory_space<vmem>>, vector<4x4x128xf32>
    %c1_41 = arith.constant 1 : index
    %c2_42 = arith.constant 2 : index
    %c0_43 = arith.constant 0 : index
    %42 = vector.load %arg2[%c1_41, %c2_42, %c0_43] : memref<3x3x128xf32, #tpu.memory_space<vmem>>, vector<1x1x128xf32>
    %43 = vector.shape_cast %42 : vector<1x1x128xf32> to vector<128xf32>
    %44 = vector.shape_cast %43 : vector<128xf32> to vector<1x1x128xf32>
    %45 = vector.broadcast %44 : vector<1x1x128xf32> to vector<4x4x128xf32>
    %46 = arith.mulf %41, %45 : vector<4x4x128xf32>
    %47 = arith.addf %40, %46 : vector<4x4x128xf32>
    %c2_44 = arith.constant 2 : index
    %c0_45 = arith.constant 0 : index
    %c0_46 = arith.constant 0 : index
    %48 = vector.load %arg6[%c2_44, %c0_45, %c0_46] : memref<6x6x128xf32, #tpu.memory_space<vmem>>, vector<4x4x128xf32>
    %c2_47 = arith.constant 2 : index
    %c0_48 = arith.constant 0 : index
    %c0_49 = arith.constant 0 : index
    %49 = vector.load %arg2[%c2_47, %c0_48, %c0_49] : memref<3x3x128xf32, #tpu.memory_space<vmem>>, vector<1x1x128xf32>
    %50 = vector.shape_cast %49 : vector<1x1x128xf32> to vector<128xf32>
    %51 = vector.shape_cast %50 : vector<128xf32> to vector<1x1x128xf32>
    %52 = vector.broadcast %51 : vector<1x1x128xf32> to vector<4x4x128xf32>
    %53 = arith.mulf %48, %52 : vector<4x4x128xf32>
    %54 = arith.addf %47, %53 : vector<4x4x128xf32>
    %c2_50 = arith.constant 2 : index
    %c1_51 = arith.constant 1 : index
    %c0_52 = arith.constant 0 : index
    %55 = vector.load %arg6[%c2_50, %c1_51, %c0_52] : memref<6x6x128xf32, #tpu.memory_space<vmem>>, vector<4x4x128xf32>
    %c2_53 = arith.constant 2 : index
    %c1_54 = arith.constant 1 : index
    %c0_55 = arith.constant 0 : index
    %56 = vector.load %arg2[%c2_53, %c1_54, %c0_55] : memref<3x3x128xf32, #tpu.memory_space<vmem>>, vector<1x1x128xf32>
    %57 = vector.shape_cast %56 : vector<1x1x128xf32> to vector<128xf32>
    %58 = vector.shape_cast %57 : vector<128xf32> to vector<1x1x128xf32>
    %59 = vector.broadcast %58 : vector<1x1x128xf32> to vector<4x4x128xf32>
    %60 = arith.mulf %55, %59 : vector<4x4x128xf32>
    %61 = arith.addf %54, %60 : vector<4x4x128xf32>
    %c2_56 = arith.constant 2 : index
    %c2_57 = arith.constant 2 : index
    %c0_58 = arith.constant 0 : index
    %62 = vector.load %arg6[%c2_56, %c2_57, %c0_58] : memref<6x6x128xf32, #tpu.memory_space<vmem>>, vector<4x4x128xf32>
    %c2_59 = arith.constant 2 : index
    %c2_60 = arith.constant 2 : index
    %c0_61 = arith.constant 0 : index
    %63 = vector.load %arg2[%c2_59, %c2_60, %c0_61] : memref<3x3x128xf32, #tpu.memory_space<vmem>>, vector<1x1x128xf32>
    %64 = vector.shape_cast %63 : vector<1x1x128xf32> to vector<128xf32>
    %65 = vector.shape_cast %64 : vector<128xf32> to vector<1x1x128xf32>
    %66 = vector.broadcast %65 : vector<1x1x128xf32> to vector<4x4x128xf32>
    %67 = arith.mulf %62, %66 : vector<4x4x128xf32>
    %68 = arith.addf %61, %67 : vector<4x4x128xf32>
    %69 = vector.shape_cast %68 : vector<4x4x128xf32> to vector<16x128xf32>
    %c0_62 = arith.constant 0 : index
    %c0_63 = arith.constant 0 : index
    %70 = vector.load %arg3[%c0_62, %c0_63] : memref<128x128xf32, #tpu.memory_space<vmem>>, vector<128x128xf32>
    %cst_64 = arith.constant dense<0.000000e+00> : vector<16x128xf32>
    %71 = tpu.matmul %69, %70, %cst_64 {dimension_numbers = #tpu.dot_dimension_numbers<[1], [0], [0], [1], [0, 0, 1, 1], [], []>} : vector<16x128xf32>, vector<128x128xf32>, vector<16x128xf32> -> vector<16x128xf32>
    %c0_65 = arith.constant 0 : index
    %c0_66 = arith.constant 0 : index
    %72 = vector.load %arg4[%c0_65, %c0_66] : memref<1x128xf32, #tpu.memory_space<vmem>>, vector<1x128xf32>
    %73 = vector.broadcast %72 : vector<1x128xf32> to vector<16x128xf32>
    %74 = arith.addf %71, %73 : vector<16x128xf32>
    %cst_67 = arith.constant 0.000000e+00 : f32
    %75 = vector.broadcast %cst_67 : f32 to vector<16x128xf32>
    %76 = arith.maximumf %74, %75 : vector<16x128xf32>
    %77 = vector.shape_cast %76 : vector<16x128xf32> to vector<4x4x128xf32>
    %c0_68 = arith.constant 0 : index
    %c0_69 = arith.constant 0 : index
    %c0_70 = arith.constant 0 : index
    %c0_71 = arith.constant 0 : index
    %78 = vector.load %arg5[%c0_68, %c0_69, %c0_70, %c0_71] : memref<1x4x4x128xf32, #tpu.memory_space<vmem>>, vector<1x4x4x128xf32>
    %79 = vector.shape_cast %78 : vector<1x4x4x128xf32> to vector<4x4x128xf32>
    %80 = vector.shape_cast %77 : vector<4x4x128xf32> to vector<1x4x4x128xf32>
    tpu.vector_store %arg5[%c0_68, %c0_69, %c0_70, %c0_71], %80 {strides = array<i32>} : memref<1x4x4x128xf32, #tpu.memory_space<vmem>>, vector<1x4x4x128xf32>,
    return
  }
  func.func @transform_0(%arg0: i32) -> (i32, i32, i32, i32) {
    %c0_i32 = arith.constant 0 : i32
    %c0_i32_0 = arith.constant 0 : i32
    %c0_i32_1 = arith.constant 0 : i32
    %c0_i32_2 = arith.constant 0 : i32
    return %arg0, %c0_i32, %c0_i32_0, %c0_i32_1 : i32, i32, i32, i32
  }
  func.func @transform_1(%arg0: i32) -> (i32, i32, i32) {
    %c0_i32 = arith.constant 0 : i32
    %c0_i32_0 = arith.constant 0 : i32
    %c0_i32_1 = arith.constant 0 : i32
    %c0_i32_2 = arith.constant 0 : i32
    return %c0_i32, %c0_i32_0, %c0_i32_1 : i32, i32, i32
  }
  func.func @transform_2(%arg0: i32) -> (i32, i32) {
    %c0_i32 = arith.constant 0 : i32
    %c0_i32_0 = arith.constant 0 : i32
    %c0_i32_1 = arith.constant 0 : i32
    return %c0_i32, %c0_i32_0 : i32, i32
  }
  func.func @transform_3(%arg0: i32) -> (i32, i32) {
    %c0_i32 = arith.constant 0 : i32
    %c0_i32_0 = arith.constant 0 : i32
    %c0_i32_1 = arith.constant 0 : i32
    return %c0_i32, %c0_i32_0 : i32, i32
  }
  func.func @transform_4(%arg0: i32) -> (i32, i32, i32, i32) {
    %c0_i32 = arith.constant 0 : i32
    %c0_i32_0 = arith.constant 0 : i32
    %c0_i32_1 = arith.constant 0 : i32
    %c0_i32_2 = arith.constant 0 : i32
    return %arg0, %c0_i32, %c0_i32_0, %c0_i32_1 : i32, i32, i32, i32
  }
}

module attributes {stable_mosaic.version = 11 : i64} {
  func.func @_fused_level_kernel(%arg0: i32, %arg1: memref<1x16x16x128xf32, #tpu.memory_space<vmem>>, %arg2: memref<3x3x128xf32, #tpu.memory_space<vmem>>, %arg3: memref<128x128xf32, #tpu.memory_space<vmem>>, %arg4: memref<1x128xf32, #tpu.memory_space<vmem>>, %arg5: memref<1x16x16x128xf32, #tpu.memory_space<vmem>>, %arg6: memref<18x18x128xf32, #tpu.memory_space<vmem>>) attributes {dimension_semantics = [#tpu.dimension_semantics<parallel>], iteration_bounds = array<i64: 2>, scalar_prefetch = 0 : i64, scratch_operands = 1 : i64, tpu.core_type = #tpu.core_type<tc>, window_params = [{transform_indices = @transform_0, window_bounds = array<i64: 1, 16, 16, 128>}, {pipeline_mode = #tpu.pipeline_mode<synchronous>, transform_indices = @transform_1, window_bounds = array<i64: 3, 3, 128>}, {pipeline_mode = #tpu.pipeline_mode<synchronous>, transform_indices = @transform_2, window_bounds = array<i64: 128, 128>}, {pipeline_mode = #tpu.pipeline_mode<synchronous>, transform_indices = @transform_3, window_bounds = array<i64: 1, 128>}, {transform_indices = @transform_4, window_bounds = array<i64: 1, 16, 16, 128>}]} {
    %cst = arith.constant 0.000000e+00 : f32
    %0 = vector.broadcast %cst : f32 to vector<18x18x128xf32>
    %c0 = arith.constant 0 : index
    %c0_0 = arith.constant 0 : index
    %c0_1 = arith.constant 0 : index
    %1 = vector.load %arg6[%c0, %c0_0, %c0_1] : memref<18x18x128xf32, #tpu.memory_space<vmem>>, vector<18x18x128xf32>
    tpu.vector_store %arg6[%c0, %c0_0, %c0_1], %0 {strides = array<i32>} : memref<18x18x128xf32, #tpu.memory_space<vmem>>, vector<18x18x128xf32>,
    %c0_2 = arith.constant 0 : index
    %c0_3 = arith.constant 0 : index
    %c0_4 = arith.constant 0 : index
    %c0_5 = arith.constant 0 : index
    %2 = vector.load %arg1[%c0_2, %c0_3, %c0_4, %c0_5] : memref<1x16x16x128xf32, #tpu.memory_space<vmem>>, vector<1x16x16x128xf32>
    %3 = vector.shape_cast %2 : vector<1x16x16x128xf32> to vector<16x16x128xf32>
    %c1 = arith.constant 1 : index
    %c1_6 = arith.constant 1 : index
    %c0_7 = arith.constant 0 : index
    %4 = vector.load %arg6[%c1, %c1_6, %c0_7] : memref<18x18x128xf32, #tpu.memory_space<vmem>>, vector<16x16x128xf32>
    tpu.vector_store %arg6[%c1, %c1_6, %c0_7], %3 {strides = array<i32>} : memref<18x18x128xf32, #tpu.memory_space<vmem>>, vector<16x16x128xf32>,
    %cst_8 = arith.constant 0.000000e+00 : f32
    %5 = vector.broadcast %cst_8 : f32 to vector<16x16x128xf32>
    %c0_9 = arith.constant 0 : index
    %c0_10 = arith.constant 0 : index
    %c0_11 = arith.constant 0 : index
    %6 = vector.load %arg6[%c0_9, %c0_10, %c0_11] : memref<18x18x128xf32, #tpu.memory_space<vmem>>, vector<16x16x128xf32>
    %c0_12 = arith.constant 0 : index
    %c0_13 = arith.constant 0 : index
    %c0_14 = arith.constant 0 : index
    %7 = vector.load %arg2[%c0_12, %c0_13, %c0_14] : memref<3x3x128xf32, #tpu.memory_space<vmem>>, vector<1x1x128xf32>
    %8 = vector.shape_cast %7 : vector<1x1x128xf32> to vector<128xf32>
    %9 = vector.shape_cast %8 : vector<128xf32> to vector<1x1x128xf32>
    %10 = vector.broadcast %9 : vector<1x1x128xf32> to vector<16x16x128xf32>
    %11 = arith.mulf %6, %10 : vector<16x16x128xf32>
    %12 = arith.addf %5, %11 : vector<16x16x128xf32>
    %c0_15 = arith.constant 0 : index
    %c1_16 = arith.constant 1 : index
    %c0_17 = arith.constant 0 : index
    %13 = vector.load %arg6[%c0_15, %c1_16, %c0_17] : memref<18x18x128xf32, #tpu.memory_space<vmem>>, vector<16x16x128xf32>
    %c0_18 = arith.constant 0 : index
    %c1_19 = arith.constant 1 : index
    %c0_20 = arith.constant 0 : index
    %14 = vector.load %arg2[%c0_18, %c1_19, %c0_20] : memref<3x3x128xf32, #tpu.memory_space<vmem>>, vector<1x1x128xf32>
    %15 = vector.shape_cast %14 : vector<1x1x128xf32> to vector<128xf32>
    %16 = vector.shape_cast %15 : vector<128xf32> to vector<1x1x128xf32>
    %17 = vector.broadcast %16 : vector<1x1x128xf32> to vector<16x16x128xf32>
    %18 = arith.mulf %13, %17 : vector<16x16x128xf32>
    %19 = arith.addf %12, %18 : vector<16x16x128xf32>
    %c0_21 = arith.constant 0 : index
    %c2 = arith.constant 2 : index
    %c0_22 = arith.constant 0 : index
    %20 = vector.load %arg6[%c0_21, %c2, %c0_22] : memref<18x18x128xf32, #tpu.memory_space<vmem>>, vector<16x16x128xf32>
    %c0_23 = arith.constant 0 : index
    %c2_24 = arith.constant 2 : index
    %c0_25 = arith.constant 0 : index
    %21 = vector.load %arg2[%c0_23, %c2_24, %c0_25] : memref<3x3x128xf32, #tpu.memory_space<vmem>>, vector<1x1x128xf32>
    %22 = vector.shape_cast %21 : vector<1x1x128xf32> to vector<128xf32>
    %23 = vector.shape_cast %22 : vector<128xf32> to vector<1x1x128xf32>
    %24 = vector.broadcast %23 : vector<1x1x128xf32> to vector<16x16x128xf32>
    %25 = arith.mulf %20, %24 : vector<16x16x128xf32>
    %26 = arith.addf %19, %25 : vector<16x16x128xf32>
    %c1_26 = arith.constant 1 : index
    %c0_27 = arith.constant 0 : index
    %c0_28 = arith.constant 0 : index
    %27 = vector.load %arg6[%c1_26, %c0_27, %c0_28] : memref<18x18x128xf32, #tpu.memory_space<vmem>>, vector<16x16x128xf32>
    %c1_29 = arith.constant 1 : index
    %c0_30 = arith.constant 0 : index
    %c0_31 = arith.constant 0 : index
    %28 = vector.load %arg2[%c1_29, %c0_30, %c0_31] : memref<3x3x128xf32, #tpu.memory_space<vmem>>, vector<1x1x128xf32>
    %29 = vector.shape_cast %28 : vector<1x1x128xf32> to vector<128xf32>
    %30 = vector.shape_cast %29 : vector<128xf32> to vector<1x1x128xf32>
    %31 = vector.broadcast %30 : vector<1x1x128xf32> to vector<16x16x128xf32>
    %32 = arith.mulf %27, %31 : vector<16x16x128xf32>
    %33 = arith.addf %26, %32 : vector<16x16x128xf32>
    %c1_32 = arith.constant 1 : index
    %c1_33 = arith.constant 1 : index
    %c0_34 = arith.constant 0 : index
    %34 = vector.load %arg6[%c1_32, %c1_33, %c0_34] : memref<18x18x128xf32, #tpu.memory_space<vmem>>, vector<16x16x128xf32>
    %c1_35 = arith.constant 1 : index
    %c1_36 = arith.constant 1 : index
    %c0_37 = arith.constant 0 : index
    %35 = vector.load %arg2[%c1_35, %c1_36, %c0_37] : memref<3x3x128xf32, #tpu.memory_space<vmem>>, vector<1x1x128xf32>
    %36 = vector.shape_cast %35 : vector<1x1x128xf32> to vector<128xf32>
    %37 = vector.shape_cast %36 : vector<128xf32> to vector<1x1x128xf32>
    %38 = vector.broadcast %37 : vector<1x1x128xf32> to vector<16x16x128xf32>
    %39 = arith.mulf %34, %38 : vector<16x16x128xf32>
    %40 = arith.addf %33, %39 : vector<16x16x128xf32>
    %c1_38 = arith.constant 1 : index
    %c2_39 = arith.constant 2 : index
    %c0_40 = arith.constant 0 : index
    %41 = vector.load %arg6[%c1_38, %c2_39, %c0_40] : memref<18x18x128xf32, #tpu.memory_space<vmem>>, vector<16x16x128xf32>
    %c1_41 = arith.constant 1 : index
    %c2_42 = arith.constant 2 : index
    %c0_43 = arith.constant 0 : index
    %42 = vector.load %arg2[%c1_41, %c2_42, %c0_43] : memref<3x3x128xf32, #tpu.memory_space<vmem>>, vector<1x1x128xf32>
    %43 = vector.shape_cast %42 : vector<1x1x128xf32> to vector<128xf32>
    %44 = vector.shape_cast %43 : vector<128xf32> to vector<1x1x128xf32>
    %45 = vector.broadcast %44 : vector<1x1x128xf32> to vector<16x16x128xf32>
    %46 = arith.mulf %41, %45 : vector<16x16x128xf32>
    %47 = arith.addf %40, %46 : vector<16x16x128xf32>
    %c2_44 = arith.constant 2 : index
    %c0_45 = arith.constant 0 : index
    %c0_46 = arith.constant 0 : index
    %48 = vector.load %arg6[%c2_44, %c0_45, %c0_46] : memref<18x18x128xf32, #tpu.memory_space<vmem>>, vector<16x16x128xf32>
    %c2_47 = arith.constant 2 : index
    %c0_48 = arith.constant 0 : index
    %c0_49 = arith.constant 0 : index
    %49 = vector.load %arg2[%c2_47, %c0_48, %c0_49] : memref<3x3x128xf32, #tpu.memory_space<vmem>>, vector<1x1x128xf32>
    %50 = vector.shape_cast %49 : vector<1x1x128xf32> to vector<128xf32>
    %51 = vector.shape_cast %50 : vector<128xf32> to vector<1x1x128xf32>
    %52 = vector.broadcast %51 : vector<1x1x128xf32> to vector<16x16x128xf32>
    %53 = arith.mulf %48, %52 : vector<16x16x128xf32>
    %54 = arith.addf %47, %53 : vector<16x16x128xf32>
    %c2_50 = arith.constant 2 : index
    %c1_51 = arith.constant 1 : index
    %c0_52 = arith.constant 0 : index
    %55 = vector.load %arg6[%c2_50, %c1_51, %c0_52] : memref<18x18x128xf32, #tpu.memory_space<vmem>>, vector<16x16x128xf32>
    %c2_53 = arith.constant 2 : index
    %c1_54 = arith.constant 1 : index
    %c0_55 = arith.constant 0 : index
    %56 = vector.load %arg2[%c2_53, %c1_54, %c0_55] : memref<3x3x128xf32, #tpu.memory_space<vmem>>, vector<1x1x128xf32>
    %57 = vector.shape_cast %56 : vector<1x1x128xf32> to vector<128xf32>
    %58 = vector.shape_cast %57 : vector<128xf32> to vector<1x1x128xf32>
    %59 = vector.broadcast %58 : vector<1x1x128xf32> to vector<16x16x128xf32>
    %60 = arith.mulf %55, %59 : vector<16x16x128xf32>
    %61 = arith.addf %54, %60 : vector<16x16x128xf32>
    %c2_56 = arith.constant 2 : index
    %c2_57 = arith.constant 2 : index
    %c0_58 = arith.constant 0 : index
    %62 = vector.load %arg6[%c2_56, %c2_57, %c0_58] : memref<18x18x128xf32, #tpu.memory_space<vmem>>, vector<16x16x128xf32>
    %c2_59 = arith.constant 2 : index
    %c2_60 = arith.constant 2 : index
    %c0_61 = arith.constant 0 : index
    %63 = vector.load %arg2[%c2_59, %c2_60, %c0_61] : memref<3x3x128xf32, #tpu.memory_space<vmem>>, vector<1x1x128xf32>
    %64 = vector.shape_cast %63 : vector<1x1x128xf32> to vector<128xf32>
    %65 = vector.shape_cast %64 : vector<128xf32> to vector<1x1x128xf32>
    %66 = vector.broadcast %65 : vector<1x1x128xf32> to vector<16x16x128xf32>
    %67 = arith.mulf %62, %66 : vector<16x16x128xf32>
    %68 = arith.addf %61, %67 : vector<16x16x128xf32>
    %69 = vector.shape_cast %68 : vector<16x16x128xf32> to vector<256x128xf32>
    %c0_62 = arith.constant 0 : index
    %c0_63 = arith.constant 0 : index
    %70 = vector.load %arg3[%c0_62, %c0_63] : memref<128x128xf32, #tpu.memory_space<vmem>>, vector<128x128xf32>
    %cst_64 = arith.constant dense<0.000000e+00> : vector<256x128xf32>
    %71 = tpu.matmul %69, %70, %cst_64 {dimension_numbers = #tpu.dot_dimension_numbers<[1], [0], [0], [1], [0, 0, 1, 1], [], []>} : vector<256x128xf32>, vector<128x128xf32>, vector<256x128xf32> -> vector<256x128xf32>
    %c0_65 = arith.constant 0 : index
    %c0_66 = arith.constant 0 : index
    %72 = vector.load %arg4[%c0_65, %c0_66] : memref<1x128xf32, #tpu.memory_space<vmem>>, vector<1x128xf32>
    %73 = vector.broadcast %72 : vector<1x128xf32> to vector<256x128xf32>
    %74 = arith.addf %71, %73 : vector<256x128xf32>
    %cst_67 = arith.constant 0.000000e+00 : f32
    %75 = vector.broadcast %cst_67 : f32 to vector<256x128xf32>
    %76 = arith.maximumf %74, %75 : vector<256x128xf32>
    %77 = vector.shape_cast %76 : vector<256x128xf32> to vector<16x16x128xf32>
    %c0_68 = arith.constant 0 : index
    %c0_69 = arith.constant 0 : index
    %c0_70 = arith.constant 0 : index
    %c0_71 = arith.constant 0 : index
    %78 = vector.load %arg5[%c0_68, %c0_69, %c0_70, %c0_71] : memref<1x16x16x128xf32, #tpu.memory_space<vmem>>, vector<1x16x16x128xf32>
    %79 = vector.shape_cast %78 : vector<1x16x16x128xf32> to vector<16x16x128xf32>
    %80 = vector.shape_cast %77 : vector<16x16x128xf32> to vector<1x16x16x128xf32>
    tpu.vector_store %arg5[%c0_68, %c0_69, %c0_70, %c0_71], %80 {strides = array<i32>} : memref<1x16x16x128xf32, #tpu.memory_space<vmem>>, vector<1x16x16x128xf32>,
    return
  }
  func.func @transform_0(%arg0: i32) -> (i32, i32, i32, i32) {
    %c0_i32 = arith.constant 0 : i32
    %c0_i32_0 = arith.constant 0 : i32
    %c0_i32_1 = arith.constant 0 : i32
    %c0_i32_2 = arith.constant 0 : i32
    return %arg0, %c0_i32, %c0_i32_0, %c0_i32_1 : i32, i32, i32, i32
  }
  func.func @transform_1(%arg0: i32) -> (i32, i32, i32) {
    %c0_i32 = arith.constant 0 : i32
    %c0_i32_0 = arith.constant 0 : i32
    %c0_i32_1 = arith.constant 0 : i32
    %c0_i32_2 = arith.constant 0 : i32
    return %c0_i32, %c0_i32_0, %c0_i32_1 : i32, i32, i32
  }
  func.func @transform_2(%arg0: i32) -> (i32, i32) {
    %c0_i32 = arith.constant 0 : i32
    %c0_i32_0 = arith.constant 0 : i32
    %c0_i32_1 = arith.constant 0 : i32
    return %c0_i32, %c0_i32_0 : i32, i32
  }
  func.func @transform_3(%arg0: i32) -> (i32, i32) {
    %c0_i32 = arith.constant 0 : i32
    %c0_i32_0 = arith.constant 0 : i32
    %c0_i32_1 = arith.constant 0 : i32
    return %c0_i32, %c0_i32_0 : i32, i32
  }
  func.func @transform_4(%arg0: i32) -> (i32, i32, i32, i32) {
    %c0_i32 = arith.constant 0 : i32
    %c0_i32_0 = arith.constant 0 : i32
    %c0_i32_1 = arith.constant 0 : i32
    %c0_i32_2 = arith.constant 0 : i32
    return %arg0, %c0_i32, %c0_i32_0, %c0_i32_1 : i32, i32, i32, i32
  }
}

module attributes {stable_mosaic.version = 11 : i64} {
  func.func @_fused_level_kernel(%arg0: i32, %arg1: memref<1x16x16x128xf32, #tpu.memory_space<vmem>>, %arg2: memref<3x3x128xf32, #tpu.memory_space<vmem>>, %arg3: memref<128x128xf32, #tpu.memory_space<vmem>>, %arg4: memref<1x128xf32, #tpu.memory_space<vmem>>, %arg5: memref<1x8x8x128xf32, #tpu.memory_space<vmem>>, %arg6: memref<18x18x128xf32, #tpu.memory_space<vmem>>) attributes {dimension_semantics = [#tpu.dimension_semantics<parallel>], iteration_bounds = array<i64: 2>, scalar_prefetch = 0 : i64, scratch_operands = 1 : i64, tpu.core_type = #tpu.core_type<tc>, window_params = [{transform_indices = @transform_0, window_bounds = array<i64: 1, 16, 16, 128>}, {pipeline_mode = #tpu.pipeline_mode<synchronous>, transform_indices = @transform_1, window_bounds = array<i64: 3, 3, 128>}, {pipeline_mode = #tpu.pipeline_mode<synchronous>, transform_indices = @transform_2, window_bounds = array<i64: 128, 128>}, {pipeline_mode = #tpu.pipeline_mode<synchronous>, transform_indices = @transform_3, window_bounds = array<i64: 1, 128>}, {transform_indices = @transform_4, window_bounds = array<i64: 1, 8, 8, 128>}]} {
    %cst = arith.constant 0.000000e+00 : f32
    %0 = vector.broadcast %cst : f32 to vector<18x18x128xf32>
    %c0 = arith.constant 0 : index
    %c0_0 = arith.constant 0 : index
    %c0_1 = arith.constant 0 : index
    %1 = vector.load %arg6[%c0, %c0_0, %c0_1] : memref<18x18x128xf32, #tpu.memory_space<vmem>>, vector<18x18x128xf32>
    tpu.vector_store %arg6[%c0, %c0_0, %c0_1], %0 {strides = array<i32>} : memref<18x18x128xf32, #tpu.memory_space<vmem>>, vector<18x18x128xf32>,
    %c0_2 = arith.constant 0 : index
    %c0_3 = arith.constant 0 : index
    %c0_4 = arith.constant 0 : index
    %c0_5 = arith.constant 0 : index
    %2 = vector.load %arg1[%c0_2, %c0_3, %c0_4, %c0_5] : memref<1x16x16x128xf32, #tpu.memory_space<vmem>>, vector<1x16x16x128xf32>
    %3 = vector.shape_cast %2 : vector<1x16x16x128xf32> to vector<16x16x128xf32>
    %c1 = arith.constant 1 : index
    %c1_6 = arith.constant 1 : index
    %c0_7 = arith.constant 0 : index
    %4 = vector.load %arg6[%c1, %c1_6, %c0_7] : memref<18x18x128xf32, #tpu.memory_space<vmem>>, vector<16x16x128xf32>
    tpu.vector_store %arg6[%c1, %c1_6, %c0_7], %3 {strides = array<i32>} : memref<18x18x128xf32, #tpu.memory_space<vmem>>, vector<16x16x128xf32>,
    %cst_8 = arith.constant 0.000000e+00 : f32
    %5 = vector.broadcast %cst_8 : f32 to vector<8x8x128xf32>
    %c0_9 = arith.constant 0 : index
    %c0_10 = arith.constant 0 : index
    %c0_11 = arith.constant 0 : index
    %6 = tpu.strided_load %arg6[%c0_9, %c0_10, %c0_11] {strides = array<i32: 2, 2, 1>} : memref<18x18x128xf32, #tpu.memory_space<vmem>>, vector<8x8x128xf32>
    %c0_12 = arith.constant 0 : index
    %c0_13 = arith.constant 0 : index
    %c0_14 = arith.constant 0 : index
    %7 = vector.load %arg2[%c0_12, %c0_13, %c0_14] : memref<3x3x128xf32, #tpu.memory_space<vmem>>, vector<1x1x128xf32>
    %8 = vector.shape_cast %7 : vector<1x1x128xf32> to vector<128xf32>
    %9 = vector.shape_cast %8 : vector<128xf32> to vector<1x1x128xf32>
    %10 = vector.broadcast %9 : vector<1x1x128xf32> to vector<8x8x128xf32>
    %11 = arith.mulf %6, %10 : vector<8x8x128xf32>
    %12 = arith.addf %5, %11 : vector<8x8x128xf32>
    %c0_15 = arith.constant 0 : index
    %c1_16 = arith.constant 1 : index
    %c0_17 = arith.constant 0 : index
    %13 = tpu.strided_load %arg6[%c0_15, %c1_16, %c0_17] {strides = array<i32: 2, 2, 1>} : memref<18x18x128xf32, #tpu.memory_space<vmem>>, vector<8x8x128xf32>
    %c0_18 = arith.constant 0 : index
    %c1_19 = arith.constant 1 : index
    %c0_20 = arith.constant 0 : index
    %14 = vector.load %arg2[%c0_18, %c1_19, %c0_20] : memref<3x3x128xf32, #tpu.memory_space<vmem>>, vector<1x1x128xf32>
    %15 = vector.shape_cast %14 : vector<1x1x128xf32> to vector<128xf32>
    %16 = vector.shape_cast %15 : vector<128xf32> to vector<1x1x128xf32>
    %17 = vector.broadcast %16 : vector<1x1x128xf32> to vector<8x8x128xf32>
    %18 = arith.mulf %13, %17 : vector<8x8x128xf32>
    %19 = arith.addf %12, %18 : vector<8x8x128xf32>
    %c0_21 = arith.constant 0 : index
    %c2 = arith.constant 2 : index
    %c0_22 = arith.constant 0 : index
    %20 = tpu.strided_load %arg6[%c0_21, %c2, %c0_22] {strides = array<i32: 2, 2, 1>} : memref<18x18x128xf32, #tpu.memory_space<vmem>>, vector<8x8x128xf32>
    %c0_23 = arith.constant 0 : index
    %c2_24 = arith.constant 2 : index
    %c0_25 = arith.constant 0 : index
    %21 = vector.load %arg2[%c0_23, %c2_24, %c0_25] : memref<3x3x128xf32, #tpu.memory_space<vmem>>, vector<1x1x128xf32>
    %22 = vector.shape_cast %21 : vector<1x1x128xf32> to vector<128xf32>
    %23 = vector.shape_cast %22 : vector<128xf32> to vector<1x1x128xf32>
    %24 = vector.broadcast %23 : vector<1x1x128xf32> to vector<8x8x128xf32>
    %25 = arith.mulf %20, %24 : vector<8x8x128xf32>
    %26 = arith.addf %19, %25 : vector<8x8x128xf32>
    %c1_26 = arith.constant 1 : index
    %c0_27 = arith.constant 0 : index
    %c0_28 = arith.constant 0 : index
    %27 = tpu.strided_load %arg6[%c1_26, %c0_27, %c0_28] {strides = array<i32: 2, 2, 1>} : memref<18x18x128xf32, #tpu.memory_space<vmem>>, vector<8x8x128xf32>
    %c1_29 = arith.constant 1 : index
    %c0_30 = arith.constant 0 : index
    %c0_31 = arith.constant 0 : index
    %28 = vector.load %arg2[%c1_29, %c0_30, %c0_31] : memref<3x3x128xf32, #tpu.memory_space<vmem>>, vector<1x1x128xf32>
    %29 = vector.shape_cast %28 : vector<1x1x128xf32> to vector<128xf32>
    %30 = vector.shape_cast %29 : vector<128xf32> to vector<1x1x128xf32>
    %31 = vector.broadcast %30 : vector<1x1x128xf32> to vector<8x8x128xf32>
    %32 = arith.mulf %27, %31 : vector<8x8x128xf32>
    %33 = arith.addf %26, %32 : vector<8x8x128xf32>
    %c1_32 = arith.constant 1 : index
    %c1_33 = arith.constant 1 : index
    %c0_34 = arith.constant 0 : index
    %34 = tpu.strided_load %arg6[%c1_32, %c1_33, %c0_34] {strides = array<i32: 2, 2, 1>} : memref<18x18x128xf32, #tpu.memory_space<vmem>>, vector<8x8x128xf32>
    %c1_35 = arith.constant 1 : index
    %c1_36 = arith.constant 1 : index
    %c0_37 = arith.constant 0 : index
    %35 = vector.load %arg2[%c1_35, %c1_36, %c0_37] : memref<3x3x128xf32, #tpu.memory_space<vmem>>, vector<1x1x128xf32>
    %36 = vector.shape_cast %35 : vector<1x1x128xf32> to vector<128xf32>
    %37 = vector.shape_cast %36 : vector<128xf32> to vector<1x1x128xf32>
    %38 = vector.broadcast %37 : vector<1x1x128xf32> to vector<8x8x128xf32>
    %39 = arith.mulf %34, %38 : vector<8x8x128xf32>
    %40 = arith.addf %33, %39 : vector<8x8x128xf32>
    %c1_38 = arith.constant 1 : index
    %c2_39 = arith.constant 2 : index
    %c0_40 = arith.constant 0 : index
    %41 = tpu.strided_load %arg6[%c1_38, %c2_39, %c0_40] {strides = array<i32: 2, 2, 1>} : memref<18x18x128xf32, #tpu.memory_space<vmem>>, vector<8x8x128xf32>
    %c1_41 = arith.constant 1 : index
    %c2_42 = arith.constant 2 : index
    %c0_43 = arith.constant 0 : index
    %42 = vector.load %arg2[%c1_41, %c2_42, %c0_43] : memref<3x3x128xf32, #tpu.memory_space<vmem>>, vector<1x1x128xf32>
    %43 = vector.shape_cast %42 : vector<1x1x128xf32> to vector<128xf32>
    %44 = vector.shape_cast %43 : vector<128xf32> to vector<1x1x128xf32>
    %45 = vector.broadcast %44 : vector<1x1x128xf32> to vector<8x8x128xf32>
    %46 = arith.mulf %41, %45 : vector<8x8x128xf32>
    %47 = arith.addf %40, %46 : vector<8x8x128xf32>
    %c2_44 = arith.constant 2 : index
    %c0_45 = arith.constant 0 : index
    %c0_46 = arith.constant 0 : index
    %48 = tpu.strided_load %arg6[%c2_44, %c0_45, %c0_46] {strides = array<i32: 2, 2, 1>} : memref<18x18x128xf32, #tpu.memory_space<vmem>>, vector<8x8x128xf32>
    %c2_47 = arith.constant 2 : index
    %c0_48 = arith.constant 0 : index
    %c0_49 = arith.constant 0 : index
    %49 = vector.load %arg2[%c2_47, %c0_48, %c0_49] : memref<3x3x128xf32, #tpu.memory_space<vmem>>, vector<1x1x128xf32>
    %50 = vector.shape_cast %49 : vector<1x1x128xf32> to vector<128xf32>
    %51 = vector.shape_cast %50 : vector<128xf32> to vector<1x1x128xf32>
    %52 = vector.broadcast %51 : vector<1x1x128xf32> to vector<8x8x128xf32>
    %53 = arith.mulf %48, %52 : vector<8x8x128xf32>
    %54 = arith.addf %47, %53 : vector<8x8x128xf32>
    %c2_50 = arith.constant 2 : index
    %c1_51 = arith.constant 1 : index
    %c0_52 = arith.constant 0 : index
    %55 = tpu.strided_load %arg6[%c2_50, %c1_51, %c0_52] {strides = array<i32: 2, 2, 1>} : memref<18x18x128xf32, #tpu.memory_space<vmem>>, vector<8x8x128xf32>
    %c2_53 = arith.constant 2 : index
    %c1_54 = arith.constant 1 : index
    %c0_55 = arith.constant 0 : index
    %56 = vector.load %arg2[%c2_53, %c1_54, %c0_55] : memref<3x3x128xf32, #tpu.memory_space<vmem>>, vector<1x1x128xf32>
    %57 = vector.shape_cast %56 : vector<1x1x128xf32> to vector<128xf32>
    %58 = vector.shape_cast %57 : vector<128xf32> to vector<1x1x128xf32>
    %59 = vector.broadcast %58 : vector<1x1x128xf32> to vector<8x8x128xf32>
    %60 = arith.mulf %55, %59 : vector<8x8x128xf32>
    %61 = arith.addf %54, %60 : vector<8x8x128xf32>
    %c2_56 = arith.constant 2 : index
    %c2_57 = arith.constant 2 : index
    %c0_58 = arith.constant 0 : index
    %62 = tpu.strided_load %arg6[%c2_56, %c2_57, %c0_58] {strides = array<i32: 2, 2, 1>} : memref<18x18x128xf32, #tpu.memory_space<vmem>>, vector<8x8x128xf32>
    %c2_59 = arith.constant 2 : index
    %c2_60 = arith.constant 2 : index
    %c0_61 = arith.constant 0 : index
    %63 = vector.load %arg2[%c2_59, %c2_60, %c0_61] : memref<3x3x128xf32, #tpu.memory_space<vmem>>, vector<1x1x128xf32>
    %64 = vector.shape_cast %63 : vector<1x1x128xf32> to vector<128xf32>
    %65 = vector.shape_cast %64 : vector<128xf32> to vector<1x1x128xf32>
    %66 = vector.broadcast %65 : vector<1x1x128xf32> to vector<8x8x128xf32>
    %67 = arith.mulf %62, %66 : vector<8x8x128xf32>
    %68 = arith.addf %61, %67 : vector<8x8x128xf32>
    %69 = vector.shape_cast %68 : vector<8x8x128xf32> to vector<64x128xf32>
    %c0_62 = arith.constant 0 : index
    %c0_63 = arith.constant 0 : index
    %70 = vector.load %arg3[%c0_62, %c0_63] : memref<128x128xf32, #tpu.memory_space<vmem>>, vector<128x128xf32>
    %cst_64 = arith.constant dense<0.000000e+00> : vector<64x128xf32>
    %71 = tpu.matmul %69, %70, %cst_64 {dimension_numbers = #tpu.dot_dimension_numbers<[1], [0], [0], [1], [0, 0, 1, 1], [], []>} : vector<64x128xf32>, vector<128x128xf32>, vector<64x128xf32> -> vector<64x128xf32>
    %c0_65 = arith.constant 0 : index
    %c0_66 = arith.constant 0 : index
    %72 = vector.load %arg4[%c0_65, %c0_66] : memref<1x128xf32, #tpu.memory_space<vmem>>, vector<1x128xf32>
    %73 = vector.broadcast %72 : vector<1x128xf32> to vector<64x128xf32>
    %74 = arith.addf %71, %73 : vector<64x128xf32>
    %cst_67 = arith.constant 0.000000e+00 : f32
    %75 = vector.broadcast %cst_67 : f32 to vector<64x128xf32>
    %76 = arith.maximumf %74, %75 : vector<64x128xf32>
    %77 = vector.shape_cast %76 : vector<64x128xf32> to vector<8x8x128xf32>
    %c0_68 = arith.constant 0 : index
    %c0_69 = arith.constant 0 : index
    %c0_70 = arith.constant 0 : index
    %c0_71 = arith.constant 0 : index
    %78 = vector.load %arg5[%c0_68, %c0_69, %c0_70, %c0_71] : memref<1x8x8x128xf32, #tpu.memory_space<vmem>>, vector<1x8x8x128xf32>
    %79 = vector.shape_cast %78 : vector<1x8x8x128xf32> to vector<8x8x128xf32>
    %80 = vector.shape_cast %77 : vector<8x8x128xf32> to vector<1x8x8x128xf32>
    tpu.vector_store %arg5[%c0_68, %c0_69, %c0_70, %c0_71], %80 {strides = array<i32>} : memref<1x8x8x128xf32, #tpu.memory_space<vmem>>, vector<1x8x8x128xf32>,
    return
  }
  func.func @transform_0(%arg0: i32) -> (i32, i32, i32, i32) {
    %c0_i32 = arith.constant 0 : i32
    %c0_i32_0 = arith.constant 0 : i32
    %c0_i32_1 = arith.constant 0 : i32
    %c0_i32_2 = arith.constant 0 : i32
    return %arg0, %c0_i32, %c0_i32_0, %c0_i32_1 : i32, i32, i32, i32
  }
  func.func @transform_1(%arg0: i32) -> (i32, i32, i32) {
    %c0_i32 = arith.constant 0 : i32
    %c0_i32_0 = arith.constant 0 : i32
    %c0_i32_1 = arith.constant 0 : i32
    %c0_i32_2 = arith.constant 0 : i32
    return %c0_i32, %c0_i32_0, %c0_i32_1 : i32, i32, i32
  }
  func.func @transform_2(%arg0: i32) -> (i32, i32) {
    %c0_i32 = arith.constant 0 : i32
    %c0_i32_0 = arith.constant 0 : i32
    %c0_i32_1 = arith.constant 0 : i32
    return %c0_i32, %c0_i32_0 : i32, i32
  }
  func.func @transform_3(%arg0: i32) -> (i32, i32) {
    %c0_i32 = arith.constant 0 : i32
    %c0_i32_0 = arith.constant 0 : i32
    %c0_i32_1 = arith.constant 0 : i32
    return %c0_i32, %c0_i32_0 : i32, i32
  }
  func.func @transform_4(%arg0: i32) -> (i32, i32, i32, i32) {
    %c0_i32 = arith.constant 0 : i32
    %c0_i32_0 = arith.constant 0 : i32
    %c0_i32_1 = arith.constant 0 : i32
    %c0_i32_2 = arith.constant 0 : i32
    return %arg0, %c0_i32, %c0_i32_0, %c0_i32_1 : i32, i32, i32, i32
  }
}

module attributes {stable_mosaic.version = 11 : i64} {
  func.func @_fused_level_kernel(%arg0: i32, %arg1: memref<1x8x8x128xf32, #tpu.memory_space<vmem>>, %arg2: memref<3x3x128xf32, #tpu.memory_space<vmem>>, %arg3: memref<128x128xf32, #tpu.memory_space<vmem>>, %arg4: memref<1x128xf32, #tpu.memory_space<vmem>>, %arg5: memref<1x4x4x128xf32, #tpu.memory_space<vmem>>, %arg6: memref<10x10x128xf32, #tpu.memory_space<vmem>>) attributes {dimension_semantics = [#tpu.dimension_semantics<parallel>], iteration_bounds = array<i64: 2>, scalar_prefetch = 0 : i64, scratch_operands = 1 : i64, tpu.core_type = #tpu.core_type<tc>, window_params = [{transform_indices = @transform_0, window_bounds = array<i64: 1, 8, 8, 128>}, {pipeline_mode = #tpu.pipeline_mode<synchronous>, transform_indices = @transform_1, window_bounds = array<i64: 3, 3, 128>}, {pipeline_mode = #tpu.pipeline_mode<synchronous>, transform_indices = @transform_2, window_bounds = array<i64: 128, 128>}, {pipeline_mode = #tpu.pipeline_mode<synchronous>, transform_indices = @transform_3, window_bounds = array<i64: 1, 128>}, {transform_indices = @transform_4, window_bounds = array<i64: 1, 4, 4, 128>}]} {
    %cst = arith.constant 0.000000e+00 : f32
    %0 = vector.broadcast %cst : f32 to vector<10x10x128xf32>
    %c0 = arith.constant 0 : index
    %c0_0 = arith.constant 0 : index
    %c0_1 = arith.constant 0 : index
    %1 = vector.load %arg6[%c0, %c0_0, %c0_1] : memref<10x10x128xf32, #tpu.memory_space<vmem>>, vector<10x10x128xf32>
    tpu.vector_store %arg6[%c0, %c0_0, %c0_1], %0 {strides = array<i32>} : memref<10x10x128xf32, #tpu.memory_space<vmem>>, vector<10x10x128xf32>,
    %c0_2 = arith.constant 0 : index
    %c0_3 = arith.constant 0 : index
    %c0_4 = arith.constant 0 : index
    %c0_5 = arith.constant 0 : index
    %2 = vector.load %arg1[%c0_2, %c0_3, %c0_4, %c0_5] : memref<1x8x8x128xf32, #tpu.memory_space<vmem>>, vector<1x8x8x128xf32>
    %3 = vector.shape_cast %2 : vector<1x8x8x128xf32> to vector<8x8x128xf32>
    %c1 = arith.constant 1 : index
    %c1_6 = arith.constant 1 : index
    %c0_7 = arith.constant 0 : index
    %4 = vector.load %arg6[%c1, %c1_6, %c0_7] : memref<10x10x128xf32, #tpu.memory_space<vmem>>, vector<8x8x128xf32>
    tpu.vector_store %arg6[%c1, %c1_6, %c0_7], %3 {strides = array<i32>} : memref<10x10x128xf32, #tpu.memory_space<vmem>>, vector<8x8x128xf32>,
    %cst_8 = arith.constant 0.000000e+00 : f32
    %5 = vector.broadcast %cst_8 : f32 to vector<4x4x128xf32>
    %c0_9 = arith.constant 0 : index
    %c0_10 = arith.constant 0 : index
    %c0_11 = arith.constant 0 : index
    %6 = tpu.strided_load %arg6[%c0_9, %c0_10, %c0_11] {strides = array<i32: 2, 2, 1>} : memref<10x10x128xf32, #tpu.memory_space<vmem>>, vector<4x4x128xf32>
    %c0_12 = arith.constant 0 : index
    %c0_13 = arith.constant 0 : index
    %c0_14 = arith.constant 0 : index
    %7 = vector.load %arg2[%c0_12, %c0_13, %c0_14] : memref<3x3x128xf32, #tpu.memory_space<vmem>>, vector<1x1x128xf32>
    %8 = vector.shape_cast %7 : vector<1x1x128xf32> to vector<128xf32>
    %9 = vector.shape_cast %8 : vector<128xf32> to vector<1x1x128xf32>
    %10 = vector.broadcast %9 : vector<1x1x128xf32> to vector<4x4x128xf32>
    %11 = arith.mulf %6, %10 : vector<4x4x128xf32>
    %12 = arith.addf %5, %11 : vector<4x4x128xf32>
    %c0_15 = arith.constant 0 : index
    %c1_16 = arith.constant 1 : index
    %c0_17 = arith.constant 0 : index
    %13 = tpu.strided_load %arg6[%c0_15, %c1_16, %c0_17] {strides = array<i32: 2, 2, 1>} : memref<10x10x128xf32, #tpu.memory_space<vmem>>, vector<4x4x128xf32>
    %c0_18 = arith.constant 0 : index
    %c1_19 = arith.constant 1 : index
    %c0_20 = arith.constant 0 : index
    %14 = vector.load %arg2[%c0_18, %c1_19, %c0_20] : memref<3x3x128xf32, #tpu.memory_space<vmem>>, vector<1x1x128xf32>
    %15 = vector.shape_cast %14 : vector<1x1x128xf32> to vector<128xf32>
    %16 = vector.shape_cast %15 : vector<128xf32> to vector<1x1x128xf32>
    %17 = vector.broadcast %16 : vector<1x1x128xf32> to vector<4x4x128xf32>
    %18 = arith.mulf %13, %17 : vector<4x4x128xf32>
    %19 = arith.addf %12, %18 : vector<4x4x128xf32>
    %c0_21 = arith.constant 0 : index
    %c2 = arith.constant 2 : index
    %c0_22 = arith.constant 0 : index
    %20 = tpu.strided_load %arg6[%c0_21, %c2, %c0_22] {strides = array<i32: 2, 2, 1>} : memref<10x10x128xf32, #tpu.memory_space<vmem>>, vector<4x4x128xf32>
    %c0_23 = arith.constant 0 : index
    %c2_24 = arith.constant 2 : index
    %c0_25 = arith.constant 0 : index
    %21 = vector.load %arg2[%c0_23, %c2_24, %c0_25] : memref<3x3x128xf32, #tpu.memory_space<vmem>>, vector<1x1x128xf32>
    %22 = vector.shape_cast %21 : vector<1x1x128xf32> to vector<128xf32>
    %23 = vector.shape_cast %22 : vector<128xf32> to vector<1x1x128xf32>
    %24 = vector.broadcast %23 : vector<1x1x128xf32> to vector<4x4x128xf32>
    %25 = arith.mulf %20, %24 : vector<4x4x128xf32>
    %26 = arith.addf %19, %25 : vector<4x4x128xf32>
    %c1_26 = arith.constant 1 : index
    %c0_27 = arith.constant 0 : index
    %c0_28 = arith.constant 0 : index
    %27 = tpu.strided_load %arg6[%c1_26, %c0_27, %c0_28] {strides = array<i32: 2, 2, 1>} : memref<10x10x128xf32, #tpu.memory_space<vmem>>, vector<4x4x128xf32>
    %c1_29 = arith.constant 1 : index
    %c0_30 = arith.constant 0 : index
    %c0_31 = arith.constant 0 : index
    %28 = vector.load %arg2[%c1_29, %c0_30, %c0_31] : memref<3x3x128xf32, #tpu.memory_space<vmem>>, vector<1x1x128xf32>
    %29 = vector.shape_cast %28 : vector<1x1x128xf32> to vector<128xf32>
    %30 = vector.shape_cast %29 : vector<128xf32> to vector<1x1x128xf32>
    %31 = vector.broadcast %30 : vector<1x1x128xf32> to vector<4x4x128xf32>
    %32 = arith.mulf %27, %31 : vector<4x4x128xf32>
    %33 = arith.addf %26, %32 : vector<4x4x128xf32>
    %c1_32 = arith.constant 1 : index
    %c1_33 = arith.constant 1 : index
    %c0_34 = arith.constant 0 : index
    %34 = tpu.strided_load %arg6[%c1_32, %c1_33, %c0_34] {strides = array<i32: 2, 2, 1>} : memref<10x10x128xf32, #tpu.memory_space<vmem>>, vector<4x4x128xf32>
    %c1_35 = arith.constant 1 : index
    %c1_36 = arith.constant 1 : index
    %c0_37 = arith.constant 0 : index
    %35 = vector.load %arg2[%c1_35, %c1_36, %c0_37] : memref<3x3x128xf32, #tpu.memory_space<vmem>>, vector<1x1x128xf32>
    %36 = vector.shape_cast %35 : vector<1x1x128xf32> to vector<128xf32>
    %37 = vector.shape_cast %36 : vector<128xf32> to vector<1x1x128xf32>
    %38 = vector.broadcast %37 : vector<1x1x128xf32> to vector<4x4x128xf32>
    %39 = arith.mulf %34, %38 : vector<4x4x128xf32>
    %40 = arith.addf %33, %39 : vector<4x4x128xf32>
    %c1_38 = arith.constant 1 : index
    %c2_39 = arith.constant 2 : index
    %c0_40 = arith.constant 0 : index
    %41 = tpu.strided_load %arg6[%c1_38, %c2_39, %c0_40] {strides = array<i32: 2, 2, 1>} : memref<10x10x128xf32, #tpu.memory_space<vmem>>, vector<4x4x128xf32>
    %c1_41 = arith.constant 1 : index
    %c2_42 = arith.constant 2 : index
    %c0_43 = arith.constant 0 : index
    %42 = vector.load %arg2[%c1_41, %c2_42, %c0_43] : memref<3x3x128xf32, #tpu.memory_space<vmem>>, vector<1x1x128xf32>
    %43 = vector.shape_cast %42 : vector<1x1x128xf32> to vector<128xf32>
    %44 = vector.shape_cast %43 : vector<128xf32> to vector<1x1x128xf32>
    %45 = vector.broadcast %44 : vector<1x1x128xf32> to vector<4x4x128xf32>
    %46 = arith.mulf %41, %45 : vector<4x4x128xf32>
    %47 = arith.addf %40, %46 : vector<4x4x128xf32>
    %c2_44 = arith.constant 2 : index
    %c0_45 = arith.constant 0 : index
    %c0_46 = arith.constant 0 : index
    %48 = tpu.strided_load %arg6[%c2_44, %c0_45, %c0_46] {strides = array<i32: 2, 2, 1>} : memref<10x10x128xf32, #tpu.memory_space<vmem>>, vector<4x4x128xf32>
    %c2_47 = arith.constant 2 : index
    %c0_48 = arith.constant 0 : index
    %c0_49 = arith.constant 0 : index
    %49 = vector.load %arg2[%c2_47, %c0_48, %c0_49] : memref<3x3x128xf32, #tpu.memory_space<vmem>>, vector<1x1x128xf32>
    %50 = vector.shape_cast %49 : vector<1x1x128xf32> to vector<128xf32>
    %51 = vector.shape_cast %50 : vector<128xf32> to vector<1x1x128xf32>
    %52 = vector.broadcast %51 : vector<1x1x128xf32> to vector<4x4x128xf32>
    %53 = arith.mulf %48, %52 : vector<4x4x128xf32>
    %54 = arith.addf %47, %53 : vector<4x4x128xf32>
    %c2_50 = arith.constant 2 : index
    %c1_51 = arith.constant 1 : index
    %c0_52 = arith.constant 0 : index
    %55 = tpu.strided_load %arg6[%c2_50, %c1_51, %c0_52] {strides = array<i32: 2, 2, 1>} : memref<10x10x128xf32, #tpu.memory_space<vmem>>, vector<4x4x128xf32>
    %c2_53 = arith.constant 2 : index
    %c1_54 = arith.constant 1 : index
    %c0_55 = arith.constant 0 : index
    %56 = vector.load %arg2[%c2_53, %c1_54, %c0_55] : memref<3x3x128xf32, #tpu.memory_space<vmem>>, vector<1x1x128xf32>
    %57 = vector.shape_cast %56 : vector<1x1x128xf32> to vector<128xf32>
    %58 = vector.shape_cast %57 : vector<128xf32> to vector<1x1x128xf32>
    %59 = vector.broadcast %58 : vector<1x1x128xf32> to vector<4x4x128xf32>
    %60 = arith.mulf %55, %59 : vector<4x4x128xf32>
    %61 = arith.addf %54, %60 : vector<4x4x128xf32>
    %c2_56 = arith.constant 2 : index
    %c2_57 = arith.constant 2 : index
    %c0_58 = arith.constant 0 : index
    %62 = tpu.strided_load %arg6[%c2_56, %c2_57, %c0_58] {strides = array<i32: 2, 2, 1>} : memref<10x10x128xf32, #tpu.memory_space<vmem>>, vector<4x4x128xf32>
    %c2_59 = arith.constant 2 : index
    %c2_60 = arith.constant 2 : index
    %c0_61 = arith.constant 0 : index
    %63 = vector.load %arg2[%c2_59, %c2_60, %c0_61] : memref<3x3x128xf32, #tpu.memory_space<vmem>>, vector<1x1x128xf32>
    %64 = vector.shape_cast %63 : vector<1x1x128xf32> to vector<128xf32>
    %65 = vector.shape_cast %64 : vector<128xf32> to vector<1x1x128xf32>
    %66 = vector.broadcast %65 : vector<1x1x128xf32> to vector<4x4x128xf32>
    %67 = arith.mulf %62, %66 : vector<4x4x128xf32>
    %68 = arith.addf %61, %67 : vector<4x4x128xf32>
    %69 = vector.shape_cast %68 : vector<4x4x128xf32> to vector<16x128xf32>
    %c0_62 = arith.constant 0 : index
    %c0_63 = arith.constant 0 : index
    %70 = vector.load %arg3[%c0_62, %c0_63] : memref<128x128xf32, #tpu.memory_space<vmem>>, vector<128x128xf32>
    %cst_64 = arith.constant dense<0.000000e+00> : vector<16x128xf32>
    %71 = tpu.matmul %69, %70, %cst_64 {dimension_numbers = #tpu.dot_dimension_numbers<[1], [0], [0], [1], [0, 0, 1, 1], [], []>} : vector<16x128xf32>, vector<128x128xf32>, vector<16x128xf32> -> vector<16x128xf32>
    %c0_65 = arith.constant 0 : index
    %c0_66 = arith.constant 0 : index
    %72 = vector.load %arg4[%c0_65, %c0_66] : memref<1x128xf32, #tpu.memory_space<vmem>>, vector<1x128xf32>
    %73 = vector.broadcast %72 : vector<1x128xf32> to vector<16x128xf32>
    %74 = arith.addf %71, %73 : vector<16x128xf32>
    %cst_67 = arith.constant 0.000000e+00 : f32
    %75 = vector.broadcast %cst_67 : f32 to vector<16x128xf32>
    %76 = arith.maximumf %74, %75 : vector<16x128xf32>
    %77 = vector.shape_cast %76 : vector<16x128xf32> to vector<4x4x128xf32>
    %c0_68 = arith.constant 0 : index
    %c0_69 = arith.constant 0 : index
    %c0_70 = arith.constant 0 : index
    %c0_71 = arith.constant 0 : index
    %78 = vector.load %arg5[%c0_68, %c0_69, %c0_70, %c0_71] : memref<1x4x4x128xf32, #tpu.memory_space<vmem>>, vector<1x4x4x128xf32>
    %79 = vector.shape_cast %78 : vector<1x4x4x128xf32> to vector<4x4x128xf32>
    %80 = vector.shape_cast %77 : vector<4x4x128xf32> to vector<1x4x4x128xf32>
    tpu.vector_store %arg5[%c0_68, %c0_69, %c0_70, %c0_71], %80 {strides = array<i32>} : memref<1x4x4x128xf32, #tpu.memory_space<vmem>>, vector<1x4x4x128xf32>,
    return
  }
  func.func @transform_0(%arg0: i32) -> (i32, i32, i32, i32) {
    %c0_i32 = arith.constant 0 : i32
    %c0_i32_0 = arith.constant 0 : i32
    %c0_i32_1 = arith.constant 0 : i32
    %c0_i32_2 = arith.constant 0 : i32
    return %arg0, %c0_i32, %c0_i32_0, %c0_i32_1 : i32, i32, i32, i32
  }
  func.func @transform_1(%arg0: i32) -> (i32, i32, i32) {
    %c0_i32 = arith.constant 0 : i32
    %c0_i32_0 = arith.constant 0 : i32
    %c0_i32_1 = arith.constant 0 : i32
    %c0_i32_2 = arith.constant 0 : i32
    return %c0_i32, %c0_i32_0, %c0_i32_1 : i32, i32, i32
  }
  func.func @transform_2(%arg0: i32) -> (i32, i32) {
    %c0_i32 = arith.constant 0 : i32
    %c0_i32_0 = arith.constant 0 : i32
    %c0_i32_1 = arith.constant 0 : i32
    return %c0_i32, %c0_i32_0 : i32, i32
  }
  func.func @transform_3(%arg0: i32) -> (i32, i32) {
    %c0_i32 = arith.constant 0 : i32
    %c0_i32_0 = arith.constant 0 : i32
    %c0_i32_1 = arith.constant 0 : i32
    return %c0_i32, %c0_i32_0 : i32, i32
  }
  func.func @transform_4(%arg0: i32) -> (i32, i32, i32, i32) {
    %c0_i32 = arith.constant 0 : i32
    %c0_i32_0 = arith.constant 0 : i32
    %c0_i32_1 = arith.constant 0 : i32
    %c0_i32_2 = arith.constant 0 : i32
    return %arg0, %c0_i32, %c0_i32_0, %c0_i32_1 : i32, i32, i32, i32
  }
}

module attributes {stable_mosaic.version = 11 : i64} {
  func.func @_fused_level_kernel(%arg0: i32, %arg1: memref<1x4x4x128xf32, #tpu.memory_space<vmem>>, %arg2: memref<3x3x128xf32, #tpu.memory_space<vmem>>, %arg3: memref<128x128xf32, #tpu.memory_space<vmem>>, %arg4: memref<1x128xf32, #tpu.memory_space<vmem>>, %arg5: memref<1x2x2x128xf32, #tpu.memory_space<vmem>>, %arg6: memref<6x6x128xf32, #tpu.memory_space<vmem>>) attributes {dimension_semantics = [#tpu.dimension_semantics<parallel>], iteration_bounds = array<i64: 2>, scalar_prefetch = 0 : i64, scratch_operands = 1 : i64, tpu.core_type = #tpu.core_type<tc>, window_params = [{transform_indices = @transform_0, window_bounds = array<i64: 1, 4, 4, 128>}, {pipeline_mode = #tpu.pipeline_mode<synchronous>, transform_indices = @transform_1, window_bounds = array<i64: 3, 3, 128>}, {pipeline_mode = #tpu.pipeline_mode<synchronous>, transform_indices = @transform_2, window_bounds = array<i64: 128, 128>}, {pipeline_mode = #tpu.pipeline_mode<synchronous>, transform_indices = @transform_3, window_bounds = array<i64: 1, 128>}, {transform_indices = @transform_4, window_bounds = array<i64: 1, 2, 2, 128>}]} {
    %cst = arith.constant 0.000000e+00 : f32
    %0 = vector.broadcast %cst : f32 to vector<6x6x128xf32>
    %c0 = arith.constant 0 : index
    %c0_0 = arith.constant 0 : index
    %c0_1 = arith.constant 0 : index
    %1 = vector.load %arg6[%c0, %c0_0, %c0_1] : memref<6x6x128xf32, #tpu.memory_space<vmem>>, vector<6x6x128xf32>
    tpu.vector_store %arg6[%c0, %c0_0, %c0_1], %0 {strides = array<i32>} : memref<6x6x128xf32, #tpu.memory_space<vmem>>, vector<6x6x128xf32>,
    %c0_2 = arith.constant 0 : index
    %c0_3 = arith.constant 0 : index
    %c0_4 = arith.constant 0 : index
    %c0_5 = arith.constant 0 : index
    %2 = vector.load %arg1[%c0_2, %c0_3, %c0_4, %c0_5] : memref<1x4x4x128xf32, #tpu.memory_space<vmem>>, vector<1x4x4x128xf32>
    %3 = vector.shape_cast %2 : vector<1x4x4x128xf32> to vector<4x4x128xf32>
    %c1 = arith.constant 1 : index
    %c1_6 = arith.constant 1 : index
    %c0_7 = arith.constant 0 : index
    %4 = vector.load %arg6[%c1, %c1_6, %c0_7] : memref<6x6x128xf32, #tpu.memory_space<vmem>>, vector<4x4x128xf32>
    tpu.vector_store %arg6[%c1, %c1_6, %c0_7], %3 {strides = array<i32>} : memref<6x6x128xf32, #tpu.memory_space<vmem>>, vector<4x4x128xf32>,
    %cst_8 = arith.constant 0.000000e+00 : f32
    %5 = vector.broadcast %cst_8 : f32 to vector<2x2x128xf32>
    %c0_9 = arith.constant 0 : index
    %c0_10 = arith.constant 0 : index
    %c0_11 = arith.constant 0 : index
    %6 = tpu.strided_load %arg6[%c0_9, %c0_10, %c0_11] {strides = array<i32: 2, 2, 1>} : memref<6x6x128xf32, #tpu.memory_space<vmem>>, vector<2x2x128xf32>
    %c0_12 = arith.constant 0 : index
    %c0_13 = arith.constant 0 : index
    %c0_14 = arith.constant 0 : index
    %7 = vector.load %arg2[%c0_12, %c0_13, %c0_14] : memref<3x3x128xf32, #tpu.memory_space<vmem>>, vector<1x1x128xf32>
    %8 = vector.shape_cast %7 : vector<1x1x128xf32> to vector<128xf32>
    %9 = vector.shape_cast %8 : vector<128xf32> to vector<1x1x128xf32>
    %10 = vector.broadcast %9 : vector<1x1x128xf32> to vector<2x2x128xf32>
    %11 = arith.mulf %6, %10 : vector<2x2x128xf32>
    %12 = arith.addf %5, %11 : vector<2x2x128xf32>
    %c0_15 = arith.constant 0 : index
    %c1_16 = arith.constant 1 : index
    %c0_17 = arith.constant 0 : index
    %13 = tpu.strided_load %arg6[%c0_15, %c1_16, %c0_17] {strides = array<i32: 2, 2, 1>} : memref<6x6x128xf32, #tpu.memory_space<vmem>>, vector<2x2x128xf32>
    %c0_18 = arith.constant 0 : index
    %c1_19 = arith.constant 1 : index
    %c0_20 = arith.constant 0 : index
    %14 = vector.load %arg2[%c0_18, %c1_19, %c0_20] : memref<3x3x128xf32, #tpu.memory_space<vmem>>, vector<1x1x128xf32>
    %15 = vector.shape_cast %14 : vector<1x1x128xf32> to vector<128xf32>
    %16 = vector.shape_cast %15 : vector<128xf32> to vector<1x1x128xf32>
    %17 = vector.broadcast %16 : vector<1x1x128xf32> to vector<2x2x128xf32>
    %18 = arith.mulf %13, %17 : vector<2x2x128xf32>
    %19 = arith.addf %12, %18 : vector<2x2x128xf32>
    %c0_21 = arith.constant 0 : index
    %c2 = arith.constant 2 : index
    %c0_22 = arith.constant 0 : index
    %20 = tpu.strided_load %arg6[%c0_21, %c2, %c0_22] {strides = array<i32: 2, 2, 1>} : memref<6x6x128xf32, #tpu.memory_space<vmem>>, vector<2x2x128xf32>
    %c0_23 = arith.constant 0 : index
    %c2_24 = arith.constant 2 : index
    %c0_25 = arith.constant 0 : index
    %21 = vector.load %arg2[%c0_23, %c2_24, %c0_25] : memref<3x3x128xf32, #tpu.memory_space<vmem>>, vector<1x1x128xf32>
    %22 = vector.shape_cast %21 : vector<1x1x128xf32> to vector<128xf32>
    %23 = vector.shape_cast %22 : vector<128xf32> to vector<1x1x128xf32>
    %24 = vector.broadcast %23 : vector<1x1x128xf32> to vector<2x2x128xf32>
    %25 = arith.mulf %20, %24 : vector<2x2x128xf32>
    %26 = arith.addf %19, %25 : vector<2x2x128xf32>
    %c1_26 = arith.constant 1 : index
    %c0_27 = arith.constant 0 : index
    %c0_28 = arith.constant 0 : index
    %27 = tpu.strided_load %arg6[%c1_26, %c0_27, %c0_28] {strides = array<i32: 2, 2, 1>} : memref<6x6x128xf32, #tpu.memory_space<vmem>>, vector<2x2x128xf32>
    %c1_29 = arith.constant 1 : index
    %c0_30 = arith.constant 0 : index
    %c0_31 = arith.constant 0 : index
    %28 = vector.load %arg2[%c1_29, %c0_30, %c0_31] : memref<3x3x128xf32, #tpu.memory_space<vmem>>, vector<1x1x128xf32>
    %29 = vector.shape_cast %28 : vector<1x1x128xf32> to vector<128xf32>
    %30 = vector.shape_cast %29 : vector<128xf32> to vector<1x1x128xf32>
    %31 = vector.broadcast %30 : vector<1x1x128xf32> to vector<2x2x128xf32>
    %32 = arith.mulf %27, %31 : vector<2x2x128xf32>
    %33 = arith.addf %26, %32 : vector<2x2x128xf32>
    %c1_32 = arith.constant 1 : index
    %c1_33 = arith.constant 1 : index
    %c0_34 = arith.constant 0 : index
    %34 = tpu.strided_load %arg6[%c1_32, %c1_33, %c0_34] {strides = array<i32: 2, 2, 1>} : memref<6x6x128xf32, #tpu.memory_space<vmem>>, vector<2x2x128xf32>
    %c1_35 = arith.constant 1 : index
    %c1_36 = arith.constant 1 : index
    %c0_37 = arith.constant 0 : index
    %35 = vector.load %arg2[%c1_35, %c1_36, %c0_37] : memref<3x3x128xf32, #tpu.memory_space<vmem>>, vector<1x1x128xf32>
    %36 = vector.shape_cast %35 : vector<1x1x128xf32> to vector<128xf32>
    %37 = vector.shape_cast %36 : vector<128xf32> to vector<1x1x128xf32>
    %38 = vector.broadcast %37 : vector<1x1x128xf32> to vector<2x2x128xf32>
    %39 = arith.mulf %34, %38 : vector<2x2x128xf32>
    %40 = arith.addf %33, %39 : vector<2x2x128xf32>
    %c1_38 = arith.constant 1 : index
    %c2_39 = arith.constant 2 : index
    %c0_40 = arith.constant 0 : index
    %41 = tpu.strided_load %arg6[%c1_38, %c2_39, %c0_40] {strides = array<i32: 2, 2, 1>} : memref<6x6x128xf32, #tpu.memory_space<vmem>>, vector<2x2x128xf32>
    %c1_41 = arith.constant 1 : index
    %c2_42 = arith.constant 2 : index
    %c0_43 = arith.constant 0 : index
    %42 = vector.load %arg2[%c1_41, %c2_42, %c0_43] : memref<3x3x128xf32, #tpu.memory_space<vmem>>, vector<1x1x128xf32>
    %43 = vector.shape_cast %42 : vector<1x1x128xf32> to vector<128xf32>
    %44 = vector.shape_cast %43 : vector<128xf32> to vector<1x1x128xf32>
    %45 = vector.broadcast %44 : vector<1x1x128xf32> to vector<2x2x128xf32>
    %46 = arith.mulf %41, %45 : vector<2x2x128xf32>
    %47 = arith.addf %40, %46 : vector<2x2x128xf32>
    %c2_44 = arith.constant 2 : index
    %c0_45 = arith.constant 0 : index
    %c0_46 = arith.constant 0 : index
    %48 = tpu.strided_load %arg6[%c2_44, %c0_45, %c0_46] {strides = array<i32: 2, 2, 1>} : memref<6x6x128xf32, #tpu.memory_space<vmem>>, vector<2x2x128xf32>
    %c2_47 = arith.constant 2 : index
    %c0_48 = arith.constant 0 : index
    %c0_49 = arith.constant 0 : index
    %49 = vector.load %arg2[%c2_47, %c0_48, %c0_49] : memref<3x3x128xf32, #tpu.memory_space<vmem>>, vector<1x1x128xf32>
    %50 = vector.shape_cast %49 : vector<1x1x128xf32> to vector<128xf32>
    %51 = vector.shape_cast %50 : vector<128xf32> to vector<1x1x128xf32>
    %52 = vector.broadcast %51 : vector<1x1x128xf32> to vector<2x2x128xf32>
    %53 = arith.mulf %48, %52 : vector<2x2x128xf32>
    %54 = arith.addf %47, %53 : vector<2x2x128xf32>
    %c2_50 = arith.constant 2 : index
    %c1_51 = arith.constant 1 : index
    %c0_52 = arith.constant 0 : index
    %55 = tpu.strided_load %arg6[%c2_50, %c1_51, %c0_52] {strides = array<i32: 2, 2, 1>} : memref<6x6x128xf32, #tpu.memory_space<vmem>>, vector<2x2x128xf32>
    %c2_53 = arith.constant 2 : index
    %c1_54 = arith.constant 1 : index
    %c0_55 = arith.constant 0 : index
    %56 = vector.load %arg2[%c2_53, %c1_54, %c0_55] : memref<3x3x128xf32, #tpu.memory_space<vmem>>, vector<1x1x128xf32>
    %57 = vector.shape_cast %56 : vector<1x1x128xf32> to vector<128xf32>
    %58 = vector.shape_cast %57 : vector<128xf32> to vector<1x1x128xf32>
    %59 = vector.broadcast %58 : vector<1x1x128xf32> to vector<2x2x128xf32>
    %60 = arith.mulf %55, %59 : vector<2x2x128xf32>
    %61 = arith.addf %54, %60 : vector<2x2x128xf32>
    %c2_56 = arith.constant 2 : index
    %c2_57 = arith.constant 2 : index
    %c0_58 = arith.constant 0 : index
    %62 = tpu.strided_load %arg6[%c2_56, %c2_57, %c0_58] {strides = array<i32: 2, 2, 1>} : memref<6x6x128xf32, #tpu.memory_space<vmem>>, vector<2x2x128xf32>
    %c2_59 = arith.constant 2 : index
    %c2_60 = arith.constant 2 : index
    %c0_61 = arith.constant 0 : index
    %63 = vector.load %arg2[%c2_59, %c2_60, %c0_61] : memref<3x3x128xf32, #tpu.memory_space<vmem>>, vector<1x1x128xf32>
    %64 = vector.shape_cast %63 : vector<1x1x128xf32> to vector<128xf32>
    %65 = vector.shape_cast %64 : vector<128xf32> to vector<1x1x128xf32>
    %66 = vector.broadcast %65 : vector<1x1x128xf32> to vector<2x2x128xf32>
    %67 = arith.mulf %62, %66 : vector<2x2x128xf32>
    %68 = arith.addf %61, %67 : vector<2x2x128xf32>
    %69 = vector.shape_cast %68 : vector<2x2x128xf32> to vector<4x128xf32>
    %c0_62 = arith.constant 0 : index
    %c0_63 = arith.constant 0 : index
    %70 = vector.load %arg3[%c0_62, %c0_63] : memref<128x128xf32, #tpu.memory_space<vmem>>, vector<128x128xf32>
    %cst_64 = arith.constant dense<0.000000e+00> : vector<4x128xf32>
    %71 = tpu.matmul %69, %70, %cst_64 {dimension_numbers = #tpu.dot_dimension_numbers<[1], [0], [0], [1], [0, 0, 1, 1], [], []>} : vector<4x128xf32>, vector<128x128xf32>, vector<4x128xf32> -> vector<4x128xf32>
    %c0_65 = arith.constant 0 : index
    %c0_66 = arith.constant 0 : index
    %72 = vector.load %arg4[%c0_65, %c0_66] : memref<1x128xf32, #tpu.memory_space<vmem>>, vector<1x128xf32>
    %73 = vector.broadcast %72 : vector<1x128xf32> to vector<4x128xf32>
    %74 = arith.addf %71, %73 : vector<4x128xf32>
    %cst_67 = arith.constant 0.000000e+00 : f32
    %75 = vector.broadcast %cst_67 : f32 to vector<4x128xf32>
    %76 = arith.maximumf %74, %75 : vector<4x128xf32>
    %77 = vector.shape_cast %76 : vector<4x128xf32> to vector<2x2x128xf32>
    %c0_68 = arith.constant 0 : index
    %c0_69 = arith.constant 0 : index
    %c0_70 = arith.constant 0 : index
    %c0_71 = arith.constant 0 : index
    %78 = vector.load %arg5[%c0_68, %c0_69, %c0_70, %c0_71] : memref<1x2x2x128xf32, #tpu.memory_space<vmem>>, vector<1x2x2x128xf32>
    %79 = vector.shape_cast %78 : vector<1x2x2x128xf32> to vector<2x2x128xf32>
    %80 = vector.shape_cast %77 : vector<2x2x128xf32> to vector<1x2x2x128xf32>
    tpu.vector_store %arg5[%c0_68, %c0_69, %c0_70, %c0_71], %80 {strides = array<i32>} : memref<1x2x2x128xf32, #tpu.memory_space<vmem>>, vector<1x2x2x128xf32>,
    return
  }
  func.func @transform_0(%arg0: i32) -> (i32, i32, i32, i32) {
    %c0_i32 = arith.constant 0 : i32
    %c0_i32_0 = arith.constant 0 : i32
    %c0_i32_1 = arith.constant 0 : i32
    %c0_i32_2 = arith.constant 0 : i32
    return %arg0, %c0_i32, %c0_i32_0, %c0_i32_1 : i32, i32, i32, i32
  }
  func.func @transform_1(%arg0: i32) -> (i32, i32, i32) {
    %c0_i32 = arith.constant 0 : i32
    %c0_i32_0 = arith.constant 0 : i32
    %c0_i32_1 = arith.constant 0 : i32
    %c0_i32_2 = arith.constant 0 : i32
    return %c0_i32, %c0_i32_0, %c0_i32_1 : i32, i32, i32
  }
  func.func @transform_2(%arg0: i32) -> (i32, i32) {
    %c0_i32 = arith.constant 0 : i32
    %c0_i32_0 = arith.constant 0 : i32
    %c0_i32_1 = arith.constant 0 : i32
    return %c0_i32, %c0_i32_0 : i32, i32
  }
  func.func @transform_3(%arg0: i32) -> (i32, i32) {
    %c0_i32 = arith.constant 0 : i32
    %c0_i32_0 = arith.constant 0 : i32
    %c0_i32_1 = arith.constant 0 : i32
    return %c0_i32, %c0_i32_0 : i32, i32
  }
  func.func @transform_4(%arg0: i32) -> (i32, i32, i32, i32) {
    %c0_i32 = arith.constant 0 : i32
    %c0_i32_0 = arith.constant 0 : i32
    %c0_i32_1 = arith.constant 0 : i32
    %c0_i32_2 = arith.constant 0 : i32
    return %arg0, %c0_i32, %c0_i32_0, %c0_i32_1 : i32, i32, i32, i32
  }
}

</mosaic_0001>

<bundles_post_ra>
// kernel: fpem_forward.6
= control target key start
LH: loop header
LB: loop body
LE: loop exit
PB: predicated region body
PF: predicated region fallthrough
CT: control target
= control target key end

     0   :  { %s555_s15 = smov 0   ;;  %s723_s0 = inlined_call_operand.vmem [shape: f32[2,4,4,128], index: 0, kind: input, shape index: {}]   ;;  %s724_s1 = inlined_call_operand.vmem [shape: f32[3,3,128], index: 1, kind: input, shape index: {}]   ;;  %s725_s2 = inlined_call_operand.vmem [shape: f32[128,128], index: 2, kind: input, shape index: {}]   ;;  %s726_s3 = inlined_call_operand.vmem [shape: f32[1,128], index: 3, kind: input, shape index: {}]   ;;  %s727_s4 = inlined_call_operand.vmem [shape: f32[2,4,4,128], index: 4, kind: output, shape index: {}]  }
   0x1 LB: > { %s467_s16 = sadd.s32 4294967295, %s527_s15   ;;  %p471_p0 = scmp.ge.s32.totalorder %s527_s15, 1  ;;  %s527_s15 = sphi %s555_s15, %s14_s15  }
   0x2   : > { %p162_p1 = scmp.lt.s32.totalorder %s527_s15, 3 }
   0x4   : > { %p163_p2 = pnand %p471_p0, %p162_p1 }
   0x5   : > { %p188_p3 = scmp.lt.s32.totalorder (!%p163_p2), %s467_s16, 1 }
   0x6   : > { %166 = sbr.rel (%p163_p2) target bundleno = 191 (0xbf), region = 36 }
   0xb   : > { %v357_v0 = vld [vmem:[%s725_s2 + $0x78] sm:$0xff]  ;;  %v356_v1 = vld [vmem:[%s725_s2 + $0x70] sm:$0xff]  ;;  %v529_v2 = vmov 0.0   ;;  %v355_v3 = vld [vmem:[%s725_s2 + $0x68] sm:$0xff]  ;;  %s729_s16 = smov (!%p188_p3, %s467_s16), 1 }
   0xc   : > { %377 = vmatpush.msra.mxu0 %v357_v0  ;;  %486 = vmatpush.msra.mxu1 %v357_v0  ;;  %198 = vst [vmem:[#allocation2] sm:$0x3f] %v529_v2  ;;  %v354_v4 = vld [vmem:[%s725_s2 + $0x60] sm:$0xff]  ;;  %s484_s25 = sshll.u32 %s729_s16, 4  ;;  %v353_v5 = vld [vmem:[%s725_s2 + $0x58] sm:$0xff]  ;;  %v352_v7 = vld [vmem:[%s725_s2 + $0x50] sm:$0xff] }
   0xd   : > { %199 = vst [vmem:[#allocation2 + $0x8] sm:$0x3f] %v529_v2  ;;  %s590_s30 = scalar_lea.vmem %s723_s0, %s484_s25  ;;  %v595_v6 = vld [vmem:[%s724_s1] ss:$0 sm:$0xff]  ;;  %v606_v11 = vld [vmem:[%s724_s1 + $0x1] ss:$0 sm:$0xff]  ;;  %s197_s29 = scalar_lea.vmem %s727_s4, %s484_s25 }
   0xe   : > { %378 = vmatpush.msra.mxu0 %v356_v1  ;;  %487 = vmatpush.msra.mxu1 %v356_v1  ;;  %200 = vst [vmem:[#allocation2 + $0x10] sm:$0x3f] %v529_v2  ;;  %v204_v8 = vld [vmem:[%s590_s30] sm:$0xf]  ;;  %v205_v9 = vld [vmem:[%s590_s30 + $0x4] sm:$0xf] }
   0xf   : > { %201 = vst [vmem:[#allocation2 + $0x18] sm:$0x3f] %v529_v2  ;;  %v206_v10 = vld [vmem:[%s590_s30 + $0x8] sm:$0xf]  ;;  %v616_v18 = vld [vmem:[%s724_s1 + $0x2] ss:$0 sm:$0xff] }
  0x10   : > { %379 = vmatpush.msra.mxu0 %v355_v3  ;;  %488 = vmatpush.msra.mxu1 %v355_v3  ;;  %209 = vst [vmem:[#allocation2 + $0x9] sm:$0xf] %v204_v8  ;;  %v351_v17 = vld [vmem:[%s725_s2 + $0x48] sm:$0xff]  ;;  %v350_v19 = vld [vmem:[%s725_s2 + $0x40] sm:$0xff]  ;;  %v349_v21 = vld [vmem:[%s725_s2 + $0x38] sm:$0xff] }
  0x11   : > { %210 = vst [vmem:[#allocation2 + $0x11] sm:$0xf] %v205_v9  ;;  %v628_v23 = vld [vmem:[%s724_s1 + $0x4] ss:$0 sm:$0xff]  ;;  %v633_v24 = vld [vmem:[%s724_s1 + $0x5] ss:$0 sm:$0xff] }
  0x12   : > { %380 = vmatpush.msra.mxu0 %v354_v4  ;;  %489 = vmatpush.msra.mxu1 %v354_v4  ;;  %211 = vst [vmem:[#allocation2 + $0x19] sm:$0xf] %v206_v10  ;;  %v638_v25 = vld [vmem:[%s724_s1 + $0x6] ss:$0 sm:$0xff]  ;;  %v348_v26 = vld [vmem:[%s725_s2 + $0x30] sm:$0xff]  ;;  %v347_v38 = vld [vmem:[%s725_s2 + $0x28] sm:$0xff] }
  0x13   : > { %v213_v12 = vld [vmem:[#allocation2] sm:$0xf]  ;;  %v346_v49 = vld [vmem:[%s725_s2 + $0x20] sm:$0xff]  ;;  %202 = vst [vmem:[#allocation2 + $0x20] sm:$0x3f] %v529_v2  ;;  %v345_v58 = vld [vmem:[%s725_s2 + $0x18] sm:$0xff] }
  0x14   : > { %v227_v13 = vld [vmem:[#allocation2 + $0x1] sm:$0xf]  ;;  %381 = vmatpush.msra.mxu0 %v353_v5  ;;  %490 = vmatpush.msra.mxu1 %v353_v5  ;;  %v219_v14 = vmul.f32 %v595_v6, %v213_v12  ;;  %v646_v31 = vld [vmem:[%s724_s1 + $0x8] ss:$0 sm:$0xff]  ;;  %203 = vst [vmem:[#allocation2 + $0x28] sm:$0x3f] %v529_v2 }
  0x15   : > { %v233_v15 = vmul.f32 %v606_v11, %v227_v13  ;;  %v241_v16 = vld [vmem:[#allocation2 + $0x2] sm:$0xf]  ;;  %v659_v43 = vld [vmem:[%s724_s1 + $0x9] ss:$0 sm:$0xff] }
  0x16   : > { %382 = vmatpush.msra.mxu0 %v352_v7  ;;  %491 = vmatpush.msra.mxu1 %v352_v7  ;;  %v247_v22 = vmul.f32 %v616_v18, %v241_v16  ;;  %v670_v56 = vld [vmem:[%s724_s1 + $0xa] ss:$0 sm:$0xff]  ;;  %v207_v57 = vld [vmem:[%s590_s30 + $0xc] sm:$0xf] }
  0x17   : > { %v237_v20 = vadd.f32 %v233_v15, %v219_v14  ;;  %v214_v27 = vld [vmem:[#allocation2 + $0x8] sm:$0xf]  ;;  %212 = vst [vmem:[#allocation2 + $0x21] sm:$0xf] %v207_v57 }
  0x18   : > { %383 = vmatpush.msra.mxu0 %v351_v17  ;;  %492 = vmatpush.msra.mxu1 %v351_v17  ;;  %v228_v28 = vld [vmem:[#allocation2 + $0x9] sm:$0xf]  ;;  %v220_v32 = vmul.f32 %v595_v6, %v214_v27  ;;  %v256_v36 = vld [vmem:[#allocation2 + $0x10] sm:$0xf] }
  0x19   : > { %v242_v29 = vld [vmem:[#allocation2 + $0xa] sm:$0xf]  ;;  %v251_v30 = vadd.f32 %v247_v22, %v237_v20  ;;  %v234_v33 = vmul.f32 %v606_v11, %v228_v28  ;;  %v271_v40 = vld [vmem:[#allocation2 + $0x11] sm:$0xf]  ;;  %v263_v45 = vmul.f32 %v628_v23, %v256_v36  ;;  %v300_v48 = vld [vmem:[#allocation2 + $0x18] sm:$0xf] }
  0x1a   : > { %384 = vmatpush.msra.mxu0 %v350_v19  ;;  %493 = vmatpush.msra.mxu1 %v350_v19  ;;  %v248_v34 = vmul.f32 %v616_v18, %v242_v29  ;;  %v255_v35 = vld [vmem:[#allocation2 + $0x8] sm:$0xf]  ;;  %v285_v46 = vld [vmem:[#allocation2 + $0x12] sm:$0xf]  ;;  %v277_v55 = vmul.f32 %v633_v24, %v271_v40  ;;  %v307_v62 = vmul.f32 %v646_v31, %v300_v48  ;;  %v315_v63 = vld [vmem:[#allocation2 + $0x19] sm:$0xf] }
  0x1b   : > { %v270_v37 = vld [vmem:[#allocation2 + $0x9] sm:$0xf]  ;;  %v262_v39 = vmul.f32 %v628_v23, %v255_v35  ;;  %v238_v44 = vadd.f32 %v234_v33, %v220_v32  ;;  %v299_v47 = vld [vmem:[#allocation2 + $0x10] sm:$0xf]  ;;  %v291_v60 = vmul.f32 %v638_v25, %v285_v46  ;;  %v216_v1 = vld [vmem:[#allocation2 + $0x18] sm:$0xf] }
  0x1c   : > { %v276_v41 = vmul.f32 %v633_v24, %v270_v37  ;;  %v284_v42 = vld [vmem:[#allocation2 + $0xa] sm:$0xf]  ;;  %385 = vmatpush.msra.mxu0 %v349_v21  ;;  %494 = vmatpush.msra.mxu1 %v349_v21  ;;  %v314_v52 = vld [vmem:[#allocation2 + $0x11] sm:$0xf]  ;;  %v306_v61 = vmul.f32 %v646_v31, %v299_v47  ;;  %v230_v8 = vld [vmem:[#allocation2 + $0x19] sm:$0xf]  ;;  %v222_v12 = vmul.f32 %v595_v6, %v216_v1 }
  0x1d   : > { %v266_v50 = vadd.f32 %v262_v39, %v251_v30  ;;  %v290_v51 = vmul.f32 %v638_v25, %v284_v42  ;;  %v328_v53 = vld [vmem:[#allocation2 + $0x12] sm:$0xf]  ;;  %v252_v54 = vadd.f32 %v248_v34, %v238_v44  ;;  %v320_v4 = vmul.f32 %v659_v43, %v314_v52  ;;  %v244_v14 = vld [vmem:[#allocation2 + $0x1a] sm:$0xf]  ;;  %v344_v21 = vld [vmem:[%s725_s2 + $0x10] sm:$0xff] }
  0x1e   : > { %386 = vmatpush.msra.mxu0 %v348_v26  ;;  %495 = vmatpush.msra.mxu1 %v348_v26  ;;  %v215_v0 = vld [vmem:[#allocation2 + $0x10] sm:$0xf]  ;;  %v334_v5 = vmul.f32 %v670_v56, %v328_v53  ;;  %v257_v15 = vld [vmem:[#allocation2 + $0x18] sm:$0xf]  ;;  %v236_v17 = vmul.f32 %v606_v11, %v230_v8  ;;  %v250_v27 = vmul.f32 %v616_v18, %v244_v14  ;;  %v343_v33 = vld [vmem:[%s725_s2 + $0x8] sm:$0xff] }
  0x1f   : > { %v280_v59 = vadd.f32 %v276_v41, %v266_v50  ;;  %v267_v3 = vadd.f32 %v263_v45, %v252_v54  ;;  %v229_v7 = vld [vmem:[#allocation2 + $0x11] sm:$0xf]  ;;  %v221_v10 = vmul.f32 %v595_v6, %v215_v0  ;;  %v272_v20 = vld [vmem:[#allocation2 + $0x19] sm:$0xf]  ;;  %v264_v28 = vmul.f32 %v628_v23, %v257_v15  ;;  %v258_v41 = vld [vmem:[#allocation2 + $0x20] sm:$0xf] }
  0x20   : > { %387 = vmatpush.msra.mxu0 %v347_v38  ;;  %496 = vmatpush.msra.mxu1 %v347_v38  ;;  %v235_v13 = vmul.f32 %v606_v11, %v229_v7  ;;  %v243_v2 = vld [vmem:[#allocation2 + $0x12] sm:$0xf]  ;;  %v329_v26 = vld [vmem:[#allocation2 + $0x1a] sm:$0xf]  ;;  %v321_v30 = vmul.f32 %v659_v43, %v315_v63  ;;  %v240_v11 = vadd.f32 %v236_v17, %v222_v12  ;;  %v273_v44 = vld [vmem:[#allocation2 + $0x21] sm:$0xf] }
  0x21   : > { %v294_v9 = vadd.f32 %v290_v51, %v280_v59  ;;  %v281_v16 = vadd.f32 %v277_v55, %v267_v3  ;;  %v249_v19 = vmul.f32 %v616_v18, %v243_v2  ;;  %v286_v32 = vld [vmem:[#allocation2 + $0x1a] sm:$0xf]  ;;  %v278_v36 = vmul.f32 %v633_v24, %v272_v20  ;;  %v287_v45 = vld [vmem:[#allocation2 + $0x22] sm:$0xf]  ;;  %v302_v53 = vld [vmem:[#allocation2 + $0x28] sm:$0xf] }
  0x22   : > { %388 = vmatpush.msra.mxu0 %v346_v49  ;;  %497 = vmatpush.msra.mxu1 %v346_v49  ;;  %v239_v6 = vadd.f32 %v235_v13, %v221_v10  ;;  %v342_v18 = vld [vmem:[%s725_s2] sm:$0xff]  ;;  %v335_v38 = vmul.f32 %v670_v56, %v329_v26  ;;  %v254_v39 = vadd.f32 %v250_v27, %v240_v11  ;;  %v301_v50 = vld [vmem:[#allocation2 + $0x20] sm:$0xf]  ;;  %v331_v0 = vld [vmem:[#allocation2 + $0x2a] sm:$0xf] }
  0x23   : > { %v310_v22 = vadd.f32 %v306_v61, %v294_v9  ;;  %v295_v29 = vadd.f32 %v291_v60, %v281_v16  ;;  %v292_v46 = vmul.f32 %v638_v25, %v286_v32  ;;  %v265_v48 = vmul.f32 %v628_v23, %v258_v41  ;;  %v316_v51 = vld [vmem:[#allocation2 + $0x21] sm:$0xf]  ;;  %v317_v61 = vld [vmem:[#allocation2 + $0x29] sm:$0xf]  ;;  %v520_v13 = vld [vmem:[%s726_s3] ss:$0 sm:$0xff] }
  0x24   : > { %389 = vmatpush.msra.mxu0 %v345_v58  ;;  %498 = vmatpush.msra.mxu1 %v345_v58  ;;  %v253_v35 = vadd.f32 %v249_v19, %v239_v6  ;;  %v279_v49 = vmul.f32 %v633_v24, %v273_v44  ;;  %v308_v54 = vmul.f32 %v646_v31, %v301_v50  ;;  %v330_v59 = vld [vmem:[#allocation2 + $0x22] sm:$0xf] }
  0x25   : > { %v324_v34 = vadd.f32 %v320_v4, %v310_v22  ;;  %v311_v37 = vadd.f32 %v307_v62, %v295_v29  ;;  %v269_v57 = vadd.f32 %v265_v48, %v254_v39  ;;  %v293_v58 = vmul.f32 %v638_v25, %v287_v45 }
  0x26   : > { %390 = vmatpush.msra.mxu0 %v344_v21  ;;  %499 = vmatpush.msra.mxu1 %v344_v21  ;;  %v268_v42 = vadd.f32 %v264_v28, %v253_v35  ;;  %v322_v23 = vmul.f32 %v659_v43, %v316_v51  ;;  %v309_v62 = vmul.f32 %v646_v31, %v302_v53 }
  0x27   : > { %v338_v40 = vadd.f32 %v334_v5, %v324_v34  ;;  %v325_v47 = vadd.f32 %v321_v30, %v311_v37  ;;  %v283_v24 = vadd.f32 %v279_v49, %v269_v57  ;;  %v336_v1 = vmul.f32 %v670_v56, %v330_v59 }
  0x28   : > { %391 = vmatpush.msra.mxu0 %v343_v33  ;;  %500 = vmatpush.msra.mxu1 %v343_v33  ;;  %v282_v52 = vadd.f32 %v278_v36, %v268_v42  ;;  %v323_v4 = vmul.f32 %v659_v43, %v317_v61  ;;  %v337_v25 = vmul.f32 %v670_v56, %v331_v0 }
  0x29   : > { %366 = vst [vmem:[#allocation1] ss:$2 sm:$0xff] %v338_v40  ;;  %v339_v55 = vadd.f32 %v335_v38, %v325_v47  ;;  %v297_v3 = vadd.f32 %v293_v58, %v283_v24 }
  0x2a   : > { %392 = vmatpush.msra.mxu0 %v342_v18  ;;  %501 = vmatpush.msra.mxu1 %v342_v18  ;;  %v296_v60 = vadd.f32 %v292_v46, %v282_v52 }
  0x2b   : > { %368 = vst [vmem:[#allocation1 + $0x1] ss:$2 sm:$0xff] %v339_v55  ;;  %v313_v7 = vadd.f32 %v309_v62, %v297_v3 }
  0x2c   : > { %v312_v63 = vadd.f32 %v308_v54, %v296_v60 }
  0x2d   : > { %v327_v9 = vadd.f32 %v323_v4, %v313_v7 }
  0x2e   : > { %v326_v5 = vadd.f32 %v322_v23, %v312_v63 }
  0x2f   : > { %v341_v12 = vadd.f32 %v337_v25, %v327_v9 }
  0x30   : > { %v340_v8 = vadd.f32 %v336_v1, %v326_v5 }
  0x31   : > { %372 = vst [vmem:[#allocation1 + $0x11] ss:$2 sm:$0xff] %v341_v12 }
  0x32   : > { %v373_v10 = vld.sshfl [vmem:[#allocation1] sm:$0xff pattern:$0x75316420]  ;;  %370 = vst [vmem:[#allocation1 + $0x10] ss:$2 sm:$0xff] %v340_v8 }
  0x33   : > { %393 = vmatmul.f32.vlgmr.msra.gmra.mxu0 %v373_v10 }
  0x39   : > { %v374_v31 = vld.sshfl [vmem:[#allocation1 + $0x10] sm:$0xff pattern:$0x75316420] }
  0x3a   : > { %396 = vmatmul.f32.vlgmr.msra.gmra.mxu1 %v374_v31 }
  0xb0   : > { %v394_v2 = vpop.f32.mrf.mxu0 }
  0xb1   : > { %v395_v43 = vadd.f32 %v520_v13, %v394_v2 }
  0xb3   : > { %v400_v56 = vmax.f32 %v395_v43, 0.0 }
  0xb5   : > { %v404_v14 = vrot.slane %v400_v56, 4  ;;  %408 = vst [vmem:[%s197_s29] sm:$0xf] %v400_v56 }
  0xb7   : > { %409 = vst [vmem:[%s197_s29 + $0x4] sm:$0xf] %v404_v14  ;;  %v397_v15 = vpop.f32.mrf.mxu1 }
  0xb8   : > { %v398_v16 = vadd.f32 %v520_v13, %v397_v15 }
  0xba   : > { %v401_v17 = vmax.f32 %v398_v16, 0.0 }
  0xbc   : > { %v405_v19 = vrot.slane %v401_v17, 4  ;;  %410 = vst [vmem:[%s197_s29 + $0x8] sm:$0xf] %v401_v17 }
  0xbe   : > { %411 = vst [vmem:[%s197_s29 + $0xc] sm:$0xf] %v405_v19 }
  0xbf PF: > { %s14_s15 = sadd.s32 1, %s527_s15  }
  0xc0   : > { %p11_p4 = scmp.ge.s32.totalorder %s14_s15, 4  }
  0xc2   :  { %13 = sbr.rel (!%p11_p4) target bundleno = 1 (0x1), region = 73 }

// kernel: fpem_forward.7
= control target key start
LH: loop header
LB: loop body
LE: loop exit
PB: predicated region body
PF: predicated region fallthrough
CT: control target
= control target key end

     0   :  { %s724_s15 = smov 0   ;;  %s1026_s0 = inlined_call_operand.vmem [shape: f32[2,8,8,128], index: 0, kind: input, shape index: {}]   ;;  %s1027_s1 = inlined_call_operand.vmem [shape: f32[3,3,128], index: 1, kind: input, shape index: {}]   ;;  %s1028_s2 = inlined_call_operand.vmem [shape: f32[128,128], index: 2, kind: input, shape index: {}]   ;;  %s1029_s3 = inlined_call_operand.vmem [shape: f32[1,128], index: 3, kind: input, shape index: {}]   ;;  %s1030_s4 = inlined_call_operand.vmem [shape: f32[2,8,8,128], index: 4, kind: output, shape index: {}]  }
   0x1 LB: > { %s604_s16 = sadd.s32 4294967295, %s696_s15   ;;  %p608_p0 = scmp.ge.s32.totalorder %s696_s15, 1  ;;  %s696_s15 = sphi %s724_s15, %s14_s15  }
   0x2   : > { %p162_p1 = scmp.lt.s32.totalorder %s696_s15, 3 }
   0x4   : > { %p163_p2 = pnand %p608_p0, %p162_p1 }
   0x5   : > { %p188_p3 = scmp.lt.s32.totalorder (!%p163_p2), %s604_s16, 1 }
   0x6   : > { %166 = sbr.rel (%p163_p2) target bundleno = 205 (0xcd), region = 36 }
   0xb   : > { %v487_v0 = vld [vmem:[%s1028_s2 + $0x78] sm:$0xff]  ;;  %v486_v1 = vld [vmem:[%s1028_s2 + $0x70] sm:$0xff]  ;;  %v698_v2 = vmov 0.0   ;;  %v485_v3 = vld [vmem:[%s1028_s2 + $0x68] sm:$0xff]  ;;  %s1032_s16 = smov (!%p188_p3, %s604_s16), 1 }
   0xc   : > { %624 = vmatpush.msra.mxu2 %v487_v0  ;;  %625 = vmatpush.msra.mxu3 %v487_v0  ;;  %206 = vst [vmem:[#allocation2 + $0x40] sm:$0xff] %v698_v2  ;;  %v484_v4 = vld [vmem:[%s1028_s2 + $0x60] sm:$0xff]  ;;  %s621_s25 = sshll.u32 %s1032_s16, 6  ;;  %v483_v5 = vld [vmem:[%s1028_s2 + $0x58] sm:$0xff]  ;;  %v482_v9 = vld [vmem:[%s1028_s2 + $0x50] sm:$0xff] }
   0xd   : > { %492 = vmatpush.msra.mxu0 %v487_v0  ;;  %623 = vmatpush.msra.mxu1 %v487_v0  ;;  %207 = vst [vmem:[#allocation2 + $0x48] sm:$0x3] %v698_v2  ;;  %s759_s30 = scalar_lea.vmem %s1026_s0, %s621_s25  ;;  %v781_v10 = vld [vmem:[%s1027_s1 + $0x1] ss:$0 sm:$0xff]  ;;  %v481_v11 = vld [vmem:[%s1028_s2 + $0x48] sm:$0xff]  ;;  %v479_v15 = vld [vmem:[%s1028_s2 + $0x38] sm:$0xff]  ;;  %s197_s29 = scalar_lea.vmem %s1030_s4, %s621_s25 }
   0xe   : > { %627 = vmatpush.msra.mxu2 %v486_v1  ;;  %628 = vmatpush.msra.mxu3 %v486_v1  ;;  %208 = vst [vmem:[#allocation2 + $0x50] sm:$0xff] %v698_v2  ;;  %v764_v6 = vld [vmem:[%s759_s30 + $0x18] sm:$0xff]  ;;  %v767_v7 = vld [vmem:[%s759_s30 + $0x20] sm:$0xff]  ;;  %v770_v8 = vld [vmem:[%s759_s30 + $0x28] sm:$0xff] }
   0xf   : > { %493 = vmatpush.msra.mxu0 %v486_v1  ;;  %626 = vmatpush.msra.mxu1 %v486_v1  ;;  %209 = vst [vmem:[#allocation2 + $0x58] sm:$0x3] %v698_v2  ;;  %v789_v12 = vld [vmem:[%s1027_s1] ss:$0 sm:$0xff]  ;;  %v794_v13 = vld [vmem:[%s1027_s1 + $0x2] ss:$0 sm:$0xff]  ;;  %v275_v16 = vmul.f32 %v781_v10, %v764_v6  ;;  %v276_v29 = vmul.f32 %v781_v10, %v767_v7 }
  0x10   : > { %630 = vmatpush.msra.mxu2 %v485_v3  ;;  %631 = vmatpush.msra.mxu3 %v485_v3  ;;  %210 = vst [vmem:[#allocation2 + $0x60] sm:$0xff] %v698_v2  ;;  %v480_v14 = vld [vmem:[%s1028_s2 + $0x40] sm:$0xff]  ;;  %v478_v24 = vld [vmem:[%s1028_s2 + $0x30] sm:$0xff]  ;;  %v477_v30 = vld [vmem:[%s1028_s2 + $0x28] sm:$0xff]  ;;  %v277_v53 = vmul.f32 %v781_v10, %v770_v8  ;;  %v245_v61 = vmul.f32 0.0, %v789_v12 }
  0x11   : > { %494 = vmatpush.msra.mxu0 %v485_v3  ;;  %629 = vmatpush.msra.mxu1 %v485_v3  ;;  %211 = vst [vmem:[#allocation2 + $0x68] sm:$0x3] %v698_v2  ;;  %v807_v17 = vld [vmem:[%s1027_s1 + $0x4] ss:$0 sm:$0xff]  ;;  %v824_v23 = vld [vmem:[%s1027_s1 + $0x5] ss:$0 sm:$0xff] }
  0x12   : > { %633 = vmatpush.msra.mxu2 %v484_v4  ;;  %634 = vmatpush.msra.mxu3 %v484_v4  ;;  %230 = vst [vmem:[#allocation2 + $0x41] sm:$0xff] %v764_v6  ;;  %v833_v25 = vld [vmem:[%s1027_s1 + $0x6] ss:$0 sm:$0xff]  ;;  %v354_v32 = vmul.f32 %v824_v23, %v767_v7  ;;  %v852_v33 = vld [vmem:[%s1027_s1 + $0x8] ss:$0 sm:$0xff]  ;;  %v475_v43 = vld [vmem:[%s1028_s2 + $0x18] sm:$0xff]  ;;  %v355_v58 = vmul.f32 %v824_v23, %v770_v8 }
  0x13   : > { %495 = vmatpush.msra.mxu0 %v484_v4  ;;  %632 = vmatpush.msra.mxu1 %v484_v4  ;;  %231 = vst [vmem:[#allocation2 + $0x51] sm:$0xff] %v767_v7  ;;  %v476_v35 = vld [vmem:[%s1028_s2 + $0x20] sm:$0xff]  ;;  %v865_v38 = vld [vmem:[%s1027_s1 + $0x9] ss:$0 sm:$0xff]  ;;  %v880_v46 = vld [vmem:[%s1027_s1 + $0xa] ss:$0 sm:$0xff] }
  0x14   : > { %636 = vmatpush.msra.mxu2 %v483_v5  ;;  %637 = vmatpush.msra.mxu3 %v483_v5  ;;  %232 = vst [vmem:[#allocation2 + $0x61] sm:$0xff] %v770_v8  ;;  %v474_v49 = vld [vmem:[%s1028_s2 + $0x10] sm:$0xff]  ;;  %v434_v50 = vmul.f32 %v865_v38, %v770_v8  ;;  %v225_v56 = vld [vmem:[%s759_s30 + $0x38] sm:$0xff]  ;;  %v473_v59 = vld [vmem:[%s1028_s2 + $0x8] sm:$0xff] }
  0x15   : > { %496 = vmatpush.msra.mxu0 %v483_v5  ;;  %635 = vmatpush.msra.mxu1 %v483_v5  ;;  %198 = vst [vmem:[#allocation2] sm:$0xff] %v698_v2  ;;  %v224_v51 = vld [vmem:[%s759_s30 + $0x30] sm:$0xff]  ;;  %v218_v60 = vld [vmem:[%s759_s30] sm:$0xff]  ;;  %v219_v4 = vld [vmem:[%s759_s30 + $0x8] sm:$0xff] }
  0x16   : > { %639 = vmatpush.msra.mxu2 %v482_v9  ;;  %640 = vmatpush.msra.mxu3 %v482_v9  ;;  %199 = vst [vmem:[#allocation2 + $0x8] sm:$0x3] %v698_v2  ;;  %v905_v63 = vmul.f32 %v781_v10, %v224_v51  ;;  %v909_v3 = vmul.f32 %v824_v23, %v224_v51  ;;  %v472_v5 = vld [vmem:[%s1028_s2] sm:$0xff] }
  0x17   : > { %497 = vmatpush.msra.mxu0 %v482_v9  ;;  %638 = vmatpush.msra.mxu1 %v482_v9  ;;  %200 = vst [vmem:[#allocation2 + $0x10] sm:$0xff] %v698_v2 }
  0x18   : > { %642 = vmatpush.msra.mxu2 %v481_v11  ;;  %643 = vmatpush.msra.mxu3 %v481_v11  ;;  %201 = vst [vmem:[#allocation2 + $0x18] sm:$0x3] %v698_v2 }
  0x19   : > { %498 = vmatpush.msra.mxu0 %v481_v11  ;;  %641 = vmatpush.msra.mxu1 %v481_v11  ;;  %v810_v18 = vld [vmem:[#allocation2 + $0x40] sm:$0xff]  ;;  %202 = vst [vmem:[#allocation2 + $0x20] sm:$0xff] %v698_v2  ;;  %v917_v11 = vmul.f32 %v824_v23, %v218_v60 }
  0x1a   : > { %v812_v19 = vld [vmem:[#allocation2 + $0x42] sm:$0xff]  ;;  %645 = vmatpush.msra.mxu2 %v480_v14  ;;  %646 = vmatpush.msra.mxu3 %v480_v14  ;;  %v249_v20 = vmul.f32 %v789_v12, %v810_v18  ;;  %v819_v22 = vld [vmem:[#allocation2 + $0x50] sm:$0xff]  ;;  %203 = vst [vmem:[#allocation2 + $0x28] sm:$0x3] %v698_v2 }
  0x1b   : > { %v301_v21 = vmul.f32 %v794_v13, %v812_v19  ;;  %499 = vmatpush.msra.mxu0 %v480_v14  ;;  %644 = vmatpush.msra.mxu1 %v480_v14  ;;  %v328_v27 = vmul.f32 %v807_v17, %v819_v22  ;;  %v838_v28 = vld [vmem:[#allocation2 + $0x52] sm:$0xff]  ;;  %204 = vst [vmem:[#allocation2 + $0x30] sm:$0xff] %v698_v2  ;;  %v397_v37 = vld [vmem:[#allocation2 + $0x60] sm:$0xff] }
  0x1c   : > { %648 = vmatpush.msra.mxu2 %v479_v15  ;;  %649 = vmatpush.msra.mxu3 %v479_v15  ;;  %v283_v26 = vadd.f32 %v275_v16, %v249_v20  ;;  %v250_v34 = vmul.f32 %v789_v12, %v819_v22  ;;  %v380_v36 = vmul.f32 %v833_v25, %v838_v28  ;;  %v450_v55 = vld [vmem:[#allocation2 + $0x62] sm:$0xff]  ;;  %v920_v14 = vld [vmem:[%s759_s30 + $0x10] sm:$0xff] }
  0x1d   : > { %500 = vmatpush.msra.mxu0 %v479_v15  ;;  %647 = vmatpush.msra.mxu1 %v479_v15  ;;  %205 = vst [vmem:[#allocation2 + $0x38] sm:$0x3] %v698_v2  ;;  %v302_v39 = vmul.f32 %v794_v13, %v838_v28  ;;  %v329_v42 = vmul.f32 %v807_v17, %v397_v37  ;;  %v261_v47 = vld [vmem:[#allocation2 + $0x1] sm:$0xff] }
  0x1e   : > { %651 = vmatpush.msra.mxu2 %v478_v24  ;;  %652 = vmatpush.msra.mxu3 %v478_v24  ;;  %v309_v31 = vadd.f32 %v301_v21, %v283_v26  ;;  %212 = vst [vmem:[#allocation2 + $0x70] sm:$0xff] %v698_v2  ;;  %v284_v41 = vadd.f32 %v276_v29, %v250_v34 }
  0x1f   : > { %501 = vmatpush.msra.mxu0 %v478_v24  ;;  %650 = vmatpush.msra.mxu1 %v478_v24  ;;  %213 = vst [vmem:[#allocation2 + $0x78] sm:$0x3] %v698_v2  ;;  %v408_v45 = vmul.f32 %v852_v33, %v397_v37  ;;  %v251_v52 = vmul.f32 %v789_v12, %v397_v37 }
  0x20   : > { %654 = vmatpush.msra.mxu2 %v477_v30  ;;  %655 = vmatpush.msra.mxu3 %v477_v30  ;;  %v336_v40 = vadd.f32 %v328_v27, %v309_v31  ;;  %214 = vst [vmem:[#allocation2 + $0x80] sm:$0xff] %v698_v2  ;;  %v310_v48 = vadd.f32 %v302_v39, %v284_v41 }
  0x21   : > { %502 = vmatpush.msra.mxu0 %v477_v30  ;;  %653 = vmatpush.msra.mxu1 %v477_v30  ;;  %215 = vst [vmem:[#allocation2 + $0x88] sm:$0x3] %v698_v2  ;;  %v271_v62 = vmul.f32 %v781_v10, %v261_v47  ;;  %v460_v1 = vmul.f32 %v880_v46, %v450_v55 }
  0x22   : > { %657 = vmatpush.msra.mxu2 %v476_v35  ;;  %658 = vmatpush.msra.mxu3 %v476_v35  ;;  %v362_v44 = vadd.f32 %v354_v32, %v336_v40  ;;  %216 = vst [vmem:[#allocation2 + $0x90] sm:$0xff] %v698_v2  ;;  %v337_v57 = vadd.f32 %v329_v42, %v310_v48 }
  0x23   : > { %503 = vmatpush.msra.mxu0 %v476_v35  ;;  %656 = vmatpush.msra.mxu1 %v476_v35  ;;  %217 = vst [vmem:[#allocation2 + $0x98] sm:$0x3] %v698_v2  ;;  %v287_v2 = vld [vmem:[#allocation2 + $0x2] sm:$0xff]  ;;  %v285_v8 = vadd.f32 %v277_v53, %v251_v52  ;;  %v303_v9 = vmul.f32 %v794_v13, %v450_v55 }
  0x24   : > { %660 = vmatpush.msra.mxu2 %v475_v43  ;;  %661 = vmatpush.msra.mxu3 %v475_v43  ;;  %v388_v54 = vadd.f32 %v380_v36, %v362_v44  ;;  %233 = vst [vmem:[#allocation2 + $0x71] sm:$0xff] %v224_v51  ;;  %v363_v16 = vadd.f32 %v355_v58, %v337_v57  ;;  %v951_v44 = vmul.f32 0.0, %v852_v33 }
  0x25   : > { %504 = vmatpush.msra.mxu0 %v475_v43  ;;  %659 = vmatpush.msra.mxu1 %v475_v43  ;;  %234 = vst [vmem:[#allocation2 + $0x81] sm:$0xff] %v225_v56  ;;  %v381_v20 = vmul.f32 %v833_v25, %v450_v55  ;;  %v924_v21 = vmul.f32 %v865_v38, %v225_v56 }
  0x26   : > { %663 = vmatpush.msra.mxu2 %v474_v49  ;;  %664 = vmatpush.msra.mxu3 %v474_v49  ;;  %v416_v0 = vadd.f32 %v408_v45, %v388_v54  ;;  %227 = vst [vmem:[#allocation2 + $0x11] sm:$0xff] %v218_v60  ;;  %v279_v24 = vadd.f32 %v271_v62, %v245_v61 }
  0x27   : > { %505 = vmatpush.msra.mxu0 %v474_v49  ;;  %662 = vmatpush.msra.mxu1 %v474_v49  ;;  %228 = vst [vmem:[#allocation2 + $0x21] sm:$0xff] %v219_v4  ;;  %v297_v26 = vmul.f32 %v794_v13, %v287_v2  ;;  %v273_v29 = vmul.f32 %v781_v10, %v219_v4 }
  0x28   : > { %666 = vmatpush.msra.mxu2 %v473_v59  ;;  %667 = vmatpush.msra.mxu3 %v473_v59  ;;  %v442_v15 = vadd.f32 %v434_v50, %v416_v0  ;;  %229 = vst [vmem:[#allocation2 + $0x31] sm:$0xff] %v920_v14  ;;  %v931_v30 = vmul.f32 %v824_v23, %v920_v14 }
  0x29   : > { %506 = vmatpush.msra.mxu0 %v473_v59  ;;  %665 = vmatpush.msra.mxu1 %v473_v59  ;;  %v934_v31 = vmul.f32 %v865_v38, %v219_v4  ;;  %v938_v32 = vmul.f32 %v852_v33, %v810_v18  ;;  %v942_v34 = vmul.f32 %v865_v38, %v764_v6 }
  0x2a   : > { %669 = vmatpush.msra.mxu2 %v472_v5  ;;  %670 = vmatpush.msra.mxu3 %v472_v5  ;;  %v468_v27 = vadd.f32 %v460_v1, %v442_v15  ;;  %v311_v35 = vadd.f32 %v303_v9, %v285_v8  ;;  %v946_v36 = vmul.f32 %v880_v46, %v812_v19 }
  0x2b   : > { %507 = vmatpush.msra.mxu0 %v472_v5  ;;  %668 = vmatpush.msra.mxu1 %v472_v5  ;;  %v389_v37 = vadd.f32 %v381_v20, %v363_v16  ;;  %v435_v39 = vmul.f32 %v865_v38, %v224_v51  ;;  %v319_v40 = vld [vmem:[#allocation2 + $0x70] sm:$0xff]  ;;  %v305_v42 = vadd.f32 %v297_v26, %v279_v24 }
  0x2c   : > { %520 = vmatmul.f32.vlgmr.msra.gmra.mxu2 %v468_v27  ;;  %v372_v41 = vld [vmem:[#allocation2 + $0x72] sm:$0xff]  ;;  %v357_v43 = vmul.f32 %v824_v23, %v225_v56  ;;  %v272_v45 = vmul.f32 %v781_v10, %v218_v60  ;;  %v330_v47 = vmul.f32 %v807_v17, %v319_v40  ;;  %v399_v48 = vld [vmem:[#allocation2 + $0x80] sm:$0xff]  ;;  %v409_v50 = vmul.f32 %v852_v33, %v319_v40 }
  0x2d   : > { %v452_v49 = vld [vmem:[#allocation2 + $0x82] sm:$0xff]  ;;  %v957_v52 = vmul.f32 %v824_v23, %v219_v4  ;;  %v274_v51 = vmul.f32 %v781_v10, %v920_v14  ;;  %v382_v53 = vmul.f32 %v833_v25, %v372_v41  ;;  %v313_v54 = vld [vmem:[#allocation2 + $0x10] sm:$0xff]  ;;  %v461_v56 = vmul.f32 %v880_v46, %v372_v41 }
  0x2e   : > { %v366_v55 = vld [vmem:[#allocation2 + $0x12] sm:$0xff]  ;;  %v252_v57 = vmul.f32 %v789_v12, %v319_v40  ;;  %v966_v58 = vmul.f32 %v807_v17, %v810_v18  ;;  %v338_v59 = vadd.f32 %v330_v47, %v311_v35  ;;  %v410_v60 = vmul.f32 %v852_v33, %v399_v48  ;;  %v393_v62 = vld [vmem:[#allocation2 + $0x20] sm:$0xff] }
  0x2f   : > { %v324_v61 = vmul.f32 %v807_v17, %v313_v54  ;;  %v446_v0 = vld [vmem:[#allocation2 + $0x22] sm:$0xff]  ;;  %v417_v10 = vadd.f32 %v409_v50, %v389_v37  ;;  %v462_v1 = vmul.f32 %v880_v46, %v452_v49  ;;  %v247_v4 = vmul.f32 %v789_v12, %v393_v62  ;;  %v315_v5 = vld [vmem:[#allocation2 + $0x30] sm:$0xff] }
  0x30   : > { %v299_v2 = vmul.f32 %v794_v13, %v446_v0  ;;  %v304_v8 = vmul.f32 %v794_v13, %v372_v41  ;;  %v364_v18 = vadd.f32 %v909_v3, %v338_v59  ;;  %v376_v15 = vmul.f32 %v833_v25, %v366_v55  ;;  %v368_v47 = vld [vmem:[#allocation2 + $0x32] sm:$0xff] }
  0x31   : > { %v332_v9 = vadd.f32 %v324_v61, %v305_v42  ;;  %v326_v16 = vmul.f32 %v807_v17, %v315_v5  ;;  %v281_v20 = vadd.f32 %v273_v29, %v247_v4  ;;  %v443_v24 = vadd.f32 %v435_v39, %v417_v10  ;;  %v427_v4 = vld [vmem:[#allocation2 + $0x91] sm:$0xff] }
  0x32   : > { %v286_v26 = vadd.f32 %v905_v63, %v252_v57  ;;  %v331_v27 = vmul.f32 %v807_v17, %v399_v48  ;;  %v390_v35 = vadd.f32 %v382_v53, %v364_v18  ;;  %v404_v40 = vmul.f32 %v852_v33, %v393_v62  ;;  %v453_v18 = vld [vmem:[#allocation2 + $0x92] sm:$0xff] }
  0x33   : > { %v358_v37 = vadd.f32 %v917_v11, %v332_v9  ;;  %v246_v41 = vmul.f32 %v789_v12, %v313_v54  ;;  %v307_v3 = vadd.f32 %v299_v2, %v281_v20  ;;  %v469_v42 = vadd.f32 %v461_v56, %v443_v24 }
  0x34   : > { %v312_v50 = vadd.f32 %v304_v8, %v286_v26  ;;  %v298_v59 = vmul.f32 %v794_v13, %v366_v55  ;;  %v418_v61 = vadd.f32 %v410_v60, %v390_v35  ;;  %v325_v63 = vmul.f32 %v807_v17, %v393_v62 }
  0x35   : > { %v384_v29 = vadd.f32 %v376_v15, %v358_v37  ;;  %v280_v39 = vadd.f32 %v272_v45, %v246_v41  ;;  %v334_v57 = vadd.f32 %v326_v16, %v307_v3  ;;  %v378_v48 = vmul.f32 %v833_v25, %v368_v47  ;;  %523 = vmatmul.f32.gmra.mxu2 %v469_v42 }
  0x36   : > { %v339_v11 = vadd.f32 %v331_v27, %v312_v50  ;;  %v383_v53 = vmul.f32 %v833_v25, %v452_v49  ;;  %v444_v10 = vadd.f32 %v924_v21, %v418_v61  ;;  %v456_v56 = vmul.f32 %v880_v46, %v446_v0 }
  0x37   : > { %v412_v54 = vadd.f32 %v404_v40, %v384_v29  ;;  %v306_v2 = vadd.f32 %v298_v59, %v280_v39  ;;  %v360_v55 = vadd.f32 %v931_v30, %v334_v57  ;;  %v248_v45 = vmul.f32 %v789_v12, %v315_v5 }
  0x38   : > { %v365_v60 = vadd.f32 %v357_v43, %v339_v11  ;;  %v300_v17 = vmul.f32 %v794_v13, %v368_v47  ;;  %v470_v62 = vadd.f32 %v462_v1, %v444_v10  ;;  %v377_v49 = vmul.f32 %v833_v25, %v446_v0 }
  0x39   : > { %v438_v8 = vadd.f32 %v934_v31, %v412_v54  ;;  %v333_v9 = vadd.f32 %v325_v63, %v306_v2  ;;  %v386_v21 = vadd.f32 %v378_v48, %v360_v55  ;;  %v437_v16 = vmul.f32 %v865_v38, %v427_v4 }
  0x3a   : > { %v391_v15 = vadd.f32 %v383_v53, %v365_v60  ;;  %v282_v20 = vadd.f32 %v274_v51, %v248_v45  ;;  %526 = vmatmul.f32.vlgmr.msra.gmra.mxu3 %v470_v62  ;;  %v405_v12 = vmul.f32 %v852_v33, %v315_v5  ;;  %v353_v13 = vmul.f32 %v824_v23, %v764_v6 }
  0x3b   : > { %v464_v24 = vadd.f32 %v456_v56, %v438_v8  ;;  %v359_v30 = vadd.f32 %v957_v52, %v333_v9  ;;  %v414_v31 = vadd.f32 %v938_v32, %v386_v21  ;;  %v463_v0 = vmul.f32 %v880_v46, %v453_v18 }
  0x3c   : > { %v419_v43 = vadd.f32 %v951_v44, %v391_v15  ;;  %v308_v1 = vadd.f32 %v300_v17, %v282_v20  ;;  %v431_v51 = vmul.f32 %v865_v38, %v920_v14  ;;  %v379_v6 = vmul.f32 %v833_v25, %v812_v19 }
  0x3d   : > { %508 = vmatmul.f32.vlgmr.msra.gmra.mxu0 %v464_v24  ;;  %v385_v26 = vadd.f32 %v377_v49, %v359_v30  ;;  %v440_v27 = vadd.f32 %v942_v34, %v414_v31  ;;  %v457_v32 = vmul.f32 %v880_v46, %v368_v47  ;;  %v407_v40 = vmul.f32 %v852_v33, %v819_v22  ;;  %v689_v22 = vld [vmem:[%s1029_s3] ss:$0 sm:$0xff] }
  0x3e   : > { %v445_v52 = vadd.f32 %v437_v16, %v419_v43  ;;  %v335_v5 = vadd.f32 %v966_v58, %v308_v1  ;;  %v433_v58 = vmul.f32 %v865_v38, %v767_v7  ;;  %v459_v25 = vmul.f32 %v880_v46, %v838_v28 }
  0x3f   : > { %v413_v23 = vadd.f32 %v405_v12, %v385_v26  ;;  %v466_v44 = vadd.f32 %v946_v36, %v440_v27 }
  0x40   : > { %v471_v35 = vadd.f32 %v463_v0, %v445_v52  ;;  %v361_v37 = vadd.f32 %v353_v13, %v335_v5 }
  0x41   : > { %v439_v14 = vadd.f32 %v431_v51, %v413_v23  ;;  %514 = vmatmul.f32.vlgmr.msra.gmra.mxu1 %v466_v44 }
  0x42   : > { %v387_v34 = vadd.f32 %v379_v6, %v361_v37  ;;  %529 = vmatmul.f32.gmra.mxu3 %v471_v35 }
  0x43   : > { %v465_v41 = vadd.f32 %v457_v32, %v439_v14 }
  0x44   : > { %v415_v19 = vadd.f32 %v407_v40, %v387_v34 }
  0x45   : > { %511 = vmatmul.f32.gmra.mxu0 %v465_v41 }
  0x46   : > { %v441_v36 = vadd.f32 %v433_v58, %v415_v19 }
  0x48   : > { %v467_v47 = vadd.f32 %v459_v25, %v441_v36 }
  0x4a   : > { %517 = vmatmul.f32.gmra.mxu1 %v467_v47 }
  0xaf   : > { %v521_v33 = vpop.f32.mrf.mxu2 }
  0xb0   : > { %v522_v3 = vadd.f32 %v689_v22, %v521_v33 }
  0xb2   : > { %v537_v7 = vmax.f32 %v522_v3, 0.0 }
  0xb4   : > { %545 = vst [vmem:[%s197_s29 + $0x20] sm:$0xff] %v537_v7 }
  0xb8   : > { %v524_v38 = vpop.f32.mrf.mxu2 }
  0xb9   : > { %v525_v28 = vadd.f32 %v689_v22, %v524_v38 }
  0xba   : > { %v509_v42 = vpop.f32.mrf.mxu0 }
  0xbb   : > { %v510_v46 = vadd.f32 %v689_v22, %v509_v42  ;;  %v538_v50 = vmax.f32 %v525_v28, 0.0 }
  0xbd   : > { %v533_v59 = vmax.f32 %v510_v46, 0.0  ;;  %v527_v61 = vpop.f32.mrf.mxu3  ;;  %546 = vst [vmem:[%s197_s29 + $0x28] sm:$0xff] %v538_v50 }
  0xbe   : > { %v515_v29 = vpop.f32.mrf.mxu1  ;;  %v528_v39 = vadd.f32 %v689_v22, %v527_v61 }
  0xbf   : > { %541 = vst [vmem:[%s197_s29] sm:$0xff] %v533_v59  ;;  %v516_v63 = vadd.f32 %v689_v22, %v515_v29 }
  0xc0   : > { %v539_v57 = vmax.f32 %v528_v39, 0.0 }
  0xc1   : > { %v535_v48 = vmax.f32 %v516_v63, 0.0 }
  0xc2   : > { %v512_v11 = vpop.f32.mrf.mxu0  ;;  %547 = vst [vmem:[%s197_s29 + $0x30] sm:$0xff] %v539_v57 }
  0xc3   : > { %v513_v53 = vadd.f32 %v689_v22, %v512_v11  ;;  %543 = vst [vmem:[%s197_s29 + $0x10] sm:$0xff] %v535_v48 }
  0xc5   : > { %v534_v10 = vmax.f32 %v513_v53, 0.0  ;;  %v530_v54 = vpop.f32.mrf.mxu3 }
  0xc6   : > { %v531_v4 = vadd.f32 %v689_v22, %v530_v54 }
  0xc7   : > { %542 = vst [vmem:[%s197_s29 + $0x8] sm:$0xff] %v534_v10  ;;  %v518_v56 = vpop.f32.mrf.mxu1 }
  0xc8   : > { %v519_v2 = vadd.f32 %v689_v22, %v518_v56  ;;  %v540_v55 = vmax.f32 %v531_v4, 0.0 }
  0xca   : > { %v536_v60 = vmax.f32 %v519_v2, 0.0  ;;  %548 = vst [vmem:[%s197_s29 + $0x38] sm:$0xff] %v540_v55 }
  0xcc   : > { %544 = vst [vmem:[%s197_s29 + $0x18] sm:$0xff] %v536_v60 }
  0xcd PF: > { %s14_s15 = sadd.s32 1, %s696_s15  }
  0xce   : > { %p11_p4 = scmp.ge.s32.totalorder %s14_s15, 4  }
  0xd0   :  { %13 = sbr.rel (!%p11_p4) target bundleno = 1 (0x1), region = 70 }

// kernel: fpem_forward.10
= control target key start
LH: loop header
LB: loop body
LE: loop exit
PB: predicated region body
PF: predicated region fallthrough
CT: control target
= control target key end

     0   :  { %s632_s15 = smov 0   ;;  %s813_s0 = inlined_call_operand.vmem [shape: f32[2,8,8,128], index: 0, kind: input, shape index: {}]   ;;  %s814_s1 = inlined_call_operand.vmem [shape: f32[3,3,128], index: 1, kind: input, shape index: {}]   ;;  %s815_s2 = inlined_call_operand.vmem [shape: f32[128,128], index: 2, kind: input, shape index: {}]   ;;  %s816_s3 = inlined_call_operand.vmem [shape: f32[1,128], index: 3, kind: input, shape index: {}]   ;;  %s817_s4 = inlined_call_operand.vmem [shape: f32[2,4,4,128], index: 4, kind: output, shape index: {}]  }
   0x1 LB: > { %s544_s16 = sadd.s32 4294967295, %s604_s15   ;;  %p548_p0 = scmp.ge.s32.totalorder %s604_s15, 1  ;;  %s604_s15 = sphi %s632_s15, %s14_s15  }
   0x2   : > { %p162_p1 = scmp.lt.s32.totalorder %s604_s15, 3 }
   0x4   : > { %p163_p2 = pnand %p548_p0, %p162_p1 }
   0x5   : > { %p188_p3 = scmp.lt.s32.totalorder (!%p163_p2), %s544_s16, 1 }
   0x6   : > { %166 = sbr.rel (%p163_p2) target bundleno = 210 (0xd2), region = 36 }
   0xb   : > { %v412_v0 = vld [vmem:[%s815_s2 + $0x78] sm:$0xff]  ;;  %v411_v1 = vld [vmem:[%s815_s2 + $0x70] sm:$0xff]  ;;  %v606_v2 = vmov 0.0   ;;  %v410_v3 = vld [vmem:[%s815_s2 + $0x68] sm:$0xff]  ;;  %s819_s16 = smov (!%p188_p3, %s544_s16), 1 }
   0xc   : > { %432 = vmatpush.msra.mxu0 %v412_v0  ;;  %563 = vmatpush.msra.mxu1 %v412_v0  ;;  %198 = vst [vmem:[#allocation2] sm:$0xff] %v606_v2  ;;  %v409_v4 = vld [vmem:[%s815_s2 + $0x60] sm:$0xff]  ;;  %s561_s25 = sshll.u32 %s819_s16, 6  ;;  %v408_v5 = vld [vmem:[%s815_s2 + $0x58] sm:$0xff]  ;;  %v407_v7 = vld [vmem:[%s815_s2 + $0x50] sm:$0xff] }
   0xd   : > { %199 = vst [vmem:[#allocation2 + $0x8] sm:$0x3] %v606_v2  ;;  %v667_v6 = vld [vmem:[%s814_s1] ss:$0 sm:$0xff]  ;;  %v676_v8 = vld [vmem:[%s814_s1 + $0x1] ss:$0 sm:$0xff]  ;;  %s684_s12 = scalar_lea.vmem %s813_s0, %s561_s25 }
   0xe   : > { %433 = vmatpush.msra.mxu0 %v411_v1  ;;  %564 = vmatpush.msra.mxu1 %v411_v1  ;;  %200 = vst [vmem:[#allocation2 + $0x10] sm:$0xff] %v606_v2  ;;  %v406_v9 = vld [vmem:[%s815_s2 + $0x48] sm:$0xff]  ;;  %v218_v12 = vld [vmem:[%s684_s12] sm:$0xff]  ;;  %v220_v19 = vld [vmem:[%s684_s12 + $0x10] sm:$0xff]  ;;  %s562_s25 = sshll.u32 %s819_s16, 4 }
   0xf   : > { %201 = vst [vmem:[#allocation2 + $0x18] sm:$0x3] %v606_v2  ;;  %v219_v14 = vld [vmem:[%s684_s12 + $0x8] sm:$0xff]  ;;  %v696_v17 = vld [vmem:[%s814_s1 + $0x2] ss:$0 sm:$0xff]  ;;  %v221_v20 = vld [vmem:[%s684_s12 + $0x18] sm:$0xff]  ;;  %s197_s28 = scalar_lea.vmem %s817_s4, %s562_s25 }
  0x10   : > { %434 = vmatpush.msra.mxu0 %v410_v3  ;;  %565 = vmatpush.msra.mxu1 %v410_v3  ;;  %202 = vst [vmem:[#allocation2 + $0x20] sm:$0xff] %v606_v2  ;;  %v405_v18 = vld [vmem:[%s815_s2 + $0x40] sm:$0xff]  ;;  %v404_v21 = vld [vmem:[%s815_s2 + $0x38] sm:$0xff]  ;;  %v403_v24 = vld [vmem:[%s815_s2 + $0x30] sm:$0xff] }
  0x11   : > { %203 = vst [vmem:[#allocation2 + $0x28] sm:$0x3] %v606_v2  ;;  %v713_v25 = vld [vmem:[%s814_s1 + $0x4] ss:$0 sm:$0xff]  ;;  %v718_v26 = vld [vmem:[%s814_s1 + $0x5] ss:$0 sm:$0xff] }
  0x12   : > { %435 = vmatpush.msra.mxu0 %v409_v4  ;;  %566 = vmatpush.msra.mxu1 %v409_v4  ;;  %204 = vst [vmem:[#allocation2 + $0x30] sm:$0xff] %v606_v2  ;;  %v402_v27 = vld [vmem:[%s815_s2 + $0x28] sm:$0xff]  ;;  %v401_v28 = vld [vmem:[%s815_s2 + $0x20] sm:$0xff]  ;;  %v400_v32 = vld [vmem:[%s815_s2 + $0x18] sm:$0xff] }
  0x13   : > { %205 = vst [vmem:[#allocation2 + $0x38] sm:$0x3] %v606_v2  ;;  %v235_v10 = vld [vmem:[#allocation2] ss:$2 sm:$0xf]  ;;  %v399_v40 = vld [vmem:[%s815_s2 + $0x10] sm:$0xff] }
  0x14   : > { %436 = vmatpush.msra.mxu0 %v408_v5  ;;  %567 = vmatpush.msra.mxu1 %v408_v5  ;;  %206 = vst [vmem:[#allocation2 + $0x40] sm:$0xff] %v606_v2  ;;  %v253_v11 = vld [vmem:[#allocation2 + $0x1] ss:$2 sm:$0xf]  ;;  %v244_v15 = vmul.f32 %v667_v6, %v235_v10  ;;  %v731_v30 = vld [vmem:[%s814_s1 + $0x6] ss:$0 sm:$0xff] }
  0x15   : > { %207 = vst [vmem:[#allocation2 + $0x48] sm:$0x3] %v606_v2  ;;  %v271_v13 = vld [vmem:[#allocation2 + $0x2] ss:$2 sm:$0xf]  ;;  %v262_v16 = vmul.f32 %v676_v8, %v253_v11  ;;  %v397_v3 = vld [vmem:[%s815_s2] sm:$0xff] }
  0x16   : > { %437 = vmatpush.msra.mxu0 %v407_v7  ;;  %568 = vmatpush.msra.mxu1 %v407_v7  ;;  %227 = vst [vmem:[#allocation2 + $0x11] sm:$0xff] %v218_v12  ;;  %v280_v23 = vmul.f32 %v696_v17, %v271_v13  ;;  %v736_v31 = vld [vmem:[%s814_s1 + $0x8] ss:$0 sm:$0xff]  ;;  %v747_v39 = vld [vmem:[%s814_s1 + $0x9] ss:$0 sm:$0xff]  ;;  %v222_v11 = vld [vmem:[%s684_s12 + $0x20] sm:$0xff] }
  0x17   : > { %228 = vst [vmem:[#allocation2 + $0x21] sm:$0xff] %v219_v14  ;;  %v266_v22 = vadd.f32 %v262_v16, %v244_v15  ;;  %v398_v49 = vld [vmem:[%s815_s2 + $0x8] sm:$0xff] }
  0x18   : > { %438 = vmatpush.msra.mxu0 %v406_v9  ;;  %569 = vmatpush.msra.mxu1 %v406_v9  ;;  %229 = vst [vmem:[#allocation2 + $0x31] sm:$0xff] %v220_v19  ;;  %v763_v54 = vld [vmem:[%s814_s1 + $0xa] ss:$0 sm:$0xff] }
  0x19   : > { %230 = vst [vmem:[#allocation2 + $0x41] sm:$0xff] %v221_v20  ;;  %v284_v29 = vadd.f32 %v280_v23, %v266_v22  ;;  %v223_v16 = vld [vmem:[%s684_s12 + $0x28] sm:$0xff] }
  0x1a   : > { %439 = vmatpush.msra.mxu0 %v405_v18  ;;  %570 = vmatpush.msra.mxu1 %v405_v18  ;;  %208 = vst [vmem:[#allocation2 + $0x50] sm:$0xff] %v606_v2 }
  0x1b   : > { %209 = vst [vmem:[#allocation2 + $0x58] sm:$0x3] %v606_v2 }
  0x1c   : > { %440 = vmatpush.msra.mxu0 %v404_v21  ;;  %571 = vmatpush.msra.mxu1 %v404_v21  ;;  %210 = vst [vmem:[#allocation2 + $0x60] sm:$0xff] %v606_v2  ;;  %v224_v21 = vld [vmem:[%s684_s12 + $0x30] sm:$0xff] }
  0x1d   : > { %v288_v33 = vld [vmem:[#allocation2 + $0x10] ss:$2 sm:$0xf]  ;;  %v307_v34 = vld [vmem:[#allocation2 + $0x11] ss:$2 sm:$0xf] }
  0x1e   : > { %441 = vmatpush.msra.mxu0 %v403_v24  ;;  %572 = vmatpush.msra.mxu1 %v403_v24  ;;  %v237_v35 = vld [vmem:[#allocation2 + $0x20] ss:$2 sm:$0xf]  ;;  %v255_v36 = vld [vmem:[#allocation2 + $0x21] ss:$2 sm:$0xf]  ;;  %v298_v37 = vmul.f32 %v713_v25, %v288_v33  ;;  %v316_v38 = vmul.f32 %v718_v26, %v307_v34 }
  0x1f   : > { %v245_v41 = vmul.f32 %v667_v6, %v237_v35  ;;  %v263_v42 = vmul.f32 %v676_v8, %v255_v36  ;;  %v273_v43 = vld [vmem:[#allocation2 + $0x22] ss:$2 sm:$0xf]  ;;  %v290_v44 = vld [vmem:[#allocation2 + $0x30] ss:$2 sm:$0xf] }
  0x20   : > { %442 = vmatpush.msra.mxu0 %v402_v27  ;;  %573 = vmatpush.msra.mxu1 %v402_v27  ;;  %v281_v45 = vmul.f32 %v696_v17, %v273_v43  ;;  %v302_v46 = vadd.f32 %v298_v37, %v284_v29  ;;  %v309_v47 = vld [vmem:[#allocation2 + $0x31] ss:$2 sm:$0xf]  ;;  %v325_v48 = vld [vmem:[#allocation2 + $0x12] ss:$2 sm:$0xf]  ;;  %v299_v51 = vmul.f32 %v713_v25, %v290_v44 }
  0x21   : > { %v267_v50 = vadd.f32 %v263_v42, %v245_v41  ;;  %v334_v52 = vmul.f32 %v731_v30, %v325_v48  ;;  %v343_v53 = vld [vmem:[#allocation2 + $0x20] ss:$2 sm:$0xf]  ;;  %v327_v56 = vld [vmem:[#allocation2 + $0x32] ss:$2 sm:$0xf]  ;;  %v317_v60 = vmul.f32 %v718_v26, %v309_v47 }
  0x22   : > { %443 = vmatpush.msra.mxu0 %v401_v28  ;;  %574 = vmatpush.msra.mxu1 %v401_v28  ;;  %v320_v55 = vadd.f32 %v316_v38, %v302_v46  ;;  %v353_v57 = vmul.f32 %v736_v31, %v343_v53  ;;  %v362_v58 = vld [vmem:[#allocation2 + $0x21] ss:$2 sm:$0xf]  ;;  %v345_v61 = vld [vmem:[#allocation2 + $0x40] ss:$2 sm:$0xf]  ;;  %v335_v5 = vmul.f32 %v731_v30, %v327_v56 }
  0x23   : > { %v285_v59 = vadd.f32 %v281_v45, %v267_v50  ;;  %v380_v62 = vld [vmem:[#allocation2 + $0x22] ss:$2 sm:$0xf]  ;;  %v364_v0 = vld [vmem:[#allocation2 + $0x41] ss:$2 sm:$0xf]  ;;  %v371_v1 = vmul.f32 %v747_v39, %v362_v58  ;;  %v354_v14 = vmul.f32 %v736_v31, %v345_v61 }
  0x24   : > { %444 = vmatpush.msra.mxu0 %v400_v32  ;;  %575 = vmatpush.msra.mxu1 %v400_v32  ;;  %v338_v63 = vadd.f32 %v334_v52, %v320_v55  ;;  %211 = vst [vmem:[#allocation2 + $0x68] sm:$0x3] %v606_v2  ;;  %v239_v7 = vld [vmem:[#allocation2 + $0x40] ss:$2 sm:$0xf]  ;;  %v389_v10 = vmul.f32 %v763_v54, %v380_v62  ;;  %v225_v28 = vld [vmem:[%s684_s12 + $0x38] sm:$0xff] }
  0x25   : > { %v303_v4 = vadd.f32 %v299_v51, %v285_v59  ;;  %212 = vst [vmem:[#allocation2 + $0x70] sm:$0xff] %v606_v2  ;;  %v257_v12 = vld [vmem:[#allocation2 + $0x41] ss:$2 sm:$0xf]  ;;  %v246_v18 = vmul.f32 %v667_v6, %v239_v7  ;;  %v372_v24 = vmul.f32 %v747_v39, %v364_v0 }
  0x26   : > { %445 = vmatpush.msra.mxu0 %v399_v40  ;;  %576 = vmatpush.msra.mxu1 %v399_v40  ;;  %v357_v9 = vadd.f32 %v353_v57, %v338_v63  ;;  %213 = vst [vmem:[#allocation2 + $0x78] sm:$0x3] %v606_v2  ;;  %v382_v15 = vld [vmem:[#allocation2 + $0x42] ss:$2 sm:$0xf]  ;;  %v264_v19 = vmul.f32 %v676_v8, %v257_v12 }
  0x27   : > { %v321_v13 = vadd.f32 %v317_v60, %v303_v4  ;;  %214 = vst [vmem:[#allocation2 + $0x80] sm:$0xff] %v606_v2  ;;  %v275_v22 = vld [vmem:[#allocation2 + $0x42] ss:$2 sm:$0xf]  ;;  %v390_v32 = vmul.f32 %v763_v54, %v382_v15 }
  0x28   : > { %446 = vmatpush.msra.mxu0 %v398_v49  ;;  %577 = vmatpush.msra.mxu1 %v398_v49  ;;  %v375_v20 = vadd.f32 %v371_v1, %v357_v9  ;;  %215 = vst [vmem:[#allocation2 + $0x88] sm:$0x3] %v606_v2  ;;  %v268_v33 = vadd.f32 %v264_v19, %v246_v18  ;;  %v597_v19 = vld [vmem:[%s816_s3] ss:$0 sm:$0xff] }
  0x29   : > { %v339_v23 = vadd.f32 %v335_v5, %v321_v13  ;;  %231 = vst [vmem:[#allocation2 + $0x51] sm:$0xff] %v222_v11  ;;  %v282_v34 = vmul.f32 %v696_v17, %v275_v22 }
  0x2a   : > { %447 = vmatpush.msra.mxu0 %v397_v3  ;;  %578 = vmatpush.msra.mxu1 %v397_v3  ;;  %v393_v27 = vadd.f32 %v389_v10, %v375_v20  ;;  %232 = vst [vmem:[#allocation2 + $0x61] sm:$0xff] %v223_v16 }
  0x2b   : > { %v358_v29 = vadd.f32 %v354_v14, %v339_v23  ;;  %233 = vst [vmem:[#allocation2 + $0x71] sm:$0xff] %v224_v21  ;;  %v286_v36 = vadd.f32 %v282_v34, %v268_v33 }
  0x2c   : > { %421 = vst [vmem:[#allocation1] ss:$2 sm:$0xff] %v393_v27 }
  0x2d   : > { %v376_v35 = vadd.f32 %v372_v24, %v358_v29  ;;  %234 = vst [vmem:[#allocation2 + $0x81] sm:$0xff] %v225_v28 }
  0x2f   : > { %v394_v2 = vadd.f32 %v390_v32, %v376_v35 }
  0x30   : > { %v292_v37 = vld [vmem:[#allocation2 + $0x50] ss:$2 sm:$0xf]  ;;  %v311_v38 = vld [vmem:[#allocation2 + $0x51] ss:$2 sm:$0xf] }
  0x31   : > { %423 = vst [vmem:[#allocation1 + $0x1] ss:$2 sm:$0xff] %v394_v2  ;;  %v241_v40 = vld [vmem:[#allocation2 + $0x60] ss:$2 sm:$0xf]  ;;  %v300_v41 = vmul.f32 %v713_v25, %v292_v37  ;;  %v318_v42 = vmul.f32 %v718_v26, %v311_v38 }
  0x32   : > { %v247_v43 = vmul.f32 %v667_v6, %v241_v40  ;;  %v259_v44 = vld [vmem:[#allocation2 + $0x61] ss:$2 sm:$0xf]  ;;  %v277_v45 = vld [vmem:[#allocation2 + $0x62] ss:$2 sm:$0xf] }
  0x33   : > { %v265_v46 = vmul.f32 %v676_v8, %v259_v44  ;;  %v283_v47 = vmul.f32 %v696_v17, %v277_v45  ;;  %v294_v48 = vld [vmem:[#allocation2 + $0x70] ss:$2 sm:$0xf]  ;;  %v304_v49 = vadd.f32 %v300_v41, %v286_v36  ;;  %v313_v50 = vld [vmem:[#allocation2 + $0x71] ss:$2 sm:$0xf] }
  0x34   : > { %v329_v51 = vld [vmem:[#allocation2 + $0x52] ss:$2 sm:$0xf]  ;;  %v301_v53 = vmul.f32 %v713_v25, %v294_v48  ;;  %v347_v57 = vld [vmem:[#allocation2 + $0x60] ss:$2 sm:$0xf]  ;;  %v319_v8 = vmul.f32 %v718_v26, %v313_v50 }
  0x35   : > { %v269_v52 = vadd.f32 %v265_v46, %v247_v43  ;;  %v322_v55 = vadd.f32 %v318_v42, %v304_v49  ;;  %v336_v56 = vmul.f32 %v731_v30, %v329_v51  ;;  %v331_v58 = vld [vmem:[#allocation2 + $0x72] ss:$2 sm:$0xf]  ;;  %v355_v6 = vmul.f32 %v736_v31, %v347_v57  ;;  %v366_v59 = vld [vmem:[#allocation2 + $0x61] ss:$2 sm:$0xf] }
  0x36   : > { %v373_v17 = vmul.f32 %v747_v39, %v366_v59  ;;  %v384_v62 = vld [vmem:[#allocation2 + $0x62] ss:$2 sm:$0xf]  ;;  %v337_v25 = vmul.f32 %v731_v30, %v331_v58  ;;  %v368_v5 = vld [vmem:[#allocation2 + $0x81] ss:$2 sm:$0xf] }
  0x37   : > { %v287_v60 = vadd.f32 %v283_v47, %v269_v52  ;;  %v340_v61 = vadd.f32 %v336_v56, %v322_v55  ;;  %v349_v0 = vld [vmem:[#allocation2 + $0x80] ss:$2 sm:$0xf]  ;;  %v391_v4 = vmul.f32 %v763_v54, %v384_v62  ;;  %v374_v12 = vmul.f32 %v747_v39, %v368_v5 }
  0x38   : > { %v428_v63 = vld.sshfl [vmem:[#allocation1] sm:$0xff pattern:$0x75316420]  ;;  %v356_v9 = vmul.f32 %v736_v31, %v349_v0  ;;  %v386_v26 = vld [vmem:[#allocation2 + $0x82] ss:$2 sm:$0xf] }
  0x39   : > { %448 = vmatmul.f32.vlgmr.msra.gmra.mxu0 %v428_v63  ;;  %v305_v1 = vadd.f32 %v301_v53, %v287_v60  ;;  %v359_v3 = vadd.f32 %v355_v6, %v340_v61  ;;  %v392_v15 = vmul.f32 %v763_v54, %v386_v26 }
  0x3b   : > { %v323_v7 = vadd.f32 %v319_v8, %v305_v1  ;;  %v377_v10 = vadd.f32 %v373_v17, %v359_v3 }
  0x3d   : > { %v341_v11 = vadd.f32 %v337_v25, %v323_v7  ;;  %v395_v13 = vadd.f32 %v391_v4, %v377_v10 }
  0x3f   : > { %v360_v14 = vadd.f32 %v356_v9, %v341_v11  ;;  %425 = vst [vmem:[#allocation1 + $0x10] ss:$2 sm:$0xff] %v395_v13 }
  0x41   : > { %v378_v16 = vadd.f32 %v374_v12, %v360_v14 }
  0x43   : > { %v396_v30 = vadd.f32 %v392_v15, %v378_v16 }
  0x45   : > { %427 = vst [vmem:[#allocation1 + $0x11] ss:$2 sm:$0xff] %v396_v30 }
  0x4c   : > { %v429_v18 = vld.sshfl [vmem:[#allocation1 + $0x10] sm:$0xff pattern:$0x75316420] }
  0x4d   : > { %451 = vmatmul.f32.vlgmr.msra.gmra.mxu1 %v429_v18 }
  0xb6   : > { %v449_v31 = vpop.f32.mrf.mxu0 }
  0xb7   : > { %v450_v20 = vadd.f32 %v597_v19, %v449_v31 }
  0xb9   : > { %v455_v39 = vmax.f32 %v450_v20, 0.0 }
  0xbb   : > { %v459_v21 = vrot.slane %v455_v39, 4  ;;  %463 = vst [vmem:[%s197_s28] sm:$0xf] %v455_v39 }
  0xbd   : > { %464 = vst [vmem:[%s197_s28 + $0x4] sm:$0xf] %v459_v21 }
  0xca   : > { %v452_v54 = vpop.f32.mrf.mxu1 }
  0xcb   : > { %v453_v22 = vadd.f32 %v597_v19, %v452_v54 }
  0xcd   : > { %v456_v23 = vmax.f32 %v453_v22, 0.0 }
  0xcf   : > { %v460_v24 = vrot.slane %v456_v23, 4  ;;  %465 = vst [vmem:[%s197_s28 + $0x8] sm:$0xf] %v456_v23 }
  0xd1   : > { %466 = vst [vmem:[%s197_s28 + $0xc] sm:$0xf] %v460_v24 }
  0xd2 PF: > { %s14_s15 = sadd.s32 1, %s604_s15  }
  0xd3   : > { %p11_p4 = scmp.ge.s32.totalorder %s14_s15, 4  }
  0xd5   :  { %13 = sbr.rel (!%p11_p4) target bundleno = 1 (0x1), region = 106 }

// kernel: fpem_forward.9
= control target key start
LH: loop header
LB: loop body
LE: loop exit
PB: predicated region body
PF: predicated region fallthrough
CT: control target
= control target key end

     0   :  { %s921_s15 = smov 0   ;;  %s1195_s0 = inlined_call_operand.vmem [shape: f32[2,16,16,128], index: 0, kind: input, shape index: {}]   ;;  %s1196_s1 = inlined_call_operand.vmem [shape: f32[3,3,128], index: 1, kind: input, shape index: {}]   ;;  %s1197_s2 = inlined_call_operand.vmem [shape: f32[128,128], index: 2, kind: input, shape index: {}]   ;;  %s1198_s3 = inlined_call_operand.vmem [shape: f32[1,128], index: 3, kind: input, shape index: {}]   ;;  %s1199_s4 = inlined_call_operand.vmem [shape: f32[2,8,8,128], index: 4, kind: output, shape index: {}]  }
   0x1 LB: > { %s801_s16 = sadd.s32 4294967295, %s893_s15   ;;  %p805_p0 = scmp.ge.s32.totalorder %s893_s15, 1  ;;  %s893_s15 = sphi %s921_s15, %s14_s15  }
   0x2   : > { %p162_p1 = scmp.lt.s32.totalorder %s893_s15, 3 }
   0x4   : > { %p163_p2 = pnand %p805_p0, %p162_p1 }
   0x5   : > { %p188_p3 = scmp.lt.s32.totalorder (!%p163_p2), %s801_s16, 1 }
   0x6   : > { %166 = sbr.rel (%p163_p2) target bundleno = 253 (0xfd), region = 36 }
   0xb   : > { %v638_v0 = vld [vmem:[%s1197_s2 + $0x78] sm:$0xff]  ;;  %v637_v1 = vld [vmem:[%s1197_s2 + $0x70] sm:$0xff]  ;;  %v895_v2 = vmov 0.0   ;;  %v636_v3 = vld [vmem:[%s1197_s2 + $0x68] sm:$0xff]  ;;  %s1201_s16 = smov (!%p188_p3, %s801_s16), 1 }
   0xc   : > { %821 = vmatpush.msra.mxu2 %v638_v0  ;;  %822 = vmatpush.msra.mxu3 %v638_v0  ;;  %222 = vst [vmem:[#allocation2 + $0xc0] sm:$0xff] %v895_v2  ;;  %v635_v4 = vld [vmem:[%s1197_s2 + $0x60] sm:$0xff]  ;;  %s818_s25 = sshll.u32 %s1201_s16, 8  ;;  %v634_v5 = vld [vmem:[%s1197_s2 + $0x58] sm:$0xff]  ;;  %v633_v7 = vld [vmem:[%s1197_s2 + $0x50] sm:$0xff] }
   0xd   : > { %643 = vmatpush.msra.mxu0 %v638_v0  ;;  %820 = vmatpush.msra.mxu1 %v638_v0  ;;  %223 = vst [vmem:[#allocation2 + $0xc8] sm:$0xff] %v895_v2  ;;  %s951_s28 = scalar_lea.vmem %s1195_s0, %s818_s25  ;;  %v632_v10 = vld [vmem:[%s1197_s2 + $0x48] sm:$0xff]  ;;  %v631_v13 = vld [vmem:[%s1197_s2 + $0x40] sm:$0xff]  ;;  %v630_v16 = vld [vmem:[%s1197_s2 + $0x38] sm:$0xff]  ;;  %s819_s25 = sshll.u32 %s1201_s16, 6 }
   0xe   : > { %824 = vmatpush.msra.mxu2 %v637_v1  ;;  %825 = vmatpush.msra.mxu3 %v637_v1  ;;  %224 = vst [vmem:[#allocation2 + $0xd0] sm:$0x3] %v895_v2  ;;  %v266_v6 = vld [vmem:[%s951_s28 + $0x70] sm:$0xff]  ;;  %v267_v8 = vld [vmem:[%s951_s28 + $0x78] sm:$0xff]  ;;  %v268_v9 = vld [vmem:[%s951_s28 + $0x80] sm:$0xff]  ;;  %s197_s29 = scalar_lea.vmem %s1199_s4, %s819_s25 }
   0xf   : > { %644 = vmatpush.msra.mxu0 %v637_v1  ;;  %823 = vmatpush.msra.mxu1 %v637_v1  ;;  %225 = vst [vmem:[#allocation2 + $0xd8] sm:$0xff] %v895_v2  ;;  %v269_v11 = vld [vmem:[%s951_s28 + $0x88] sm:$0xff]  ;;  %v270_v12 = vld [vmem:[%s951_s28 + $0x90] sm:$0xff]  ;;  %v271_v14 = vld [vmem:[%s951_s28 + $0x98] sm:$0xff] }
  0x10   : > { %827 = vmatpush.msra.mxu2 %v636_v3  ;;  %828 = vmatpush.msra.mxu3 %v636_v3  ;;  %226 = vst [vmem:[#allocation2 + $0xe0] sm:$0xff] %v895_v2  ;;  %v979_v15 = vld [vmem:[%s1196_s1] ss:$0 sm:$0xff]  ;;  %v987_v17 = vld [vmem:[%s1196_s1 + $0x1] ss:$0 sm:$0xff]  ;;  %v629_v19 = vld [vmem:[%s1197_s2 + $0x30] sm:$0xff] }
  0x11   : > { %645 = vmatpush.msra.mxu0 %v636_v3  ;;  %826 = vmatpush.msra.mxu1 %v636_v3  ;;  %227 = vst [vmem:[#allocation2 + $0xe8] sm:$0x3] %v895_v2  ;;  %v992_v18 = vld [vmem:[%s1196_s1 + $0x2] ss:$0 sm:$0xff]  ;;  %v628_v20 = vld [vmem:[%s1197_s2 + $0x28] sm:$0xff]  ;;  %v626_v35 = vld [vmem:[%s1197_s2 + $0x18] sm:$0xff] }
  0x12   : > { %830 = vmatpush.msra.mxu2 %v635_v4  ;;  %831 = vmatpush.msra.mxu3 %v635_v4  ;;  %228 = vst [vmem:[#allocation2 + $0xf0] sm:$0xff] %v895_v2  ;;  %v1004_v21 = vld [vmem:[%s1196_s1 + $0x4] ss:$0 sm:$0xff]  ;;  %v1013_v28 = vld [vmem:[%s1196_s1 + $0x5] ss:$0 sm:$0xff]  ;;  %v625_v40 = vld [vmem:[%s1197_s2 + $0x10] sm:$0xff] }
  0x13   : > { %646 = vmatpush.msra.mxu0 %v635_v4  ;;  %829 = vmatpush.msra.mxu1 %v635_v4  ;;  %229 = vst [vmem:[#allocation2 + $0xf8] sm:$0xff] %v895_v2  ;;  %v627_v29 = vld [vmem:[%s1197_s2 + $0x20] sm:$0xff]  ;;  %v1033_v39 = vld [vmem:[%s1196_s1 + $0x8] ss:$0 sm:$0xff]  ;;  %v1044_v44 = vld [vmem:[%s1196_s1 + $0x9] ss:$0 sm:$0xff] }
  0x14   : > { %833 = vmatpush.msra.mxu2 %v634_v5  ;;  %834 = vmatpush.msra.mxu3 %v634_v5  ;;  %230 = vst [vmem:[#allocation2 + $0x100] sm:$0x3] %v895_v2  ;;  %v1023_v34 = vld [vmem:[%s1196_s1 + $0x6] ss:$0 sm:$0xff]  ;;  %v624_v45 = vld [vmem:[%s1197_s2 + $0x8] sm:$0xff]  ;;  %v274_v58 = vld [vmem:[%s951_s28 + $0xb0] sm:$0xff] }
  0x15   : > { %647 = vmatpush.msra.mxu0 %v634_v5  ;;  %832 = vmatpush.msra.mxu1 %v634_v5  ;;  %299 = vst [vmem:[#allocation2 + $0xc1] sm:$0xff] %v266_v6  ;;  %v1055_v49 = vld [vmem:[%s1196_s1 + $0xa] ss:$0 sm:$0xff]  ;;  %v623_v50 = vld [vmem:[%s1197_s2] sm:$0xff]  ;;  %v275_v59 = vld [vmem:[%s951_s28 + $0xb8] sm:$0xff] }
  0x16   : > { %836 = vmatpush.msra.mxu2 %v633_v7  ;;  %837 = vmatpush.msra.mxu3 %v633_v7  ;;  %300 = vst [vmem:[#allocation2 + $0xc9] sm:$0xff] %v267_v8  ;;  %v276_v60 = vld [vmem:[%s951_s28 + $0xc0] sm:$0xff]  ;;  %v277_v61 = vld [vmem:[%s951_s28 + $0xc8] sm:$0xff]  ;;  %v278_v62 = vld [vmem:[%s951_s28 + $0xd0] sm:$0xff] }
  0x17   : > { %648 = vmatpush.msra.mxu0 %v633_v7  ;;  %835 = vmatpush.msra.mxu1 %v633_v7  ;;  %301 = vst [vmem:[#allocation2 + $0xd9] sm:$0xff] %v268_v9  ;;  %v279_v63 = vld [vmem:[%s951_s28 + $0xd8] sm:$0xff]  ;;  %v252_v3 = vld [vmem:[%s951_s28] sm:$0xff]  ;;  %v253_v4 = vld [vmem:[%s951_s28 + $0x8] sm:$0xff] }
  0x18   : > { %839 = vmatpush.msra.mxu2 %v632_v10  ;;  %840 = vmatpush.msra.mxu3 %v632_v10  ;;  %302 = vst [vmem:[#allocation2 + $0xe1] sm:$0xff] %v269_v11  ;;  %v254_v7 = vld [vmem:[%s951_s28 + $0x10] sm:$0xff]  ;;  %v255_v8 = vld [vmem:[%s951_s28 + $0x18] sm:$0xff] }
  0x19   : > { %649 = vmatpush.msra.mxu0 %v632_v10  ;;  %838 = vmatpush.msra.mxu1 %v632_v10  ;;  %303 = vst [vmem:[#allocation2 + $0xf1] sm:$0xff] %v270_v12 }
  0x1a   : > { %842 = vmatpush.msra.mxu2 %v631_v13  ;;  %843 = vmatpush.msra.mxu3 %v631_v13  ;;  %304 = vst [vmem:[#allocation2 + $0xf9] sm:$0xff] %v271_v14 }
  0x1b   : > { %650 = vmatpush.msra.mxu0 %v631_v13  ;;  %841 = vmatpush.msra.mxu1 %v631_v13  ;;  %198 = vst [vmem:[#allocation2] sm:$0xff] %v895_v2 }
  0x1c   : > { %845 = vmatpush.msra.mxu2 %v630_v16  ;;  %846 = vmatpush.msra.mxu3 %v630_v16  ;;  %199 = vst [vmem:[#allocation2 + $0x8] sm:$0xff] %v895_v2 }
  0x1d   : > { %651 = vmatpush.msra.mxu0 %v630_v16  ;;  %844 = vmatpush.msra.mxu1 %v630_v16  ;;  %v325_v22 = vld [vmem:[#allocation2 + $0xc0] ss:$2 sm:$0xff]  ;;  %v359_v23 = vld [vmem:[#allocation2 + $0xc1] ss:$2 sm:$0xff]  ;;  %200 = vst [vmem:[#allocation2 + $0x10] sm:$0x3] %v895_v2 }
  0x1e   : > { %v393_v24 = vld [vmem:[#allocation2 + $0xc2] ss:$2 sm:$0xff]  ;;  %848 = vmatpush.msra.mxu2 %v629_v19  ;;  %849 = vmatpush.msra.mxu3 %v629_v19  ;;  %v338_v25 = vmul.f32 %v979_v15, %v325_v22  ;;  %v372_v26 = vmul.f32 %v987_v17, %v359_v23  ;;  %201 = vst [vmem:[#allocation2 + $0x18] sm:$0xff] %v895_v2 }
  0x1f   : > { %v406_v27 = vmul.f32 %v992_v18, %v393_v24  ;;  %652 = vmatpush.msra.mxu0 %v629_v19  ;;  %847 = vmatpush.msra.mxu1 %v629_v19  ;;  %v426_v30 = vld [vmem:[#allocation2 + $0xd8] ss:$2 sm:$0xff]  ;;  %v461_v31 = vld [vmem:[#allocation2 + $0xd9] ss:$2 sm:$0xff]  ;;  %202 = vst [vmem:[#allocation2 + $0x20] sm:$0xff] %v895_v2  ;;  %v258_v23 = vld [vmem:[%s951_s28 + $0x30] sm:$0xff] }
  0x20   : > { %851 = vmatpush.msra.mxu2 %v628_v20  ;;  %852 = vmatpush.msra.mxu3 %v628_v20  ;;  %v380_v32 = vadd.f32 %v372_v26, %v338_v25  ;;  %v440_v33 = vmul.f32 %v1004_v21, %v426_v30  ;;  %v495_v36 = vld [vmem:[#allocation2 + $0xda] ss:$2 sm:$0xff]  ;;  %v474_v38 = vmul.f32 %v1013_v28, %v461_v31 }
  0x21   : > { %653 = vmatpush.msra.mxu0 %v628_v20  ;;  %850 = vmatpush.msra.mxu1 %v628_v20  ;;  %v529_v41 = vld [vmem:[#allocation2 + $0xf0] ss:$2 sm:$0xff]  ;;  %203 = vst [vmem:[#allocation2 + $0x28] sm:$0x3] %v895_v2  ;;  %v508_v43 = vmul.f32 %v1023_v34, %v495_v36  ;;  %v564_v46 = vld [vmem:[#allocation2 + $0xf1] ss:$2 sm:$0xff] }
  0x22   : > { %854 = vmatpush.msra.mxu2 %v627_v29  ;;  %855 = vmatpush.msra.mxu3 %v627_v29  ;;  %v414_v37 = vadd.f32 %v406_v27, %v380_v32  ;;  %204 = vst [vmem:[#allocation2 + $0x30] sm:$0xff] %v895_v2  ;;  %v543_v48 = vmul.f32 %v1033_v39, %v529_v41  ;;  %v598_v51 = vld [vmem:[#allocation2 + $0xf2] ss:$2 sm:$0xff] }
  0x23   : > { %654 = vmatpush.msra.mxu0 %v627_v29  ;;  %853 = vmatpush.msra.mxu1 %v627_v29  ;;  %205 = vst [vmem:[#allocation2 + $0x38] sm:$0xff] %v895_v2  ;;  %v577_v53 = vmul.f32 %v1044_v44, %v564_v46  ;;  %v611_v55 = vmul.f32 %v1055_v49, %v598_v51  ;;  %v317_v0 = vld [vmem:[#allocation2] ss:$2 sm:$0xff]  ;;  %v351_v1 = vld [vmem:[#allocation2 + $0x1] ss:$2 sm:$0xff]  ;;  %v259_v27 = vld [vmem:[%s951_s28 + $0x38] sm:$0xff] }
  0x24   : > { %857 = vmatpush.msra.mxu2 %v626_v35  ;;  %858 = vmatpush.msra.mxu3 %v626_v35  ;;  %v448_v42 = vadd.f32 %v440_v33, %v414_v37  ;;  %206 = vst [vmem:[#allocation2 + $0x40] sm:$0x3] %v895_v2  ;;  %v368_v5 = vmul.f32 %v987_v17, %v351_v1  ;;  %v385_v6 = vld [vmem:[#allocation2 + $0x2] ss:$2 sm:$0xff]  ;;  %v361_v46 = vld [vmem:[#allocation2 + $0xf1] ss:$2 sm:$0xff] }
  0x25   : > { %655 = vmatpush.msra.mxu0 %v626_v35  ;;  %856 = vmatpush.msra.mxu1 %v626_v35  ;;  %207 = vst [vmem:[#allocation2 + $0x48] sm:$0xff] %v895_v2  ;;  %v402_v12 = vmul.f32 %v992_v18, %v385_v6  ;;  %v260_v33 = vld [vmem:[%s951_s28 + $0x40] sm:$0xff]  ;;  %v261_v35 = vld [vmem:[%s951_s28 + $0x48] sm:$0xff] }
  0x26   : > { %860 = vmatpush.msra.mxu2 %v625_v40  ;;  %861 = vmatpush.msra.mxu3 %v625_v40  ;;  %v482_v47 = vadd.f32 %v474_v38, %v448_v42  ;;  %208 = vst [vmem:[#allocation2 + $0x50] sm:$0xff] %v895_v2 }
  0x27   : > { %656 = vmatpush.msra.mxu0 %v625_v40  ;;  %859 = vmatpush.msra.mxu1 %v625_v40  ;;  %209 = vst [vmem:[#allocation2 + $0x58] sm:$0x3] %v895_v2 }
  0x28   : > { %863 = vmatpush.msra.mxu2 %v624_v45  ;;  %864 = vmatpush.msra.mxu3 %v624_v45  ;;  %v516_v52 = vadd.f32 %v508_v43, %v482_v47  ;;  %210 = vst [vmem:[#allocation2 + $0x60] sm:$0xff] %v895_v2 }
  0x29   : > { %657 = vmatpush.msra.mxu0 %v624_v45  ;;  %862 = vmatpush.msra.mxu1 %v624_v45  ;;  %211 = vst [vmem:[#allocation2 + $0x68] sm:$0xff] %v895_v2  ;;  %v327_v45 = vld [vmem:[#allocation2 + $0xf0] ss:$2 sm:$0xff] }
  0x2a   : > { %866 = vmatpush.msra.mxu2 %v623_v50  ;;  %867 = vmatpush.msra.mxu3 %v623_v50  ;;  %v551_v54 = vadd.f32 %v543_v48, %v516_v52  ;;  %212 = vst [vmem:[#allocation2 + $0x70] sm:$0x3] %v895_v2  ;;  %v262_v48 = vld [vmem:[%s951_s28 + $0x50] sm:$0xff] }
  0x2b   : > { %658 = vmatpush.msra.mxu0 %v623_v50  ;;  %865 = vmatpush.msra.mxu1 %v623_v50  ;;  %213 = vst [vmem:[#allocation2 + $0x78] sm:$0xff] %v895_v2 }
  0x2c   : > { %v585_v56 = vadd.f32 %v577_v53, %v551_v54  ;;  %214 = vst [vmem:[#allocation2 + $0x80] sm:$0xff] %v895_v2  ;;  %v263_v54 = vld [vmem:[%s951_s28 + $0x58] sm:$0xff] }
  0x2d   : > { %215 = vst [vmem:[#allocation2 + $0x88] sm:$0x3] %v895_v2 }
  0x2e   : > { %v619_v57 = vadd.f32 %v611_v55, %v585_v56  ;;  %216 = vst [vmem:[#allocation2 + $0x90] sm:$0xff] %v895_v2  ;;  %v272_v55 = vld [vmem:[%s951_s28 + $0xa0] sm:$0xff] }
  0x2f   : > { %217 = vst [vmem:[#allocation2 + $0x98] sm:$0xff] %v895_v2 }
  0x30   : > { %671 = vmatmul.f32.vlgmr.msra.gmra.mxu2 %v619_v57  ;;  %218 = vst [vmem:[#allocation2 + $0xa0] sm:$0x3] %v895_v2 }
  0x31   : > { %219 = vst [vmem:[#allocation2 + $0xa8] sm:$0xff] %v895_v2 }
  0x32   : > { %220 = vst [vmem:[#allocation2 + $0xb0] sm:$0xff] %v895_v2 }
  0x33   : > { %221 = vst [vmem:[#allocation2 + $0xb8] sm:$0x3] %v895_v2 }
  0x34   : > { %231 = vst [vmem:[#allocation2 + $0x108] sm:$0xff] %v895_v2 }
  0x35   : > { %232 = vst [vmem:[#allocation2 + $0x110] sm:$0xff] %v895_v2 }
  0x36   : > { %233 = vst [vmem:[#allocation2 + $0x118] sm:$0x3] %v895_v2 }
  0x37   : > { %234 = vst [vmem:[#allocation2 + $0x120] sm:$0xff] %v895_v2 }
  0x38   : > { %235 = vst [vmem:[#allocation2 + $0x128] sm:$0xff] %v895_v2 }
  0x39   : > { %236 = vst [vmem:[#allocation2 + $0x130] sm:$0x3] %v895_v2 }
  0x3a   : > { %237 = vst [vmem:[#allocation2 + $0x138] sm:$0xff] %v895_v2 }
  0x3b   : > { %238 = vst [vmem:[#allocation2 + $0x140] sm:$0xff] %v895_v2 }
  0x3c   : > { %239 = vst [vmem:[#allocation2 + $0x148] sm:$0x3] %v895_v2 }
  0x3d   : > { %240 = vst [vmem:[#allocation2 + $0x150] sm:$0xff] %v895_v2 }
  0x3e   : > { %241 = vst [vmem:[#allocation2 + $0x158] sm:$0xff] %v895_v2 }
  0x3f   : > { %242 = vst [vmem:[#allocation2 + $0x160] sm:$0x3] %v895_v2 }
  0x40   : > { %243 = vst [vmem:[#allocation2 + $0x168] sm:$0xff] %v895_v2 }
  0x41   : > { %244 = vst [vmem:[#allocation2 + $0x170] sm:$0xff] %v895_v2 }
  0x42   : > { %245 = vst [vmem:[#allocation2 + $0x178] sm:$0x3] %v895_v2 }
  0x43   : > { %246 = vst [vmem:[#allocation2 + $0x180] sm:$0xff] %v895_v2 }
  0x44   : > { %247 = vst [vmem:[#allocation2 + $0x188] sm:$0xff] %v895_v2 }
  0x45   : > { %248 = vst [vmem:[#allocation2 + $0x190] sm:$0x3] %v895_v2  ;;  %v334_v2 = vmul.f32 %v979_v15, %v317_v0 }
  0x46   : > { %307 = vst [vmem:[#allocation2 + $0x121] sm:$0xff] %v274_v58 }
  0x47   : > { %308 = vst [vmem:[#allocation2 + $0x129] sm:$0xff] %v275_v59  ;;  %v376_v19 = vadd.f32 %v368_v5, %v334_v2  ;;  %v339_v59 = vmul.f32 %v979_v15, %v327_v45 }
  0x48   : > { %309 = vst [vmem:[#allocation2 + $0x139] sm:$0xff] %v276_v60  ;;  %v373_v60 = vmul.f32 %v987_v17, %v361_v46 }
  0x49   : > { %310 = vst [vmem:[#allocation2 + $0x141] sm:$0xff] %v277_v61  ;;  %v410_v32 = vadd.f32 %v402_v12, %v376_v19 }
  0x4a   : > { %311 = vst [vmem:[#allocation2 + $0x151] sm:$0xff] %v278_v62 }
  0x4b   : > { %312 = vst [vmem:[#allocation2 + $0x159] sm:$0xff] %v279_v63 }
  0x4c   : > { %285 = vst [vmem:[#allocation2 + $0x19] sm:$0xff] %v252_v3  ;;  %v273_v3 = vld [vmem:[%s951_s28 + $0xa8] sm:$0xff] }
  0x4d   : > { %286 = vst [vmem:[#allocation2 + $0x21] sm:$0xff] %v253_v4  ;;  %v395_v4 = vld [vmem:[#allocation2 + $0xf2] ss:$2 sm:$0xff] }
  0x4e   : > { %v329_v9 = vld [vmem:[#allocation2 + $0x120] ss:$2 sm:$0xff]  ;;  %v363_v10 = vld [vmem:[#allocation2 + $0x121] ss:$2 sm:$0xff]  ;;  %287 = vst [vmem:[#allocation2 + $0x31] sm:$0xff] %v254_v7 }
  0x4f   : > { %v397_v11 = vld [vmem:[#allocation2 + $0x122] ss:$2 sm:$0xff]  ;;  %v340_v13 = vmul.f32 %v979_v15, %v329_v9  ;;  %v374_v14 = vmul.f32 %v987_v17, %v363_v10  ;;  %288 = vst [vmem:[#allocation2 + $0x39] sm:$0xff] %v255_v8 }
  0x50   : > { %v408_v16 = vmul.f32 %v992_v18, %v397_v11  ;;  %v430_v20 = vld [vmem:[#allocation2 + $0x138] ss:$2 sm:$0xff]  ;;  %v465_v22 = vld [vmem:[#allocation2 + $0x139] ss:$2 sm:$0xff]  ;;  %291 = vst [vmem:[#allocation2 + $0x61] sm:$0xff] %v258_v23 }
  0x51   : > { %v382_v24 = vadd.f32 %v374_v14, %v340_v13  ;;  %v442_v25 = vmul.f32 %v1004_v21, %v430_v20  ;;  %v499_v26 = vld [vmem:[#allocation2 + $0x13a] ss:$2 sm:$0xff]  ;;  %v476_v30 = vmul.f32 %v1013_v28, %v465_v22  ;;  %292 = vst [vmem:[#allocation2 + $0x69] sm:$0xff] %v259_v27 }
  0x52   : > { %v533_v31 = vld [vmem:[#allocation2 + $0x150] ss:$2 sm:$0xff]  ;;  %v510_v41 = vmul.f32 %v1023_v34, %v499_v26  ;;  %v568_v47 = vld [vmem:[#allocation2 + $0x151] ss:$2 sm:$0xff]  ;;  %293 = vst [vmem:[#allocation2 + $0x79] sm:$0xff] %v260_v33  ;;  %v280_v8 = vld [vmem:[%s951_s28 + $0xe0] sm:$0xff] }
  0x53   : > { %v416_v29 = vadd.f32 %v408_v16, %v382_v24  ;;  %v545_v51 = vmul.f32 %v1033_v39, %v533_v31  ;;  %294 = vst [vmem:[#allocation2 + $0x81] sm:$0xff] %v261_v35  ;;  %v602_v56 = vld [vmem:[#allocation2 + $0x152] ss:$2 sm:$0xff]  ;;  %v579_v62 = vmul.f32 %v1044_v44, %v568_v47  ;;  %v365_v10 = vld [vmem:[#allocation2 + $0x151] ss:$2 sm:$0xff]  ;;  %v381_v16 = vadd.f32 %v373_v60, %v339_v59  ;;  %v281_v24 = vld [vmem:[%s951_s28 + $0xe8] sm:$0xff] }
  0x54   : > { %v418_v36 = vld [vmem:[#allocation2 + $0x18] ss:$2 sm:$0xff]  ;;  %v453_v37 = vld [vmem:[#allocation2 + $0x19] ss:$2 sm:$0xff]  ;;  %295 = vst [vmem:[#allocation2 + $0x91] sm:$0xff] %v262_v48  ;;  %v613_v5 = vmul.f32 %v1055_v49, %v602_v56  ;;  %v375_v31 = vmul.f32 %v987_v17, %v365_v10 }
  0x55   : > { %v487_v38 = vld [vmem:[#allocation2 + $0x1a] ss:$2 sm:$0xff]  ;;  %v450_v40 = vadd.f32 %v442_v25, %v416_v29  ;;  %v436_v42 = vmul.f32 %v1004_v21, %v418_v36  ;;  %v470_v43 = vmul.f32 %v1013_v28, %v453_v37  ;;  %296 = vst [vmem:[#allocation2 + $0x99] sm:$0xff] %v263_v54  ;;  %v407_v29 = vmul.f32 %v992_v18, %v395_v4  ;;  %v282_v37 = vld [vmem:[%s951_s28 + $0xf0] sm:$0xff]  ;;  %v566_v10 = vld [vmem:[#allocation2 + $0x121] ss:$2 sm:$0xff] }
  0x56   : > { %v504_v53 = vmul.f32 %v1023_v34, %v487_v38  ;;  %v521_v57 = vld [vmem:[#allocation2 + $0x30] ss:$2 sm:$0xff]  ;;  %v556_v58 = vld [vmem:[#allocation2 + $0x31] ss:$2 sm:$0xff]  ;;  %305 = vst [vmem:[#allocation2 + $0x109] sm:$0xff] %v272_v55 }
  0x57   : > { %v484_v50 = vadd.f32 %v476_v30, %v450_v40  ;;  %v444_v52 = vadd.f32 %v436_v42, %v410_v32  ;;  %v539_v0 = vmul.f32 %v1033_v39, %v521_v57  ;;  %v590_v1 = vld [vmem:[#allocation2 + $0x32] ss:$2 sm:$0xff]  ;;  %v573_v7 = vmul.f32 %v1044_v44, %v556_v58  ;;  %306 = vst [vmem:[#allocation2 + $0x111] sm:$0xff] %v273_v3  ;;  %v353_v47 = vld [vmem:[#allocation2 + $0x31] ss:$2 sm:$0xff]  ;;  %v257_v57 = vld [vmem:[%s951_s28 + $0x28] sm:$0xff] }
  0x58   : > { %v331_v9 = vld [vmem:[#allocation2 + $0x150] ss:$2 sm:$0xff]  ;;  %v607_v11 = vmul.f32 %v1055_v49, %v590_v1  ;;  %v321_v12 = vld [vmem:[#allocation2 + $0x60] ss:$2 sm:$0xff]  ;;  %v355_v13 = vld [vmem:[#allocation2 + $0x61] ss:$2 sm:$0xff]  ;;  %v415_v56 = vadd.f32 %v407_v29, %v381_v16 }
  0x59   : > { %v518_v61 = vadd.f32 %v510_v41, %v484_v50  ;;  %v478_v63 = vadd.f32 %v470_v43, %v444_v52  ;;  %v389_v14 = vld [vmem:[#allocation2 + $0x62] ss:$2 sm:$0xff]  ;;  %v336_v22 = vmul.f32 %v979_v15, %v321_v12  ;;  %v370_v23 = vmul.f32 %v987_v17, %v355_v13  ;;  %313 = vst [vmem:[#allocation2 + $0x169] sm:$0xff] %v280_v8  ;;  %v399_v38 = vld [vmem:[#allocation2 + $0x152] ss:$2 sm:$0xff] }
  0x5a   : > { %v404_v25 = vmul.f32 %v992_v18, %v389_v14  ;;  %v422_v26 = vld [vmem:[#allocation2 + $0x78] ss:$2 sm:$0xff]  ;;  %v457_v27 = vld [vmem:[#allocation2 + $0x79] ss:$2 sm:$0xff]  ;;  %v341_v30 = vmul.f32 %v979_v15, %v331_v9  ;;  %314 = vst [vmem:[#allocation2 + $0x171] sm:$0xff] %v281_v24  ;;  %v409_v52 = vmul.f32 %v992_v18, %v399_v38  ;;  %v265_v12 = vld [vmem:[%s951_s28 + $0x68] sm:$0xff] }
  0x5b   : > { %v553_v2 = vadd.f32 %v545_v51, %v518_v61  ;;  %v512_v6 = vadd.f32 %v504_v53, %v478_v63  ;;  %v378_v35 = vadd.f32 %v370_v23, %v336_v22  ;;  %v438_v36 = vmul.f32 %v1004_v21, %v422_v26  ;;  %v491_v40 = vld [vmem:[#allocation2 + $0x7a] ss:$2 sm:$0xff]  ;;  %315 = vst [vmem:[#allocation2 + $0x181] sm:$0xff] %v282_v37 }
  0x5c   : > { %v283_v41 = vld [vmem:[%s951_s28 + $0xf8] sm:$0xff]  ;;  %v472_v45 = vmul.f32 %v1013_v28, %v457_v27  ;;  %v383_v51 = vadd.f32 %v375_v31, %v341_v30  ;;  %v256_v53 = vld [vmem:[%s951_s28 + $0x20] sm:$0xff]  ;;  %v506_v55 = vmul.f32 %v1023_v34, %v491_v40  ;;  %290 = vst [vmem:[#allocation2 + $0x51] sm:$0xff] %v257_v57 }
  0x5d   : > { %v587_v19 = vadd.f32 %v579_v62, %v553_v2  ;;  %v547_v20 = vadd.f32 %v539_v0, %v512_v6  ;;  %v412_v43 = vadd.f32 %v404_v25, %v378_v35  ;;  %v319_v46 = vld [vmem:[#allocation2 + $0x30] ss:$2 sm:$0xff]  ;;  %v560_v50 = vld [vmem:[#allocation2 + $0x91] ss:$2 sm:$0xff]  ;;  %316 = vst [vmem:[#allocation2 + $0x189] sm:$0xff] %v283_v41  ;;  %v369_v0 = vmul.f32 %v987_v17, %v353_v47 }
  0x5e   : > { %v525_v48 = vld [vmem:[#allocation2 + $0x90] ss:$2 sm:$0xff]  ;;  %v357_v59 = vld [vmem:[#allocation2 + $0x91] ss:$2 sm:$0xff]  ;;  %v335_v63 = vmul.f32 %v979_v15, %v319_v46  ;;  %289 = vst [vmem:[#allocation2 + $0x49] sm:$0xff] %v256_v53  ;;  %v575_v8 = vmul.f32 %v1044_v44, %v560_v50  ;;  %v578_v35 = vmul.f32 %v1044_v44, %v566_v10 }
  0x5f   : > { %v621_v32 = vadd.f32 %v613_v5, %v587_v19  ;;  %v581_v33 = vadd.f32 %v573_v7, %v547_v20  ;;  %v446_v54 = vadd.f32 %v438_v36, %v412_v43  ;;  %v323_v58 = vld [vmem:[#allocation2 + $0x90] ss:$2 sm:$0xff]  ;;  %v463_v61 = vld [vmem:[#allocation2 + $0x109] ss:$2 sm:$0xff]  ;;  %v541_v3 = vmul.f32 %v1033_v39, %v525_v48  ;;  %v531_v5 = vld [vmem:[#allocation2 + $0x120] ss:$2 sm:$0xff] }
  0x60   : > { %v428_v60 = vld [vmem:[#allocation2 + $0x108] ss:$2 sm:$0xff]  ;;  %v475_v2 = vmul.f32 %v1013_v28, %v463_v61  ;;  %v264_v7 = vld [vmem:[%s951_s28 + $0x60] sm:$0xff]  ;;  %v337_v13 = vmul.f32 %v979_v15, %v323_v58  ;;  %v371_v24 = vmul.f32 %v987_v17, %v357_v59  ;;  %v377_v27 = vadd.f32 %v369_v0, %v335_v63  ;;  %298 = vst [vmem:[#allocation2 + $0xb1] sm:$0xff] %v265_v12 }
  0x61   : > { %677 = vmatmul.f32.vlgmr.msra.gmra.mxu3 %v621_v32  ;;  %v615_v42 = vadd.f32 %v607_v11, %v581_v33  ;;  %v497_v62 = vld [vmem:[#allocation2 + $0x10a] ss:$2 sm:$0xff]  ;;  %v480_v1 = vadd.f32 %v472_v45, %v446_v54  ;;  %v441_v4 = vmul.f32 %v1004_v21, %v428_v60  ;;  %v417_v11 = vadd.f32 %v409_v52, %v383_v51  ;;  %v467_v22 = vld [vmem:[#allocation2 + $0x169] ss:$2 sm:$0xff] }
  0x62   : > { %v387_v6 = vld [vmem:[#allocation2 + $0x32] ss:$2 sm:$0xff]  ;;  %v509_v19 = vmul.f32 %v1023_v34, %v497_v62  ;;  %v477_v26 = vmul.f32 %v1013_v28, %v467_v22  ;;  %297 = vst [vmem:[#allocation2 + $0xa9] sm:$0xff] %v264_v7  ;;  %v544_v33 = vmul.f32 %v1033_v39, %v531_v5  ;;  %v600_v36 = vld [vmem:[#allocation2 + $0x122] ss:$2 sm:$0xff]  ;;  %v379_v43 = vadd.f32 %v371_v24, %v337_v13 }
  0x63   : > { %659 = vmatmul.f32.vlgmr.msra.gmra.mxu0 %v615_v42  ;;  %v594_v9 = vld [vmem:[#allocation2 + $0x92] ss:$2 sm:$0xff]  ;;  %v514_v14 = vadd.f32 %v506_v55, %v480_v1  ;;  %v449_v16 = vadd.f32 %v441_v4, %v415_v56  ;;  %v403_v29 = vmul.f32 %v992_v18, %v387_v6  ;;  %v612_v53 = vmul.f32 %v1055_v49, %v600_v36  ;;  %v558_v7 = vld [vmem:[#allocation2 + $0x61] ss:$2 sm:$0xff] }
  0x64   : > { %v432_v20 = vld [vmem:[#allocation2 + $0x168] ss:$2 sm:$0xff]  ;;  %v609_v15 = vmul.f32 %v1055_v49, %v594_v9  ;;  %v570_v42 = vld [vmem:[#allocation2 + $0x181] ss:$2 sm:$0xff] }
  0x65   : > { %v501_v23 = vld [vmem:[#allocation2 + $0x16a] ss:$2 sm:$0xff]  ;;  %v443_v25 = vmul.f32 %v1004_v21, %v432_v20  ;;  %v549_v31 = vadd.f32 %v541_v3, %v514_v14  ;;  %v483_v32 = vadd.f32 %v475_v2, %v449_v16  ;;  %v411_v50 = vadd.f32 %v403_v29, %v377_v27  ;;  %v455_v55 = vld [vmem:[#allocation2 + $0x49] ss:$2 sm:$0xff] }
  0x66   : > { %v391_v30 = vld [vmem:[#allocation2 + $0x92] ss:$2 sm:$0xff]  ;;  %v511_v37 = vmul.f32 %v1023_v34, %v501_v23  ;;  %v604_v48 = vld [vmem:[#allocation2 + $0x182] ss:$2 sm:$0xff]  ;;  %v580_v58 = vmul.f32 %v1044_v44, %v570_v42  ;;  %v471_v60 = vmul.f32 %v1013_v28, %v455_v55  ;;  %v574_v23 = vmul.f32 %v1044_v44, %v558_v7  ;;  %v562_v24 = vld [vmem:[#allocation2 + $0xc1] ss:$2 sm:$0xff] }
  0x67   : > { %v451_v17 = vadd.f32 %v443_v25, %v417_v11  ;;  %v535_v38 = vld [vmem:[#allocation2 + $0x180] ss:$2 sm:$0xff]  ;;  %v583_v40 = vadd.f32 %v575_v8, %v549_v31  ;;  %v517_v41 = vadd.f32 %v509_v19, %v483_v32  ;;  %v405_v45 = vmul.f32 %v992_v18, %v391_v30 }
  0x68   : > { %v546_v47 = vmul.f32 %v1033_v39, %v535_v38  ;;  %v420_v54 = vld [vmem:[#allocation2 + $0x48] ss:$2 sm:$0xff]  ;;  %v614_v0 = vmul.f32 %v1055_v49, %v604_v48  ;;  %v576_v30 = vmul.f32 %v1044_v44, %v562_v24 }
  0x69   : > { %v485_v46 = vadd.f32 %v477_v26, %v451_v17  ;;  %v617_v51 = vadd.f32 %v609_v15, %v583_v40  ;;  %v552_v52 = vadd.f32 %v544_v33, %v517_v41  ;;  %v489_v56 = vld [vmem:[#allocation2 + $0x4a] ss:$2 sm:$0xff]  ;;  %v437_v59 = vmul.f32 %v1004_v21, %v420_v54  ;;  %v459_v2 = vld [vmem:[#allocation2 + $0xa9] ss:$2 sm:$0xff] }
  0x6a   : > { %v523_v61 = vld [vmem:[#allocation2 + $0x60] ss:$2 sm:$0xff]  ;;  %v413_v62 = vadd.f32 %v405_v45, %v379_v43  ;;  %v505_v3 = vmul.f32 %v1023_v34, %v489_v56  ;;  %v473_v9 = vmul.f32 %v1013_v28, %v459_v2 }
  0x6b   : > { %v519_v57 = vadd.f32 %v511_v37, %v485_v46  ;;  %665 = vmatmul.f32.vlgmr.msra.gmra.mxu1 %v617_v51  ;;  %v586_v18 = vadd.f32 %v578_v35, %v552_v52  ;;  %v445_v1 = vadd.f32 %v437_v59, %v411_v50  ;;  %v424_v4 = vld [vmem:[#allocation2 + $0xa8] ss:$2 sm:$0xff]  ;;  %v540_v12 = vmul.f32 %v1033_v39, %v523_v61 }
  0x6c   : > { %v493_v5 = vld [vmem:[#allocation2 + $0xaa] ss:$2 sm:$0xff]  ;;  %v439_v8 = vmul.f32 %v1004_v21, %v424_v4 }
  0x6d   : > { %v554_v63 = vadd.f32 %v546_v47, %v519_v57  ;;  %v620_v6 = vadd.f32 %v612_v53, %v586_v18  ;;  %v479_v11 = vadd.f32 %v471_v60, %v445_v1  ;;  %v527_v13 = vld [vmem:[#allocation2 + $0xc0] ss:$2 sm:$0xff]  ;;  %v507_v19 = vmul.f32 %v1023_v34, %v493_v5 }
  0x6e   : > { %v592_v14 = vld [vmem:[#allocation2 + $0x62] ss:$2 sm:$0xff]  ;;  %v447_v16 = vadd.f32 %v439_v8, %v413_v62  ;;  %v542_v21 = vmul.f32 %v1033_v39, %v527_v13  ;;  %v886_v39 = vld [vmem:[%s1198_s3] ss:$0 sm:$0xff] }
  0x6f   : > { %v588_v10 = vadd.f32 %v580_v58, %v554_v63  ;;  %674 = vmatmul.f32.gmra.mxu2 %v620_v6  ;;  %v513_v22 = vadd.f32 %v505_v3, %v479_v11  ;;  %v608_v26 = vmul.f32 %v1055_v49, %v592_v14  ;;  %v596_v27 = vld [vmem:[#allocation2 + $0xc2] ss:$2 sm:$0xff] }
  0x70   : > { %v481_v25 = vadd.f32 %v473_v9, %v447_v16  ;;  %v610_v34 = vmul.f32 %v1055_v49, %v596_v27 }
  0x71   : > { %v622_v20 = vadd.f32 %v614_v0, %v588_v10  ;;  %v548_v28 = vadd.f32 %v540_v12, %v513_v22 }
  0x72   : > { %v515_v29 = vadd.f32 %v507_v19, %v481_v25 }
  0x73   : > { %680 = vmatmul.f32.gmra.mxu3 %v622_v20  ;;  %v582_v31 = vadd.f32 %v574_v23, %v548_v28 }
  0x74   : > { %v550_v15 = vadd.f32 %v542_v21, %v515_v29 }
  0x75   : > { %v616_v32 = vadd.f32 %v608_v26, %v582_v31 }
  0x76   : > { %v584_v33 = vadd.f32 %v576_v30, %v550_v15 }
  0x77   : > { %662 = vmatmul.f32.gmra.mxu0 %v616_v32 }
  0x78   : > { %v618_v35 = vadd.f32 %v610_v34, %v584_v33 }
  0x7a   : > { %668 = vmatmul.f32.gmra.mxu1 %v618_v35 }
  0xb3   : > { %v672_v36 = vpop.f32.mrf.mxu2 }
  0xb4   : > { %v673_v17 = vadd.f32 %v886_v39, %v672_v36 }
  0xb6   : > { %v688_v44 = vmax.f32 %v673_v17, 0.0 }
  0xb8   : > { %696 = vst [vmem:[%s197_s29 + $0x20] sm:$0xff] %v688_v44 }
  0xe0   : > { %v660_v37 = vpop.f32.mrf.mxu0 }
  0xe1   : > { %v661_v49 = vadd.f32 %v886_v39, %v660_v37 }
  0xe3   : > { %v684_v38 = vmax.f32 %v661_v49, 0.0 }
  0xe4   : > { %v678_v40 = vpop.f32.mrf.mxu3 }
  0xe5   : > { %692 = vst [vmem:[%s197_s29] sm:$0xff] %v684_v38  ;;  %v679_v41 = vadd.f32 %v886_v39, %v678_v40 }
  0xe7   : > { %v690_v42 = vmax.f32 %v679_v41, 0.0 }
  0xe8   : > { %v666_v43 = vpop.f32.mrf.mxu1 }
  0xe9   : > { %698 = vst [vmem:[%s197_s29 + $0x30] sm:$0xff] %v690_v42  ;;  %v667_v45 = vadd.f32 %v886_v39, %v666_v43 }
  0xeb   : > { %v686_v46 = vmax.f32 %v667_v45, 0.0 }
  0xed   : > { %694 = vst [vmem:[%s197_s29 + $0x10] sm:$0xff] %v686_v46 }
  0xf2   : > { %v675_v47 = vpop.f32.mrf.mxu2 }
  0xf3   : > { %v676_v48 = vadd.f32 %v886_v39, %v675_v47 }
  0xf4   : > { %v663_v50 = vpop.f32.mrf.mxu0 }
  0xf5   : > { %v689_v51 = vmax.f32 %v676_v48, 0.0  ;;  %v664_v53 = vadd.f32 %v886_v39, %v663_v50 }
  0xf6   : > { %v681_v52 = vpop.f32.mrf.mxu3 }
  0xf7   : > { %v682_v54 = vadd.f32 %v886_v39, %v681_v52  ;;  %697 = vst [vmem:[%s197_s29 + $0x28] sm:$0xff] %v689_v51  ;;  %v685_v55 = vmax.f32 %v664_v53, 0.0  ;;  %v669_v56 = vpop.f32.mrf.mxu1 }
  0xf8   : > { %v670_v58 = vadd.f32 %v886_v39, %v669_v56 }
  0xf9   : > { %v691_v57 = vmax.f32 %v682_v54, 0.0  ;;  %693 = vst [vmem:[%s197_s29 + $0x8] sm:$0xff] %v685_v55 }
  0xfa   : > { %v687_v59 = vmax.f32 %v670_v58, 0.0 }
  0xfb   : > { %699 = vst [vmem:[%s197_s29 + $0x38] sm:$0xff] %v691_v57 }
  0xfc   : > { %695 = vst [vmem:[%s197_s29 + $0x18] sm:$0xff] %v687_v59 }
  0xfd PF: > { %s14_s15 = sadd.s32 1, %s893_s15  }
  0xfe   : > { %p11_p4 = scmp.ge.s32.totalorder %s14_s15, 4  }
 0x100   :  { %13 = sbr.rel (!%p11_p4) target bundleno = 1 (0x1), region = 139 }

// kernel: fpem_forward.11
= control target key start
LH: loop header
LB: loop body
LE: loop exit
PB: predicated region body
PF: predicated region fallthrough
CT: control target
= control target key end

     0   :  { %s493_s15 = smov 0   ;;  %s592_s0 = inlined_call_operand.vmem [shape: f32[2,4,4,128], index: 0, kind: input, shape index: {}]   ;;  %s593_s1 = inlined_call_operand.vmem [shape: f32[3,3,128], index: 1, kind: input, shape index: {}]   ;;  %s594_s2 = inlined_call_operand.vmem [shape: f32[128,128], index: 2, kind: input, shape index: {}]   ;;  %s595_s3 = inlined_call_operand.vmem [shape: f32[1,128], index: 3, kind: input, shape index: {}]   ;;  %s596_s4 = inlined_call_operand.vmem [shape: f32[2,2,2,128], index: 4, kind: output, shape index: {}]  }
   0x1 LB: > { %s421_s16 = sadd.s32 4294967295, %s465_s15   ;;  %p425_p0 = scmp.ge.s32.totalorder %s465_s15, 1  ;;  %s465_s15 = sphi %s493_s15, %s14_s15  }
   0x2   : > { %p162_p1 = scmp.lt.s32.totalorder %s465_s15, 3 }
   0x4   : > { %p163_p2 = pnand %p425_p0, %p162_p1 }
   0x5   : > { %p188_p3 = scmp.lt.s32.totalorder (!%p163_p2), %s421_s16, 1 }
   0x6   : > { %166 = sbr.rel (%p163_p2) target bundleno = 185 (0xb9), region = 36 }
   0xb   : > { %v318_v0 = vld [vmem:[%s594_s2 + $0x78] sm:$0xff]  ;;  %v317_v1 = vld [vmem:[%s594_s2 + $0x70] sm:$0xff]  ;;  %v467_v2 = vmov 0.0   ;;  %v316_v3 = vld [vmem:[%s594_s2 + $0x68] sm:$0xff]  ;;  %s598_s16 = smov (!%p188_p3, %s421_s16), 1 }
   0xc   : > { %330 = vmatpush.msra.mxu0 %v318_v0  ;;  %198 = vst [vmem:[#allocation2] sm:$0x3f] %v467_v2  ;;  %v315_v4 = vld [vmem:[%s594_s2 + $0x60] sm:$0xff]  ;;  %s438_s25 = sshll.u32 %s598_s16, 4  ;;  %v314_v5 = vld [vmem:[%s594_s2 + $0x58] sm:$0xff]  ;;  %v313_v10 = vld [vmem:[%s594_s2 + $0x50] sm:$0xff] }
   0xd   : > { %199 = vst [vmem:[#allocation2 + $0x8] sm:$0x3f] %v467_v2  ;;  %s192_s30 = scalar_lea.vmem %s592_s0, %s438_s25  ;;  %v449_v12 = vld [vmem:[%s593_s1] ss:$0 sm:$0xff]  ;;  %v312_v13 = vld [vmem:[%s594_s2 + $0x48] sm:$0xff]  ;;  %v310_v19 = vld [vmem:[%s594_s2 + $0x38] sm:$0xff] }
   0xe   : > { %331 = vmatpush.msra.mxu0 %v317_v1  ;;  %200 = vst [vmem:[#allocation2 + $0x10] sm:$0x3f] %v467_v2  ;;  %v204_v6 = vld [vmem:[%s192_s30] sm:$0xf]  ;;  %v205_v7 = vld [vmem:[%s192_s30 + $0x4] sm:$0xf] }
   0xf   : > { %201 = vst [vmem:[#allocation2 + $0x18] sm:$0x3f] %v467_v2  ;;  %v206_v8 = vld [vmem:[%s192_s30 + $0x8] sm:$0xf]  ;;  %v207_v9 = vld [vmem:[%s192_s30 + $0xc] sm:$0xf] }
  0x10   : > { %332 = vmatpush.msra.mxu0 %v316_v3  ;;  %202 = vst [vmem:[#allocation2 + $0x20] sm:$0x3f] %v467_v2  ;;  %v311_v15 = vld [vmem:[%s594_s2 + $0x40] sm:$0xff]  ;;  %v309_v24 = vld [vmem:[%s594_s2 + $0x30] sm:$0xff]  ;;  %v308_v41 = vld [vmem:[%s594_s2 + $0x28] sm:$0xff]  ;;  %s439_s25 = sshll.u32 %s598_s16, 2 }
  0x11   : > { %209 = vst [vmem:[#allocation2 + $0x9] sm:$0xf] %v204_v6  ;;  %v450_v17 = vld [vmem:[%s593_s1 + $0x1] ss:$0 sm:$0xff]  ;;  %v451_v20 = vld [vmem:[%s593_s1 + $0x2] ss:$0 sm:$0xff]  ;;  %s197_s28 = scalar_lea.vmem %s596_s4, %s439_s25 }
  0x12   : > { %333 = vmatpush.msra.mxu0 %v315_v4  ;;  %210 = vst [vmem:[#allocation2 + $0x11] sm:$0xf] %v205_v7  ;;  %v452_v22 = vld [vmem:[%s593_s1 + $0x4] ss:$0 sm:$0xff]  ;;  %v453_v23 = vld [vmem:[%s593_s1 + $0x5] ss:$0 sm:$0xff] }
  0x13   : > { %v213_v11 = vld [vmem:[#allocation2] ss:$2 sm:$0x3]  ;;  %211 = vst [vmem:[#allocation2 + $0x19] sm:$0xf] %v206_v8  ;;  %v307_v48 = vld [vmem:[%s594_s2 + $0x20] sm:$0xff] }
  0x14   : > { %334 = vmatpush.msra.mxu0 %v314_v5  ;;  %212 = vst [vmem:[#allocation2 + $0x21] sm:$0xf] %v207_v9  ;;  %v223_v14 = vld [vmem:[#allocation2 + $0x1] ss:$2 sm:$0x3]  ;;  %v218_v16 = vmul.f32 %v449_v12, %v213_v11  ;;  %v306_v56 = vld [vmem:[%s594_s2 + $0x18] sm:$0xff] }
  0x15   : > { %v233_v18 = vld [vmem:[#allocation2 + $0x2] ss:$2 sm:$0x3]  ;;  %v228_v21 = vmul.f32 %v450_v17, %v223_v14  ;;  %v454_v46 = vld [vmem:[%s593_s1 + $0x6] ss:$0 sm:$0xff]  ;;  %v305_v0 = vld [vmem:[%s594_s2 + $0x10] sm:$0xff] }
  0x16   : > { %335 = vmatpush.msra.mxu0 %v313_v10  ;;  %v238_v25 = vmul.f32 %v451_v20, %v233_v18  ;;  %v455_v54 = vld [vmem:[%s593_s1 + $0x8] ss:$0 sm:$0xff]  ;;  %v456_v62 = vld [vmem:[%s593_s1 + $0x9] ss:$0 sm:$0xff]  ;;  %v457_v6 = vld [vmem:[%s593_s1 + $0xa] ss:$0 sm:$0xff] }
  0x17   : > { %v230_v30 = vadd.f32 %v228_v21, %v218_v16  ;;  %v304_v7 = vld [vmem:[%s594_s2 + $0x8] sm:$0xff] }
  0x18   : > { %336 = vmatpush.msra.mxu0 %v312_v13  ;;  %v242_v26 = vld [vmem:[#allocation2 + $0x8] ss:$2 sm:$0x3]  ;;  %v253_v27 = vld [vmem:[#allocation2 + $0x9] ss:$2 sm:$0x3] }
  0x19   : > { %v215_v28 = vld [vmem:[#allocation2 + $0x10] ss:$2 sm:$0x3]  ;;  %v225_v29 = vld [vmem:[#allocation2 + $0x11] ss:$2 sm:$0x3]  ;;  %v248_v31 = vmul.f32 %v452_v22, %v242_v26  ;;  %v240_v37 = vadd.f32 %v238_v25, %v230_v30  ;;  %v258_v39 = vmul.f32 %v453_v23, %v253_v27 }
  0x1a   : > { %337 = vmatpush.msra.mxu0 %v311_v15  ;;  %v219_v32 = vmul.f32 %v449_v12, %v215_v28  ;;  %v229_v33 = vmul.f32 %v450_v17, %v225_v29  ;;  %v235_v34 = vld [vmem:[#allocation2 + $0x12] ss:$2 sm:$0x3]  ;;  %v244_v35 = vld [vmem:[#allocation2 + $0x18] ss:$2 sm:$0x3] }
  0x1b   : > { %v239_v36 = vmul.f32 %v451_v20, %v235_v34  ;;  %v255_v38 = vld [vmem:[#allocation2 + $0x19] ss:$2 sm:$0x3]  ;;  %v263_v40 = vld [vmem:[#allocation2 + $0xa] ss:$2 sm:$0x3]  ;;  %v249_v43 = vmul.f32 %v452_v22, %v244_v35  ;;  %v250_v45 = vadd.f32 %v248_v31, %v240_v37 }
  0x1c   : > { %338 = vmatpush.msra.mxu0 %v310_v19  ;;  %v231_v42 = vadd.f32 %v229_v33, %v219_v32  ;;  %v265_v44 = vld [vmem:[#allocation2 + $0x1a] ss:$2 sm:$0x3]  ;;  %v273_v47 = vld [vmem:[#allocation2 + $0x10] ss:$2 sm:$0x3]  ;;  %v259_v50 = vmul.f32 %v453_v23, %v255_v38  ;;  %v268_v53 = vmul.f32 %v454_v46, %v263_v40 }
  0x1d   : > { %v275_v51 = vld [vmem:[#allocation2 + $0x20] ss:$2 sm:$0x3]  ;;  %v260_v52 = vadd.f32 %v258_v39, %v250_v45  ;;  %v284_v55 = vld [vmem:[#allocation2 + $0x11] ss:$2 sm:$0x3]  ;;  %v269_v58 = vmul.f32 %v454_v46, %v265_v44  ;;  %v279_v61 = vmul.f32 %v455_v54, %v273_v47 }
  0x1e   : > { %339 = vmatpush.msra.mxu0 %v309_v24  ;;  %v241_v49 = vadd.f32 %v239_v36, %v231_v42  ;;  %v286_v59 = vld [vmem:[#allocation2 + $0x21] ss:$2 sm:$0x3]  ;;  %v294_v63 = vld [vmem:[#allocation2 + $0x12] ss:$2 sm:$0x3]  ;;  %v280_v2 = vmul.f32 %v455_v54, %v275_v51  ;;  %v289_v5 = vmul.f32 %v456_v62, %v284_v55 }
  0x1f   : > { %v270_v60 = vadd.f32 %v268_v53, %v260_v52  ;;  %v296_v3 = vld [vmem:[#allocation2 + $0x22] ss:$2 sm:$0x3]  ;;  %v290_v9 = vmul.f32 %v456_v62, %v286_v59  ;;  %v299_v11 = vmul.f32 %v457_v6, %v294_v63  ;;  %v303_v12 = vld [vmem:[%s594_s2] sm:$0xff] }
  0x20   : > { %340 = vmatpush.msra.mxu0 %v308_v41  ;;  %v251_v57 = vadd.f32 %v249_v43, %v241_v49  ;;  %v300_v14 = vmul.f32 %v457_v6, %v296_v3  ;;  %v458_v19 = vld [vmem:[%s595_s3] ss:$0 sm:$0xff] }
  0x21   : > { %v281_v4 = vadd.f32 %v279_v61, %v270_v60 }
  0x22   : > { %341 = vmatpush.msra.mxu0 %v307_v48  ;;  %v261_v1 = vadd.f32 %v259_v50, %v251_v57 }
  0x23   : > { %v291_v10 = vadd.f32 %v289_v5, %v281_v4 }
  0x24   : > { %342 = vmatpush.msra.mxu0 %v306_v56  ;;  %v271_v8 = vadd.f32 %v269_v58, %v261_v1 }
  0x25   : > { %v301_v15 = vadd.f32 %v299_v11, %v291_v10 }
  0x26   : > { %343 = vmatpush.msra.mxu0 %v305_v0  ;;  %v282_v13 = vadd.f32 %v280_v2, %v271_v8 }
  0x27   : > { %325 = vst [vmem:[#allocation1] ss:$4 sm:$0xff] %v301_v15 }
  0x28   : > { %344 = vmatpush.msra.mxu0 %v304_v7  ;;  %v292_v16 = vadd.f32 %v290_v9, %v282_v13 }
  0x2a   : > { %345 = vmatpush.msra.mxu0 %v303_v12  ;;  %v302_v17 = vadd.f32 %v300_v14, %v292_v16 }
  0x2c   : > { %327 = vst [vmem:[#allocation1 + $0x1] ss:$4 sm:$0xff] %v302_v17 }
  0x33   : > { %v328_v18 = vld.sshfl [vmem:[#allocation1] sm:$0xff pattern:$0x73625140] }
  0x34   : > { %346 = vmatmul.f32.vlgmr.msra.gmra.mxu0 %v328_v18 }
  0xb1   : > { %v347_v20 = vpop.f32.mrf.mxu0 }
  0xb2   : > { %v348_v21 = vadd.f32 %v458_v19, %v347_v20 }
  0xb4   : > { %v350_v22 = vmax.f32 %v348_v21, 0.0 }
  0xb6   : > { %v352_v23 = vrot.slane %v350_v22, 2  ;;  %354 = vst [vmem:[%s197_s28] sm:$0x3] %v350_v22 }
  0xb8   : > { %355 = vst [vmem:[%s197_s28 + $0x2] sm:$0x3] %v352_v23 }
  0xb9 PF: > { %s14_s15 = sadd.s32 1, %s465_s15  }
  0xba   : > { %p11_p4 = scmp.ge.s32.totalorder %s14_s15, 4  }
  0xbc   :  { %13 = sbr.rel (!%p11_p4) target bundleno = 1 (0x1), region = 86 }

// kernel: fpem_forward.8
= control target key start
LH: loop header
LB: loop body
LE: loop exit
PB: predicated region body
PF: predicated region fallthrough
CT: control target
= control target key end

     0   :  { %s1584_s15 = smov 0   ;;  %s2714_s0 = inlined_call_operand.vmem [shape: f32[2,16,16,128], index: 0, kind: input, shape index: {}]   ;;  %s2715_s1 = inlined_call_operand.vmem [shape: f32[3,3,128], index: 1, kind: input, shape index: {}]   ;;  %s2716_s2 = inlined_call_operand.vmem [shape: f32[128,128], index: 2, kind: input, shape index: {}]   ;;  %s2717_s3 = inlined_call_operand.vmem [shape: f32[1,128], index: 3, kind: input, shape index: {}]   ;;  %s2718_s4 = inlined_call_operand.vmem [shape: f32[2,16,16,128], index: 4, kind: output, shape index: {}]  }
   0x1 LB: > { %s1454_s16 = sadd.s32 4294967295, %s1556_s15   ;;  %p1458_p0 = scmp.ge.s32.totalorder %s1556_s15, 1  ;;  %s1556_s15 = sphi %s1584_s15, %s14_s15  }
   0x2   : > { %p162_p1 = scmp.lt.s32.totalorder %s1556_s15, 3 }
   0x4   : > { %p163_p2 = pnand %p1458_p0, %p162_p1 }
   0x6   : > { %166 = sbr.rel (%p163_p2) target bundleno = 369 (0x171), region = 36 }
   0xb   : > { %v1217_v0 = vld [vmem:[%s2716_s2 + $0x78] sm:$0xff]  ;;  %v1216_v1 = vld [vmem:[%s2716_s2 + $0x70] sm:$0xff]  ;;  %p188_p3 = scmp.lt.s32.totalorder %s1454_s16, 1  ;;  %v1558_v2 = vmov 0.0   ;;  %v1215_v3 = vld [vmem:[%s2716_s2 + $0x68] sm:$0xff] }
   0xc   : > { %1474 = vmatpush.msra.mxu2 %v1217_v0  ;;  %1475 = vmatpush.msra.mxu3 %v1217_v0  ;;  %222 = vst [vmem:[#allocation2 + $0xc0] sm:$0xff] %v1558_v2  ;;  %v1214_v4 = vld [vmem:[%s2716_s2 + $0x60] sm:$0xff]  ;;  %v1213_v5 = vld [vmem:[%s2716_s2 + $0x58] sm:$0xff]  ;;  %v1212_v7 = vld [vmem:[%s2716_s2 + $0x50] sm:$0xff] }
   0xd   : > { %1222 = vmatpush.msra.mxu0 %v1217_v0  ;;  %1473 = vmatpush.msra.mxu1 %v1217_v0  ;;  %s2872_s16 = smov (!%p188_p3, %s1454_s16), 1  ;;  %223 = vst [vmem:[#allocation2 + $0xc8] sm:$0xff] %v1558_v2  ;;  %v1211_v10 = vld [vmem:[%s2716_s2 + $0x48] sm:$0xff]  ;;  %v1210_v12 = vld [vmem:[%s2716_s2 + $0x40] sm:$0xff]  ;;  %v1209_v16 = vld [vmem:[%s2716_s2 + $0x38] sm:$0xff] }
   0xe   : > { %1477 = vmatpush.msra.mxu2 %v1216_v1  ;;  %1478 = vmatpush.msra.mxu3 %v1216_v1  ;;  %224 = vst [vmem:[#allocation2 + $0xd0] sm:$0x3] %v1558_v2  ;;  %s1471_s25 = sshll.u32 %s2872_s16, 8  ;;  %v1656_v15 = vld [vmem:[%s2715_s1 + $0x1] ss:$0 sm:$0xff]  ;;  %v1208_v19 = vld [vmem:[%s2716_s2 + $0x30] sm:$0xff] }
   0xf   : > { %1223 = vmatpush.msra.mxu0 %v1216_v1  ;;  %1476 = vmatpush.msra.mxu1 %v1216_v1  ;;  %225 = vst [vmem:[#allocation2 + $0xd8] sm:$0xff] %v1558_v2  ;;  %s1616_s28 = scalar_lea.vmem %s2714_s0, %s1471_s25  ;;  %v1666_v17 = vld [vmem:[%s2715_s1] ss:$0 sm:$0xff]  ;;  %v1672_v18 = vld [vmem:[%s2715_s1 + $0x2] ss:$0 sm:$0xff]  ;;  %v1207_v23 = vld [vmem:[%s2716_s2 + $0x28] sm:$0xff]  ;;  %s2646_s24 = scalar_lea.vmem %s2718_s4, %s1471_s25 }
  0x10   : > { %1480 = vmatpush.msra.mxu2 %v1215_v3  ;;  %1481 = vmatpush.msra.mxu3 %v1215_v3  ;;  %226 = vst [vmem:[#allocation2 + $0xe0] sm:$0xff] %v1558_v2  ;;  %v266_v6 = vld [vmem:[%s1616_s28 + $0x70] sm:$0xff]  ;;  %v1630_v8 = vld [vmem:[%s1616_s28 + $0x78] sm:$0xff]  ;;  %v1634_v9 = vld [vmem:[%s1616_s28 + $0x80] sm:$0xff]  ;;  %v351_v62 = vmul.f32 0.0, %v1666_v17 }
  0x11   : > { %1224 = vmatpush.msra.mxu0 %v1215_v3  ;;  %1479 = vmatpush.msra.mxu1 %v1215_v3  ;;  %227 = vst [vmem:[#allocation2 + $0xe8] sm:$0x3] %v1558_v2  ;;  %v1640_v11 = vld [vmem:[%s1616_s28 + $0x88] sm:$0xff]  ;;  %v1646_v13 = vld [vmem:[%s1616_s28 + $0x90] sm:$0xff]  ;;  %v1650_v14 = vld [vmem:[%s1616_s28 + $0x98] sm:$0xff]  ;;  %v465_v20 = vmul.f32 %v1656_v15, %v266_v6  ;;  %v466_v58 = vmul.f32 %v1656_v15, %v1630_v8 }
  0x12   : > { %1483 = vmatpush.msra.mxu2 %v1214_v4  ;;  %1484 = vmatpush.msra.mxu3 %v1214_v4  ;;  %228 = vst [vmem:[#allocation2 + $0xf0] sm:$0xff] %v1558_v2  ;;  %v1681_v21 = vld [vmem:[%s2715_s1 + $0x4] ss:$0 sm:$0xff]  ;;  %v1692_v26 = vld [vmem:[%s2715_s1 + $0x5] ss:$0 sm:$0xff]  ;;  %v1205_v34 = vld [vmem:[%s2716_s2 + $0x18] sm:$0xff] }
  0x13   : > { %1225 = vmatpush.msra.mxu0 %v1214_v4  ;;  %1482 = vmatpush.msra.mxu1 %v1214_v4  ;;  %229 = vst [vmem:[#allocation2 + $0xf8] sm:$0xff] %v1558_v2  ;;  %v1206_v29 = vld [vmem:[%s2716_s2 + $0x20] sm:$0xff]  ;;  %v760_v36 = vmul.f32 %v1692_v26, %v1634_v9  ;;  %v1721_v37 = vld [vmem:[%s2715_s1 + $0x8] ss:$0 sm:$0xff]  ;;  %v1204_v39 = vld [vmem:[%s2716_s2 + $0x10] sm:$0xff] }
  0x14   : > { %1486 = vmatpush.msra.mxu2 %v1213_v5  ;;  %1487 = vmatpush.msra.mxu3 %v1213_v5  ;;  %230 = vst [vmem:[#allocation2 + $0x100] sm:$0x3] %v1558_v2  ;;  %v1707_v32 = vld [vmem:[%s2715_s1 + $0x6] ss:$0 sm:$0xff]  ;;  %v1735_v42 = vld [vmem:[%s2715_s1 + $0x9] ss:$0 sm:$0xff] }
  0x15   : > { %1226 = vmatpush.msra.mxu0 %v1213_v5  ;;  %1485 = vmatpush.msra.mxu1 %v1213_v5  ;;  %299 = vst [vmem:[#allocation2 + $0xc1] sm:$0xff] %v266_v6  ;;  %v1203_v43 = vld [vmem:[%s2716_s2 + $0x8] sm:$0xff]  ;;  %v1202_v48 = vld [vmem:[%s2716_s2] sm:$0xff]  ;;  %v1056_v50 = vmul.f32 %v1735_v42, %v1646_v13  ;;  %v761_v6 = vmul.f32 %v1692_v26, %v1640_v11 }
  0x16   : > { %1489 = vmatpush.msra.mxu2 %v1212_v7  ;;  %1490 = vmatpush.msra.mxu3 %v1212_v7  ;;  %300 = vst [vmem:[#allocation2 + $0xc9] sm:$0xff] %v1630_v8  ;;  %v1747_v46 = vld [vmem:[%s2715_s1 + $0xa] ss:$0 sm:$0xff] }
  0x17   : > { %1227 = vmatpush.msra.mxu0 %v1212_v7  ;;  %1488 = vmatpush.msra.mxu1 %v1212_v7  ;;  %2777 = vst [vmem:[#allocation3_spill] sm:$0xff] %v1650_v14 }
  0x18   : > { %301 = vst [vmem:[#allocation2 + $0xd9] sm:$0xff] %v1634_v9  ;;  %1492 = vmatpush.msra.mxu2 %v1211_v10  ;;  %1493 = vmatpush.msra.mxu3 %v1211_v10 }
  0x19   : > { %2778 = vst [vmem:[#allocation4_spill] sm:$0xff] %v1656_v15  ;;  %1228 = vmatpush.msra.mxu0 %v1211_v10  ;;  %1491 = vmatpush.msra.mxu1 %v1211_v10 }
  0x1a   : > { %302 = vst [vmem:[#allocation2 + $0xe1] sm:$0xff] %v1640_v11  ;;  %1495 = vmatpush.msra.mxu2 %v1210_v12  ;;  %1496 = vmatpush.msra.mxu3 %v1210_v12 }
  0x1b   : > { %303 = vst [vmem:[#allocation2 + $0xf1] sm:$0xff] %v1646_v13  ;;  %1229 = vmatpush.msra.mxu0 %v1210_v12  ;;  %1494 = vmatpush.msra.mxu1 %v1210_v12 }
  0x1c   : > { %304 = vst [vmem:[#allocation2 + $0xf9] sm:$0xff] %v1650_v14  ;;  %1498 = vmatpush.msra.mxu2 %v1209_v16  ;;  %1499 = vmatpush.msra.mxu3 %v1209_v16  ;;  %v333_v22 = vld [vmem:[#allocation2 + $0xc0] sm:$0xff] }
  0x1d   : > { %198 = vst [vmem:[#allocation2] sm:$0xff] %v1558_v2  ;;  %1230 = vmatpush.msra.mxu0 %v1209_v16  ;;  %1497 = vmatpush.msra.mxu1 %v1209_v16  ;;  %v367_v24 = vmul.f32 %v1666_v17, %v333_v22  ;;  %v529_v25 = vld [vmem:[#allocation2 + $0xc2] sm:$0xff]  ;;  %v530_v59 = vld [vmem:[#allocation2 + $0xca] sm:$0xff] }
  0x1e   : > { %199 = vst [vmem:[#allocation2 + $0x8] sm:$0xff] %v1558_v2  ;;  %1501 = vmatpush.msra.mxu2 %v1208_v19  ;;  %1502 = vmatpush.msra.mxu3 %v1208_v19  ;;  %v563_v27 = vmul.f32 %v1672_v18, %v529_v25  ;;  %v334_v55 = vld [vmem:[#allocation2 + $0xc8] sm:$0xff]  ;;  %v564_v61 = vmul.f32 %v1672_v18, %v530_v59  ;;  %v1811_v22 = vld [vmem:[%s1616_s28 + $0xb0] sm:$0xff] }
  0x1f   : > { %2779 = vst [vmem:[#allocation5_spill] sm:$0xff] %v1692_v26  ;;  %v1696_v28 = vld [vmem:[#allocation2 + $0xd8] sm:$0xff]  ;;  %1231 = vmatpush.msra.mxu0 %v1208_v19  ;;  %1500 = vmatpush.msra.mxu1 %v1208_v19  ;;  %v497_v30 = vadd.f32 %v465_v20, %v367_v24  ;;  %v368_v57 = vmul.f32 %v1666_v17, %v334_v55 }
  0x20   : > { %200 = vst [vmem:[#allocation2 + $0x10] sm:$0x3] %v1558_v2  ;;  %v662_v31 = vmul.f32 %v1681_v21, %v1696_v28  ;;  %1504 = vmatpush.msra.mxu2 %v1207_v23  ;;  %1505 = vmatpush.msra.mxu3 %v1207_v23  ;;  %v369_v20 = vmul.f32 %v1666_v17, %v1696_v28  ;;  %v1865_v55 = vld [vmem:[%s1616_s28 + $0xd8] sm:$0xff] }
  0x21   : > { %201 = vst [vmem:[#allocation2 + $0x18] sm:$0xff] %v1558_v2  ;;  %v1710_v33 = vld [vmem:[#allocation2 + $0xda] sm:$0xff]  ;;  %1232 = vmatpush.msra.mxu0 %v1207_v23  ;;  %1503 = vmatpush.msra.mxu1 %v1207_v23  ;;  %v595_v35 = vadd.f32 %v563_v27, %v497_v30  ;;  %v498_v60 = vadd.f32 %v466_v58, %v368_v57  ;;  %v1802_v12 = vld [vmem:[#allocation2 + $0xe2] sm:$0xff]  ;;  %v1826_v30 = vld [vmem:[%s1616_s28 + $0x30] sm:$0xff] }
  0x22   : > { %202 = vst [vmem:[#allocation2 + $0x20] sm:$0xff] %v1558_v2  ;;  %1507 = vmatpush.msra.mxu2 %v1206_v29  ;;  %1508 = vmatpush.msra.mxu3 %v1206_v29  ;;  %v1724_v38 = vld [vmem:[#allocation2 + $0xf0] sm:$0xff]  ;;  %v858_v41 = vmul.f32 %v1707_v32, %v1710_v33  ;;  %v1791_v0 = vld [vmem:[#allocation2 + $0xe0] sm:$0xff]  ;;  %v859_v19 = vmul.f32 %v1707_v32, %v1802_v12  ;;  %v275_v23 = vld [vmem:[%s1616_s28 + $0xb8] sm:$0xff] }
  0x23   : > { %203 = vst [vmem:[#allocation2 + $0x28] sm:$0x3] %v1558_v2  ;;  %1233 = vmatpush.msra.mxu0 %v1206_v29  ;;  %1506 = vmatpush.msra.mxu1 %v1206_v29  ;;  %v694_v40 = vadd.f32 %v662_v31, %v595_v35  ;;  %v958_v45 = vmul.f32 %v1721_v37, %v1724_v38  ;;  %v1750_v47 = vld [vmem:[#allocation2 + $0xf2] sm:$0xff]  ;;  %v276_v29 = vld [vmem:[%s1616_s28 + $0xc0] sm:$0xff] }
  0x24   : > { %204 = vst [vmem:[#allocation2 + $0x30] sm:$0xff] %v1558_v2  ;;  %1510 = vmatpush.msra.mxu2 %v1205_v34  ;;  %1511 = vmatpush.msra.mxu3 %v1205_v34  ;;  %v1154_v52 = vmul.f32 %v1747_v46, %v1750_v47  ;;  %v596_v3 = vadd.f32 %v564_v61, %v498_v60  ;;  %v1814_v24 = vld [vmem:[#allocation2 + $0xf8] sm:$0xff]  ;;  %v1871_v57 = vld [vmem:[%s1616_s28 + $0x40] sm:$0xff] }
  0x25   : > { %205 = vst [vmem:[#allocation2 + $0x38] sm:$0xff] %v1558_v2  ;;  %1234 = vmatpush.msra.mxu0 %v1205_v34  ;;  %1509 = vmatpush.msra.mxu1 %v1205_v34  ;;  %v792_v44 = vadd.f32 %v760_v36, %v694_v40  ;;  %v415_v56 = vld [vmem:[#allocation2 + $0x1] sm:$0xff]  ;;  %v663_v4 = vmul.f32 %v1681_v21, %v1791_v0 }
  0x26   : > { %2780 = vst [vmem:[#allocation6_spill] sm:$0xff] %v1735_v42  ;;  %1513 = vmatpush.msra.mxu2 %v1204_v39  ;;  %1514 = vmatpush.msra.mxu3 %v1204_v39  ;;  %v449_v63 = vmul.f32 %v1656_v15, %v415_v56  ;;  %v513_v1 = vld [vmem:[#allocation2 + $0x2] sm:$0xff]  ;;  %v467_v27 = vmul.f32 %v1656_v15, %v1634_v9  ;;  %v1834_v9 = vld [vmem:[%s1616_s28 + $0xd0] sm:$0xff] }
  0x27   : > { %206 = vst [vmem:[#allocation2 + $0x40] sm:$0x3] %v1558_v2  ;;  %v890_v49 = vadd.f32 %v858_v41, %v792_v44  ;;  %1235 = vmatpush.msra.mxu0 %v1204_v39  ;;  %1512 = vmatpush.msra.mxu1 %v1204_v39  ;;  %v695_v5 = vadd.f32 %v663_v4, %v596_v3  ;;  %v416_v7 = vld [vmem:[#allocation2 + $0x9] sm:$0xff]  ;;  %v252_v40 = vld [vmem:[%s1616_s28] sm:$0xff] }
  0x28   : > { %207 = vst [vmem:[#allocation2 + $0x48] sm:$0xff] %v1558_v2  ;;  %1516 = vmatpush.msra.mxu2 %v1203_v43  ;;  %1517 = vmatpush.msra.mxu3 %v1203_v43  ;;  %v481_v8 = vadd.f32 %v449_v63, %v351_v62  ;;  %v547_v10 = vmul.f32 %v1672_v18, %v513_v1  ;;  %v514_v35 = vld [vmem:[#allocation2 + $0xa] sm:$0xff] }
  0x29   : > { %208 = vst [vmem:[#allocation2 + $0x50] sm:$0xff] %v1558_v2  ;;  %v990_v51 = vadd.f32 %v958_v45, %v890_v49  ;;  %1236 = vmatpush.msra.mxu0 %v1203_v43  ;;  %1515 = vmatpush.msra.mxu1 %v1203_v43  ;;  %v793_v16 = vadd.f32 %v761_v6, %v695_v5  ;;  %v1847_v45 = vld [vmem:[%s1616_s28 + $0xc8] sm:$0xff]  ;;  %v1868_v56 = vld [vmem:[%s1616_s28 + $0x10] sm:$0xff] }
  0x2a   : > { %209 = vst [vmem:[#allocation2 + $0x58] sm:$0x3] %v1558_v2  ;;  %1519 = vmatpush.msra.mxu2 %v1202_v48  ;;  %1520 = vmatpush.msra.mxu3 %v1202_v48  ;;  %v450_v25 = vmul.f32 %v1656_v15, %v416_v7  ;;  %v1823_v28 = vmul.f32 %v1656_v15, %v1811_v22  ;;  %v1885_v63 = vld [vmem:[%s1616_s28 + $0x50] sm:$0xff]  ;;  %v1897_v4 = vld [vmem:[%s1616_s28 + $0x8] sm:$0xff] }
  0x2b   : > { %210 = vst [vmem:[#allocation2 + $0x60] sm:$0xff] %v1558_v2  ;;  %v1088_v53 = vadd.f32 %v1056_v50, %v990_v51  ;;  %1237 = vmatpush.msra.mxu0 %v1202_v48  ;;  %1518 = vmatpush.msra.mxu1 %v1202_v48  ;;  %v891_v31 = vadd.f32 %v859_v19, %v793_v16  ;;  %v1859_v50 = vld [vmem:[#allocation2 + $0xfa] sm:$0xff] }
  0x2c   : > { %211 = vst [vmem:[#allocation2 + $0x68] sm:$0xff] %v1558_v2  ;;  %v959_v34 = vmul.f32 %v1721_v37, %v1814_v24  ;;  %v565_v36 = vmul.f32 %v1672_v18, %v1710_v33  ;;  %v1837_v39 = vmul.f32 %v1692_v26, %v276_v29  ;;  %v1840_v41 = vadd.f32 %v547_v10, %v481_v8 }
  0x2d   : > { %212 = vst [vmem:[#allocation2 + $0x70] sm:$0x3] %v1558_v2  ;;  %v1186_v54 = vadd.f32 %v1154_v52, %v1088_v53  ;;  %v1844_v43 = vmul.f32 %v1656_v15, %v1826_v30  ;;  %v499_v44 = vadd.f32 %v467_v27, %v369_v20  ;;  %v1855_v33 = vmul.f32 %v1692_v26, %v252_v40 }
  0x2e   : > { %213 = vst [vmem:[#allocation2 + $0x78] sm:$0xff] %v1558_v2  ;;  %v991_v48 = vadd.f32 %v959_v34, %v891_v31  ;;  %v1057_v49 = vmul.f32 %v1735_v42, %v1650_v14  ;;  %v482_v51 = vadd.f32 %v450_v25, %v351_v62  ;;  %v548_v52 = vmul.f32 %v1672_v18, %v514_v35  ;;  %v259_v62 = vld [vmem:[%s1616_s28 + $0x38] sm:$0xff]  ;;  %v1920_v25 = vld [vmem:[%s1616_s28 + $0x48] sm:$0xff] }
  0x2f   : > { %214 = vst [vmem:[#allocation2 + $0x80] sm:$0xff] %v1558_v2  ;;  %1286 = vmatmul.f32.vlgmr.msra.gmra.mxu2 %v1186_v54  ;;  %v597_v53 = vadd.f32 %v565_v36, %v499_v44  ;;  %v664_v54 = vmul.f32 %v1681_v21, %v1724_v38  ;;  %v1155_v59 = vmul.f32 %v1747_v46, %v1859_v50 }
  0x30   : > { %215 = vst [vmem:[#allocation2 + $0x88] sm:$0x3] %v1558_v2  ;;  %v1089_v58 = vadd.f32 %v1057_v49, %v991_v48  ;;  %v474_v60 = vmul.f32 %v1656_v15, %v275_v23  ;;  %v762_v61 = vmul.f32 %v1692_v26, %v1646_v13  ;;  %v1881_v38 = vmul.f32 %v1735_v42, %v1868_v56 }
  0x31   : > { %216 = vst [vmem:[#allocation2 + $0x90] sm:$0xff] %v1558_v2  ;;  %v1889_v1 = vmul.f32 %v1692_v26, %v1871_v57  ;;  %v1893_v3 = vmul.f32 %v1692_v26, %v1847_v45  ;;  %v696_v13 = vadd.f32 %v664_v54, %v597_v53  ;;  %v1901_v5 = vmul.f32 %v1735_v42, %v1885_v63 }
  0x32   : > { %217 = vst [vmem:[#allocation2 + $0x98] sm:$0xff] %v1558_v2  ;;  %v1187_v6 = vadd.f32 %v1155_v59, %v1089_v58  ;;  %v1904_v7 = vmul.f32 %v1656_v15, %v259_v62  ;;  %v475_v8 = vmul.f32 %v1656_v15, %v276_v29  ;;  %v1910_v10 = vmul.f32 %v1735_v42, %v1865_v55 }
  0x33   : > { %218 = vst [vmem:[#allocation2 + $0xa0] sm:$0x3] %v1558_v2  ;;  %v1912_v16 = vadd.f32 %v548_v52, %v482_v51  ;;  %v794_v19 = vadd.f32 %v762_v61, %v696_v13  ;;  %v860_v20 = vmul.f32 %v1707_v32, %v1750_v47  ;;  %v1924_v27 = vmul.f32 %v1692_v26, %v1897_v4  ;;  %v1934_v47 = vld [vmem:[%s1616_s28 + $0x58] sm:$0xff]  ;;  %v1980_v13 = vld [vmem:[%s1616_s28 + $0xa0] sm:$0xff] }
  0x34   : > { %219 = vst [vmem:[#allocation2 + $0xa8] sm:$0xff] %v1558_v2  ;;  %v468_v31 = vmul.f32 %v1656_v15, %v1640_v11  ;;  %v1938_v35 = vmul.f32 %v1692_v26, %v1920_v25  ;;  %v1942_v36 = vmul.f32 %v1692_v26, %v1834_v9  ;;  %v1949_v11 = vmul.f32 %v1656_v15, %v1871_v57 }
  0x35   : > { %220 = vst [vmem:[#allocation2 + $0xb0] sm:$0xff] %v1558_v2  ;;  %v1966_v52 = vmul.f32 %v1735_v42, %v1934_v47  ;;  %v1970_v53 = vmul.f32 %v1672_v18, %v1802_v12 }
  0x36   : > { %221 = vst [vmem:[#allocation2 + $0xb8] sm:$0x3] %v1558_v2 }
  0x37   : > { %231 = vst [vmem:[#allocation2 + $0x108] sm:$0xff] %v1558_v2  ;;  %1289 = vmatmul.f32.gmra.mxu2 %v1187_v6  ;;  %v1982_v6 = vadd.f32 %v860_v20, %v794_v19  ;;  %v2003_v20 = vmul.f32 %v1735_v42, %v1980_v13 }
  0x38   : > { %232 = vst [vmem:[#allocation2 + $0x110] sm:$0xff] %v1558_v2 }
  0x39   : > { %233 = vst [vmem:[#allocation2 + $0x118] sm:$0x3] %v1558_v2 }
  0x3a   : > { %234 = vst [vmem:[#allocation2 + $0x120] sm:$0xff] %v1558_v2 }
  0x3b   : > { %235 = vst [vmem:[#allocation2 + $0x128] sm:$0xff] %v1558_v2 }
  0x3c   : > { %236 = vst [vmem:[#allocation2 + $0x130] sm:$0x3] %v1558_v2 }
  0x3d   : > { %237 = vst [vmem:[#allocation2 + $0x138] sm:$0xff] %v1558_v2 }
  0x3e   : > { %238 = vst [vmem:[#allocation2 + $0x140] sm:$0xff] %v1558_v2 }
  0x3f   : > { %239 = vst [vmem:[#allocation2 + $0x148] sm:$0x3] %v1558_v2 }
  0x40   : > { %240 = vst [vmem:[#allocation2 + $0x150] sm:$0xff] %v1558_v2 }
  0x41   : > { %241 = vst [vmem:[#allocation2 + $0x158] sm:$0xff] %v1558_v2 }
  0x42   : > { %242 = vst [vmem:[#allocation2 + $0x160] sm:$0x3] %v1558_v2 }
  0x43   : > { %243 = vst [vmem:[#allocation2 + $0x168] sm:$0xff] %v1558_v2 }
  0x44   : > { %244 = vst [vmem:[#allocation2 + $0x170] sm:$0xff] %v1558_v2 }
  0x45   : > { %245 = vst [vmem:[#allocation2 + $0x178] sm:$0x3] %v1558_v2 }
  0x46   : > { %246 = vst [vmem:[#allocation2 + $0x180] sm:$0xff] %v1558_v2 }
  0x47   : > { %247 = vst [vmem:[#allocation2 + $0x188] sm:$0xff] %v1558_v2 }
  0x48   : > { %248 = vst [vmem:[#allocation2 + $0x190] sm:$0x3] %v1558_v2 }
  0x49   : > { %249 = vst [vmem:[#allocation2 + $0x198] sm:$0xff] %v1558_v2 }
  0x4a   : > { %2781 = vst [vmem:[#allocation7_spill] sm:$0xff] %v1811_v22 }
  0x4b   : > { %2782 = vst [vmem:[#allocation8_spill] sm:$0xff] %v1814_v24 }
  0x4c   : > { %250 = vst [vmem:[#allocation2 + $0x1a0] sm:$0xff] %v1558_v2 }
  0x4d   : > { %2783 = vst [vmem:[#allocation9_spill] sm:$0xff] %v1826_v30 }
  0x4e   : > { %251 = vst [vmem:[#allocation2 + $0x1a8] sm:$0x3] %v1558_v2  ;;  %v1852_v2 = vmul.f32 %v1735_v42, %v1834_v9 }
  0x4f   : > { %2784 = vst [vmem:[#allocation10_spill] sm:$0xff] %v1834_v9 }
  0x50   : > { %2785 = vst [vmem:[#allocation11_spill] sm:$0xff] %v1847_v45 }
  0x51   : > { %307 = vst [vmem:[#allocation2 + $0x121] sm:$0xff] %v1811_v22  ;;  %v1985_v22 = vld [vmem:[%s1616_s28 + $0xe0] sm:$0xff] }
  0x52   : > { %308 = vst [vmem:[#allocation2 + $0x129] sm:$0xff] %v275_v23  ;;  %v1917_v23 = vld [vmem:[%s1616_s28 + $0x18] sm:$0xff] }
  0x53   : > { %2786 = vst [vmem:[#allocation12_spill] sm:$0xff] %v1859_v50 }
  0x54   : > { %2787 = vst [vmem:[#allocation13_spill] sm:$0xff] %v1865_v55 }
  0x55   : > { %309 = vst [vmem:[#allocation2 + $0x139] sm:$0xff] %v276_v29  ;;  %v370_v29 = vmul.f32 %v1666_v17, %v1791_v0  ;;  %v1945_v0 = vmul.f32 %v1656_v15, %v252_v40 }
  0x56   : > { %2788 = vst [vmem:[#allocation14_spill] sm:$0xff] %v1868_v56 }
  0x57   : > { %310 = vst [vmem:[#allocation2 + $0x141] sm:$0xff] %v1847_v45 }
  0x58   : > { %2789 = vst [vmem:[#allocation15_spill] sm:$0xff] %v1885_v63  ;;  %v1930_v34 = vld [vmem:[#allocation2 + $0x120] sm:$0xff] }
  0x59   : > { %311 = vst [vmem:[#allocation2 + $0x151] sm:$0xff] %v1834_v9  ;;  %v375_v44 = vmul.f32 %v1666_v17, %v1930_v34  ;;  %v1953_v48 = vld [vmem:[#allocation2 + $0x122] sm:$0xff]  ;;  %v1958_v51 = vld [vmem:[#allocation2 + $0x12a] sm:$0xff] }
  0x5a   : > { %2790 = vst [vmem:[#allocation16_spill] sm:$0xff] %v1897_v4  ;;  %v1956_v49 = vld [vmem:[#allocation2 + $0x128] sm:$0xff]  ;;  %v571_v54 = vmul.f32 %v1672_v18, %v1953_v48  ;;  %v572_v61 = vmul.f32 %v1672_v18, %v1958_v51 }
  0x5b   : > { %312 = vst [vmem:[#allocation2 + $0x159] sm:$0xff] %v1865_v55  ;;  %v376_v59 = vmul.f32 %v1666_v17, %v1956_v49  ;;  %v505_v12 = vadd.f32 %v1823_v28, %v375_v44  ;;  %v2007_v44 = vmul.f32 %v1735_v42, %v1985_v22 }
  0x5c   : > { %2791 = vst [vmem:[#allocation17_spill] sm:$0xff] %v1917_v23  ;;  %v635_v58 = vld [vmem:[#allocation2 + $0x138] sm:$0xff] }
  0x5d   : > { %285 = vst [vmem:[#allocation2 + $0x19] sm:$0xff] %v252_v40  ;;  %v1962_v40 = vmul.f32 %v1735_v42, %v1917_v23  ;;  %v506_v19 = vadd.f32 %v474_v60, %v376_v59 }
  0x5e   : > { %2792 = vst [vmem:[#allocation18_spill] sm:$0xff] %v1920_v25  ;;  %v1990_v9 = vld [vmem:[#allocation2 + $0x140] sm:$0xff] }
  0x5f   : > { %2793 = vst [vmem:[#allocation19_spill] sm:$0xff] %v1930_v34  ;;  %v670_v34 = vmul.f32 %v1681_v21, %v635_v58  ;;  %v671_v28 = vmul.f32 %v1681_v21, %v1990_v9 }
  0x60   : > { %286 = vst [vmem:[#allocation2 + $0x21] sm:$0xff] %v1897_v4  ;;  %v1997_v4 = vld [vmem:[#allocation2 + $0x150] sm:$0xff] }
  0x61   : > { %2794 = vst [vmem:[#allocation20_spill] sm:$0xff] %v1934_v47 }
  0x62   : > { %2795 = vst [vmem:[#allocation21_spill] sm:$0xff] %v1953_v48  ;;  %v832_v48 = vld [vmem:[#allocation2 + $0x13a] sm:$0xff] }
  0x63   : > { %287 = vst [vmem:[#allocation2 + $0x31] sm:$0xff] %v1868_v56  ;;  %v866_v59 = vmul.f32 %v1707_v32, %v832_v48 }
  0x64   : > { %2796 = vst [vmem:[#allocation22_spill] sm:$0xff] %v1956_v49  ;;  %v377_v49 = vmul.f32 %v1666_v17, %v635_v58  ;;  %v2009_v58 = vld [vmem:[#allocation2 + $0x152] sm:$0xff] }
  0x65   : > { %2797 = vst [vmem:[#allocation23_spill] sm:$0xff] %v1958_v51  ;;  %v1995_v51 = vadd.f32 %v468_v31, %v370_v29  ;;  %v2012_v29 = vld [vmem:[#allocation2 + $0x158] sm:$0xff]  ;;  %v2017_v31 = vmul.f32 %v1692_v26, %v1868_v56  ;;  %v966_v56 = vmul.f32 %v1721_v37, %v1997_v4 }
  0x66   : > { %288 = vst [vmem:[#allocation2 + $0x39] sm:$0xff] %v1917_v23  ;;  %v1992_v23 = vld [vmem:[#allocation2 + $0x142] sm:$0xff]  ;;  %v507_v60 = vadd.f32 %v475_v8, %v377_v49  ;;  %v2020_v55 = vld [vmem:[#allocation2 + $0x18] sm:$0xff]  ;;  %v2030_v8 = vmul.f32 %v1692_v26, %v1885_v63 }
  0x67   : > { %2798 = vst [vmem:[#allocation24_spill] sm:$0xff] %v1980_v13 }
  0x68   : > { %2799 = vst [vmem:[#allocation25_spill] sm:$0xff] %v1985_v22 }
  0x69   : > { %291 = vst [vmem:[#allocation2 + $0x61] sm:$0xff] %v1826_v30  ;;  %v603_v30 = vadd.f32 %v571_v54, %v505_v12  ;;  %v604_v54 = vadd.f32 %v572_v61, %v506_v19  ;;  %v867_v12 = vmul.f32 %v1707_v32, %v1992_v23  ;;  %v646_v61 = vmul.f32 %v1681_v21, %v2020_v55  ;;  %v2040_v19 = vld [vmem:[#allocation2 + $0x1a] sm:$0xff] }
  0x6a   : > { %2800 = vst [vmem:[#allocation26_spill] sm:$0xff] %v1990_v9  ;;  %v842_v50 = vmul.f32 %v1707_v32, %v2040_v19 }
  0x6b   : > { %2801 = vst [vmem:[#allocation27_spill] sm:$0xff] %v1992_v23  ;;  %v702_v49 = vadd.f32 %v670_v34, %v603_v30  ;;  %v2047_v30 = vld [vmem:[#allocation2 + $0x30] sm:$0xff]  ;;  %v703_v34 = vadd.f32 %v671_v28, %v604_v54  ;;  %v967_v23 = vmul.f32 %v1721_v37, %v2012_v29  ;;  %v678_v9 = vadd.f32 %v646_v61, %v1840_v41  ;;  %v2062_v28 = vld [vmem:[%s1616_s28 + $0xe8] sm:$0xff] }
  0x6c   : > { %2802 = vst [vmem:[#allocation28_spill] sm:$0xff] %v1997_v4  ;;  %v672_v54 = vmul.f32 %v1681_v21, %v1997_v4 }
  0x6d   : > { %292 = vst [vmem:[#allocation2 + $0x69] sm:$0xff] %v259_v62  ;;  %v573_v62 = vmul.f32 %v1672_v18, %v832_v48  ;;  %v2036_v48 = vmul.f32 %v1747_v46, %v2009_v58  ;;  %v2058_v26 = vld [vmem:[#allocation2 + $0x38] sm:$0xff]  ;;  %v801_v41 = vadd.f32 %v1893_v3, %v703_v34 }
  0x6e   : > { %293 = vst [vmem:[#allocation2 + $0x79] sm:$0xff] %v1871_v57  ;;  %v2026_v57 = vld [vmem:[%s1616_s28 + $0xa8] sm:$0xff]  ;;  %v2130_v42 = vld [vmem:[#allocation2 + $0x3a] sm:$0xff] }
  0x6f   : > { %2803 = vst [vmem:[#allocation29_spill] sm:$0xff] %v2012_v29  ;;  %v605_v45 = vadd.f32 %v573_v62, %v507_v60  ;;  %v942_v60 = vmul.f32 %v1721_v37, %v2047_v30  ;;  %v2074_v62 = vld [vmem:[#allocation2 + $0x15a] sm:$0xff]  ;;  %v2084_v29 = vld [vmem:[#allocation2 + $0x32] sm:$0xff] }
  0x70   : > { %294 = vst [vmem:[#allocation2 + $0x81] sm:$0xff] %v1920_v25  ;;  %v2043_v25 = vld [vmem:[#allocation2 + $0x20] sm:$0xff] }
  0x71   : > { %2804 = vst [vmem:[#allocation30_spill] sm:$0xff] %v2026_v57  ;;  %v647_v15 = vmul.f32 %v1681_v21, %v2043_v25 }
  0x72   : > { %2805 = vst [vmem:[#allocation31_spill] sm:$0xff] %v2030_v8  ;;  %v2045_v8 = vld [vmem:[#allocation2 + $0x22] sm:$0xff] }
  0x73   : > { %295 = vst [vmem:[#allocation2 + $0x91] sm:$0xff] %v1885_v63  ;;  %v800_v63 = vadd.f32 %v1837_v39, %v702_v49  ;;  %v2071_v39 = vld [vmem:[#allocation2 + $0x60] sm:$0xff]  ;;  %v679_v49 = vadd.f32 %v647_v15, %v1912_v16  ;;  %v843_v61 = vmul.f32 %v1707_v32, %v2045_v8  ;;  %v943_v15 = vmul.f32 %v1721_v37, %v2058_v26 }
  0x74   : > { %2806 = vst [vmem:[#allocation32_spill] sm:$0xff] %v2043_v25  ;;  %v776_v25 = vadd.f32 %v1855_v33, %v678_v9  ;;  %v359_v3 = vmul.f32 %v1666_v17, %v2071_v39  ;;  %v2088_v34 = vld [vmem:[#allocation2 + $0x62] sm:$0xff]  ;;  %v899_v9 = vadd.f32 %v867_v12, %v801_v41  ;;  %v2111_v24 = vld [vmem:[#allocation2 + $0x6a] sm:$0xff]  ;;  %v1138_v12 = vmul.f32 %v1747_v46, %v2084_v29 }
  0x75   : > { %2807 = vst [vmem:[#allocation33_spill] sm:$0xff] %v2045_v8  ;;  %v898_v4 = vadd.f32 %v866_v59, %v800_v63  ;;  %v2092_v16 = vld [vmem:[#allocation2 + $0x68] sm:$0xff]  ;;  %v555_v63 = vmul.f32 %v1672_v18, %v2088_v34  ;;  %v2097_v59 = vld [vmem:[#allocation2 + $0x78] sm:$0xff]  ;;  %v777_v33 = vadd.f32 %v1924_v27, %v679_v49  ;;  %v2104_v8 = vld [vmem:[%s1616_s28 + $0x60] sm:$0xff] }
  0x76   : > { %296 = vst [vmem:[#allocation2 + $0x99] sm:$0xff] %v1934_v47  ;;  %v2067_v47 = vld [vmem:[%s1616_s28 + $0x20] sm:$0xff]  ;;  %v489_v14 = vadd.f32 %v1844_v43, %v359_v3  ;;  %v2115_v27 = vld [vmem:[%s1616_s28 + $0x68] sm:$0xff] }
  0x77   : > { %2808 = vst [vmem:[#allocation34_spill] sm:$0xff] %v2058_v26  ;;  %v998_v26 = vadd.f32 %v966_v56, %v898_v4  ;;  %v1163_v56 = vmul.f32 %v1747_v46, %v2074_v62  ;;  %v2122_v4 = vld [vmem:[#allocation2 + $0x80] sm:$0xff] }
  0x78   : > { %305 = vst [vmem:[#allocation2 + $0x109] sm:$0xff] %v1980_v13  ;;  %v2081_v13 = vld [vmem:[%s1616_s28 + $0x28] sm:$0xff]  ;;  %v587_v49 = vadd.f32 %v555_v63, %v489_v14  ;;  %v2139_v14 = vld [vmem:[%s1616_s28 + $0xf0] sm:$0xff] }
  0x79   : > { %2809 = vst [vmem:[#allocation35_spill] sm:$0xff] %v2062_v28 }
  0x7a   : > { %2810 = vst [vmem:[#allocation36_spill] sm:$0xff] %v2071_v39  ;;  %v360_v39 = vmul.f32 %v1666_v17, %v2092_v16  ;;  %v2126_v3 = vld [vmem:[#allocation2 + $0x90] sm:$0xff] }
  0x7b   : > { %306 = vst [vmem:[#allocation2 + $0x111] sm:$0xff] %v2026_v57  ;;  %v874_v57 = vadd.f32 %v842_v50, %v776_v25  ;;  %v875_v50 = vadd.f32 %v843_v61, %v777_v33  ;;  %v1096_v25 = vadd.f32 %v1852_v2, %v998_v26  ;;  %v556_v61 = vmul.f32 %v1672_v18, %v2111_v24 }
  0x7c   : > { %2811 = vst [vmem:[#allocation37_spill] sm:$0xff] %v2088_v34  ;;  %v2109_v34 = vld [vmem:[#allocation2 + $0x7a] sm:$0xff]  ;;  %v490_v43 = vadd.f32 %v1904_v7, %v360_v39  ;;  %v704_v33 = vadd.f32 %v672_v54, %v605_v45  ;;  %v950_v45 = vmul.f32 %v1721_v37, %v2126_v3 }
  0x7d   : > { %2812 = vst [vmem:[#allocation38_spill] sm:$0xff] %v2092_v16  ;;  %v974_v41 = vadd.f32 %v942_v60, %v874_v57  ;;  %v2128_v16 = vld [vmem:[#allocation2 + $0x92] sm:$0xff]  ;;  %v850_v7 = vmul.f32 %v1707_v32, %v2109_v34  ;;  %v975_v39 = vadd.f32 %v943_v15, %v875_v50  ;;  %v1194_v26 = vadd.f32 %v2036_v48, %v1096_v25  ;;  %v2145_v60 = vld [vmem:[#allocation2 + $0x82] sm:$0xff] }
  0x7e   : > { %313 = vst [vmem:[#allocation2 + $0x169] sm:$0xff] %v1985_v22  ;;  %v654_v22 = vmul.f32 %v1681_v21, %v2097_v59  ;;  %v655_v57 = vmul.f32 %v1681_v21, %v2122_v4  ;;  %v2147_v63 = vld [vmem:[#allocation2 + $0x98] sm:$0xff]  ;;  %v1146_v48 = vmul.f32 %v1747_v46, %v2128_v16 }
  0x7f   : > { %314 = vst [vmem:[#allocation2 + $0x171] sm:$0xff] %v2062_v28  ;;  %v999_v28 = vadd.f32 %v967_v23, %v899_v9  ;;  %v1072_v2 = vadd.f32 %v1881_v38, %v974_v41  ;;  %v2149_v15 = vld [vmem:[#allocation2 + $0x108] sm:$0xff]  ;;  %v588_v38 = vadd.f32 %v556_v61, %v490_v43  ;;  %1310 = vmatmul.f32.vlgmr.msra.gmra.mxu3 %v1194_v26  ;;  %v2172_v61 = vld [vmem:[%s1616_s28 + $0xf8] sm:$0xff] }
  0x80   : > { %2813 = vst [vmem:[#allocation39_spill] sm:$0xff] %v2111_v24  ;;  %v686_v23 = vadd.f32 %v654_v22, %v587_v49  ;;  %v1139_v22 = vmul.f32 %v1747_v46, %v2130_v42  ;;  %v1073_v41 = vadd.f32 %v1962_v40, %v975_v39  ;;  %v960_v43 = vmul.f32 %v1721_v37, %v2149_v15 }
  0x81   : > { %289 = vst [vmem:[#allocation2 + $0x49] sm:$0xff] %v2067_v47  ;;  %v1170_v9 = vadd.f32 %v1138_v12, %v1072_v2  ;;  %v1097_v25 = vadd.f32 %v1910_v10, %v999_v28  ;;  %v687_v24 = vadd.f32 %v655_v57, %v588_v38  ;;  %v802_v10 = vadd.f32 %v1942_v36, %v704_v33 }
  0x82   : > { %2814 = vst [vmem:[#allocation40_spill] sm:$0xff] %v2115_v27  ;;  %v784_v50 = vadd.f32 %v1889_v1, %v686_v23  ;;  %v2163_v49 = vld [vmem:[#allocation2 + $0x10a] sm:$0xff]  ;;  %v868_v40 = vmul.f32 %v1707_v32, %v2009_v58  ;;  %v992_v39 = vadd.f32 %v960_v43, %v1982_v6  ;;  %v353_v2 = vmul.f32 %v1666_v17, %v2020_v55 }
  0x83   : > { %290 = vst [vmem:[#allocation2 + $0x51] sm:$0xff] %v2081_v13  ;;  %1238 = vmatmul.f32.vlgmr.msra.gmra.mxu0 %v1170_v9  ;;  %v785_v12 = vadd.f32 %v1938_v35, %v687_v24  ;;  %v1156_v26 = vmul.f32 %v1747_v46, %v2163_v49  ;;  %v1195_v36 = vadd.f32 %v1163_v56, %v1097_v25 }
  0x84   : > { %297 = vst [vmem:[#allocation2 + $0xa9] sm:$0xff] %v2104_v8  ;;  %v882_v1 = vadd.f32 %v850_v7, %v784_v50  ;;  %v900_v33 = vadd.f32 %v868_v40, %v802_v10  ;;  %v549_v57 = vmul.f32 %v1672_v18, %v2040_v19  ;;  %v1090_v24 = vadd.f32 %v2003_v20, %v992_v39  ;;  %v2195_v50 = vld [vmem:[#allocation2 + $0x9a] sm:$0xff]  ;;  %v2820_v40 = vld [vmem:[#allocation6_spill] sm:$0xff] }
  0x85   : > { %298 = vst [vmem:[#allocation2 + $0xb1] sm:$0xff] %v2115_v27  ;;  %v2158_v54 = vld [vmem:[#allocation2 + $0x168] sm:$0xff]  ;;  %v951_v27 = vmul.f32 %v1721_v37, %v2147_v63  ;;  %v483_v35 = vadd.f32 %v1945_v0, %v353_v2  ;;  %v648_v6 = vmul.f32 %v1681_v21, %v2047_v30  ;;  %v1171_v9 = vadd.f32 %v1139_v22, %v1073_v41 }
  0x86   : > { %2815 = vst [vmem:[#allocation41_spill] sm:$0xff] %v2139_v14  ;;  %v968_v28 = vmul.f32 %v1721_v37, %v2158_v54  ;;  %v982_v7 = vadd.f32 %v950_v45, %v882_v1  ;;  %v2186_v23 = vld [vmem:[#allocation2 + $0x16a] sm:$0xff]  ;;  %v598_v45 = vadd.f32 %v1970_v53, %v1995_v51  ;;  %v1188_v43 = vadd.f32 %v1156_v26, %v1090_v24 }
  0x87   : > { %2816 = vst [vmem:[#allocation42_spill] sm:$0xff] %v2149_v15  ;;  %v1164_v19 = vmul.f32 %v1747_v46, %v2186_v23  ;;  %v581_v20 = vadd.f32 %v549_v57, %v483_v35  ;;  %1313 = vmatmul.f32.gmra.mxu3 %v1195_v36  ;;  %v361_v22 = vmul.f32 %v1666_v17, %v2097_v59  ;;  %v2822_v36 = vld [vmem:[#allocation3_spill] sm:$0xff] }
  0x88   : > { %315 = vst [vmem:[#allocation2 + $0x181] sm:$0xff] %v2139_v14  ;;  %v851_v14 = vmul.f32 %v1707_v32, %v2145_v60  ;;  %v1080_v55 = vadd.f32 %v1901_v5, %v982_v7  ;;  %v1000_v56 = vadd.f32 %v968_v28, %v900_v33  ;;  %v557_v51 = vmul.f32 %v1672_v18, %v2109_v34  ;;  %v2821_v7 = vld [vmem:[#allocation8_spill] sm:$0xff]  ;;  %v2823_v33 = vld [vmem:[#allocation5_spill] sm:$0xff] }
  0x89   : > { %2817 = vst [vmem:[#allocation43_spill] sm:$0xff] %v2172_v61  ;;  %1292 = vmatmul.f32.gmra.mxu2 %v1188_v43  ;;  %v680_v41 = vadd.f32 %v648_v6, %v581_v20  ;;  %v491_v59 = vadd.f32 %v1949_v11, %v361_v22  ;;  %v656_v34 = vmul.f32 %v1681_v21, %v2126_v3  ;;  %v2824_v6 = vld [vmem:[#allocation12_spill] sm:$0xff]  ;;  %v2825_v43 = vld [vmem:[#allocation26_spill] sm:$0xff]  ;;  %v2826_v20 = vld [vmem:[#allocation11_spill] sm:$0xff] }
  0x8a   : > { %316 = vst [vmem:[#allocation2 + $0x189] sm:$0xff] %v2172_v61  ;;  %v883_v38 = vadd.f32 %v851_v14, %v785_v12  ;;  %v2201_v14 = vld [vmem:[#allocation2 + $0x48] sm:$0xff]  ;;  %v1178_v0 = vadd.f32 %v1146_v48, %v1080_v55  ;;  %v1098_v1 = vadd.f32 %v2007_v44, %v1000_v56  ;;  %v844_v48 = vmul.f32 %v1707_v32, %v2084_v29 }
  0x8b   : > { %v2204_v5 = vld [vmem:[#allocation2 + $0x4a] sm:$0xff]  ;;  %1241 = vmatmul.f32.gmra.mxu0 %v1171_v9  ;;  %v944_v44 = vmul.f32 %v1721_v37, %v2201_v14  ;;  %v1042_v28 = vmul.f32 %v2820_v40, %v2067_v47  ;;  %v852_v39 = vmul.f32 %v1707_v32, %v2128_v16  ;;  %v589_v2 = vadd.f32 %v557_v51, %v491_v59 }
  0x8c   : > { %v983_v25 = vadd.f32 %v951_v27, %v883_v38  ;;  %2818 = vst [vmem:[#allocation44_spill] sm:$0xff] %v2204_v5  ;;  %v1147_v27 = vmul.f32 %v1747_v46, %v2195_v50  ;;  %1262 = vmatmul.f32.vlgmr.msra.gmra.mxu1 %v1178_v0  ;;  %v2220_v10 = vld [vmem:[#allocation2 + $0xa8] sm:$0xff]  ;;  %v1140_v12 = vmul.f32 %v1747_v46, %v2204_v5  ;;  %v2233_v38 = vld [vmem:[#allocation2 + $0x110] sm:$0xff]  ;;  %v2827_v0 = vld [vmem:[#allocation4_spill] sm:$0xff] }
  0x8d   : > { %2819 = vst [vmem:[#allocation45_spill] sm:$0xff] %v2220_v10  ;;  %v1196_v26 = vadd.f32 %v1164_v19, %v1098_v1  ;;  %v665_v11 = vmul.f32 %v1681_v21, %v2821_v7  ;;  %v763_v57 = vmul.f32 %v2823_v33, %v2822_v36  ;;  %v952_v35 = vmul.f32 %v1721_v37, %v2220_v10  ;;  %v2239_v56 = vld [vmem:[#allocation2 + $0xaa] sm:$0xff] }
  0x8e   : > { %v1081_v53 = vadd.f32 %v1966_v52, %v983_v25  ;;  %v778_v52 = vadd.f32 %v2017_v31, %v680_v41  ;;  %v861_v55 = vmul.f32 %v1707_v32, %v2824_v6  ;;  %v688_v9 = vadd.f32 %v656_v34, %v589_v2  ;;  %v2252_v34 = vld [vmem:[#allocation2 + $0x112] sm:$0xff]  ;;  %v2830_v2 = vld [vmem:[#allocation29_spill] sm:$0xff] }
  0x8f   : > { %v697_v25 = vadd.f32 %v665_v11, %v598_v45  ;;  %v378_v19 = vmul.f32 %v1666_v17, %v2825_v43  ;;  %v476_v1 = vmul.f32 %v2827_v0, %v2826_v20  ;;  %v1050_v51 = vmul.f32 %v2820_v40, %v2104_v8  ;;  %1316 = vmatmul.f32.gmra.mxu3 %v1196_v26  ;;  %v2832_v20 = vld [vmem:[#allocation13_spill] sm:$0xff] }
  0x90   : > { %v1179_v31 = vadd.f32 %v1147_v27, %v1081_v53  ;;  %v876_v24 = vadd.f32 %v844_v48, %v778_v52  ;;  %v961_v53 = vmul.f32 %v1721_v37, %v2233_v38  ;;  %v2828_v27 = vld [vmem:[#allocation27_spill] sm:$0xff]  ;;  %v673_v11 = vmul.f32 %v1681_v21, %v2830_v2 }
  0x91   : > { %v574_v41 = vmul.f32 %v1672_v18, %v2828_v27  ;;  %v2829_v48 = vld [vmem:[#allocation31_spill] sm:$0xff]  ;;  %v795_v45 = vadd.f32 %v763_v57, %v697_v25  ;;  %v508_v52 = vadd.f32 %v476_v1, %v378_v19  ;;  %v1148_v36 = vmul.f32 %v1747_v46, %v2239_v56  ;;  %v2833_v19 = vld [vmem:[#allocation32_spill] sm:$0xff] }
  0x92   : > { %v976_v22 = vadd.f32 %v944_v44, %v876_v24  ;;  %v786_v59 = vadd.f32 %v2829_v48, %v688_v9  ;;  %v2831_v24 = vld [vmem:[#allocation30_spill] sm:$0xff]  ;;  %v771_v27 = vmul.f32 %v2823_v33, %v2832_v20  ;;  %v2262_v25 = vld [vmem:[#allocation2 + $0x170] sm:$0xff]  ;;  %v354_v1 = vmul.f32 %v1666_v17, %v2833_v19 }
  0x93   : > { %v1059_v43 = vmul.f32 %v2820_v40, %v2831_v24  ;;  %v893_v9 = vadd.f32 %v861_v55, %v795_v45  ;;  %v606_v57 = vadd.f32 %v574_v41, %v508_v52  ;;  %v2835_v24 = vld [vmem:[#allocation33_spill] sm:$0xff]  ;;  %v869_v55 = vmul.f32 %v1707_v32, %v2074_v62 }
  0x94   : > { %v1074_v44 = vadd.f32 %v1042_v28, %v976_v22  ;;  %1265 = vmatmul.f32.gmra.mxu1 %v1179_v31  ;;  %v884_v26 = vadd.f32 %v852_v39, %v786_v59  ;;  %v1157_v28 = vmul.f32 %v1747_v46, %v2252_v34  ;;  %v2834_v22 = vld [vmem:[#allocation16_spill] sm:$0xff]  ;;  %v550_v2 = vmul.f32 %v1672_v18, %v2835_v24  ;;  %v2836_v59 = vld [vmem:[#allocation34_spill] sm:$0xff] }
  0x95   : > { %v452_v61 = vmul.f32 %v2827_v0, %v2834_v22  ;;  %v993_v31 = vadd.f32 %v961_v53, %v893_v9  ;;  %v705_v39 = vadd.f32 %v673_v11, %v606_v57  ;;  %v969_v41 = vmul.f32 %v1721_v37, %v2262_v25  ;;  %v2837_v22 = vld [vmem:[#allocation17_spill] sm:$0xff]  ;;  %v2282_v11 = vld [vmem:[#allocation2 + $0x50] sm:$0xff]  ;;  %v2838_v9 = vld [vmem:[#allocation18_spill] sm:$0xff] }
  0x96   : > { %v1172_v48 = vadd.f32 %v1140_v12, %v1074_v44  ;;  %v984_v20 = vadd.f32 %v952_v35, %v884_v26  ;;  %v649_v45 = vmul.f32 %v1681_v21, %v2836_v59  ;;  %v747_v24 = vmul.f32 %v2823_v33, %v2837_v22  ;;  %v2280_v35 = vld [vmem:[#allocation2 + $0x172] sm:$0xff] }
  0x97   : > { %v484_v12 = vadd.f32 %v452_v61, %v354_v1  ;;  %v1091_v44 = vadd.f32 %v1059_v43, %v993_v31  ;;  %v803_v19 = vadd.f32 %v771_v27, %v705_v39  ;;  %v362_v26 = vmul.f32 %v1666_v17, %v2122_v4  ;;  %v2839_v1 = vld [vmem:[#allocation35_spill] sm:$0xff] }
  0x98   : > { %1244 = vmatmul.f32.gmra.mxu0 %v1172_v48  ;;  %v1082_v52 = vadd.f32 %v1050_v51, %v984_v20  ;;  %v460_v61 = vmul.f32 %v2827_v0, %v2838_v9  ;;  %v558_v57 = vmul.f32 %v1672_v18, %v2145_v60  ;;  %v1067_v48 = vmul.f32 %v2820_v40, %v2839_v1  ;;  %v337_v20 = vld [vmem:[#allocation2 + $0xf0] sm:$0xff] }
  0x99   : > { %v582_v53 = vadd.f32 %v550_v2, %v484_v12  ;;  %v1189_v43 = vadd.f32 %v1157_v28, %v1091_v44  ;;  %v901_v27 = vadd.f32 %v869_v55, %v803_v19  ;;  %v845_v2 = vmul.f32 %v1707_v32, %v2130_v42  ;;  %v435_v12 = vld [vmem:[#allocation2 + $0xf1] sm:$0xff] }
  0x9a   : > { %v1180_v51 = vadd.f32 %v1148_v36, %v1082_v52  ;;  %v492_v39 = vadd.f32 %v460_v61, %v362_v26  ;;  %v657_v4 = vmul.f32 %v1681_v21, %v2147_v63  ;;  %v533_v22 = vld [vmem:[#allocation2 + $0xf2] sm:$0xff]  ;;  %v1165_v36 = vmul.f32 %v1747_v46, %v2280_v35 }
  0x9b   : > { %v681_v31 = vadd.f32 %v649_v45, %v582_v53  ;;  %1295 = vmatmul.f32.gmra.mxu2 %v1189_v43  ;;  %v1001_v60 = vadd.f32 %v969_v41, %v901_v27  ;;  %v945_v28 = vmul.f32 %v1721_v37, %v2282_v11  ;;  %v2300_v55 = vld [vmem:[#allocation2 + $0x52] sm:$0xff]  ;;  %v371_v26 = vmul.f32 %v1666_v17, %v337_v20 }
  0x9c   : > { %1268 = vmatmul.f32.gmra.mxu1 %v1180_v51  ;;  %v590_v52 = vadd.f32 %v558_v57, %v492_v39  ;;  %v2840_v44 = vld [vmem:[#allocation20_spill] sm:$0xff]  ;;  %v2304_v53 = vld [vmem:[#allocation2 + $0xb0] sm:$0xff]  ;;  %v1043_v41 = vmul.f32 %v2820_v40, %v2081_v13  ;;  %v469_v61 = vmul.f32 %v2827_v0, %v435_v12  ;;  %v567_v51 = vmul.f32 %v1672_v18, %v533_v22 }
  0x9d   : > { %v779_v45 = vadd.f32 %v747_v24, %v681_v31  ;;  %v755_v19 = vmul.f32 %v2823_v33, %v2840_v44  ;;  %v1099_v9 = vadd.f32 %v1067_v48, %v1001_v60  ;;  %v1141_v24 = vmul.f32 %v1747_v46, %v2300_v55  ;;  %v2317_v48 = vld [vmem:[#allocation2 + $0xb2] sm:$0xff] }
  0x9e   : > { %v689_v57 = vadd.f32 %v657_v4, %v590_v52  ;;  %v853_v27 = vmul.f32 %v1707_v32, %v2195_v50  ;;  %v953_v20 = vmul.f32 %v1721_v37, %v2304_v53  ;;  %v501_v39 = vadd.f32 %v469_v61, %v371_v26  ;;  %v2330_v26 = vld [vmem:[%s2715_s1 + $0x1] ss:$0 sm:$0xff] }
  0x9f   : > { %v877_v43 = vadd.f32 %v845_v2, %v779_v45  ;;  %v1197_v31 = vadd.f32 %v1165_v36, %v1099_v9  ;;  %v666_v0 = vmul.f32 %v1681_v21, %v2149_v15  ;;  %v2841_v2 = vld [vmem:[#allocation40_spill] sm:$0xff]  ;;  %v2844_v9 = vld [vmem:[#allocation10_spill] sm:$0xff] }
  0xa0   : > { %v787_v22 = vadd.f32 %v755_v19, %v689_v57  ;;  %v1051_v60 = vmul.f32 %v2820_v40, %v2841_v2  ;;  %v2842_v45 = vld [vmem:[#allocation28_spill] sm:$0xff]  ;;  %v599_v52 = vadd.f32 %v567_v51, %v501_v39  ;;  %v575_v19 = vmul.f32 %v1672_v18, %v2009_v58  ;;  %v2846_v2 = vld [vmem:[#allocation25_spill] sm:$0xff] }
  0xa1   : > { %v977_v12 = vadd.f32 %v945_v28, %v877_v43  ;;  %v379_v4 = vmul.f32 %v1666_v17, %v2842_v45  ;;  %1319 = vmatmul.f32.gmra.mxu3 %v1197_v31  ;;  %v2843_v36 = vld [vmem:[#allocation24_spill] sm:$0xff]  ;;  %v477_v28 = vmul.f32 %v2330_v26, %v2844_v9  ;;  %v1149_v17 = vmul.f32 %v1747_v46, %v2317_v48  ;;  %v2845_v31 = vld [vmem:[#allocation19_spill] sm:$0xff]  ;;  %v2349_v58 = vld [vmem:[%s2715_s1] ss:$0 sm:$0xff] }
  0xa2   : > { %v764_v44 = vmul.f32 %v2823_v33, %v2843_v36  ;;  %v885_v43 = vadd.f32 %v853_v27, %v787_v22  ;;  %v862_v51 = vmul.f32 %v1707_v32, %v2163_v49  ;;  %v698_v57 = vadd.f32 %v666_v0, %v599_v52  ;;  %v2847_v22 = vld [vmem:[#allocation14_spill] sm:$0xff]  ;;  %v2849_v52 = vld [vmem:[#allocation21_spill] sm:$0xff] }
  0xa3   : > { %v1075_v61 = vadd.f32 %v1043_v41, %v977_v12  ;;  %v962_v39 = vmul.f32 %v1721_v37, %v2845_v31  ;;  %v509_v45 = vadd.f32 %v477_v28, %v379_v4  ;;  %v674_v36 = vmul.f32 %v1681_v21, %v2158_v54  ;;  %v2353_v12 = vld [vmem:[#allocation2 + $0x180] sm:$0xff]  ;;  %v2848_v4 = vld [vmem:[#allocation7_spill] sm:$0xff] }
  0xa4   : > { %v985_v15 = vadd.f32 %v953_v20, %v885_v43  ;;  %v772_v18 = vmul.f32 %v2823_v33, %v2846_v2  ;;  %v355_v41 = vmul.f32 %v2349_v58, %v2047_v30  ;;  %v796_v27 = vadd.f32 %v764_v44, %v698_v57  ;;  %v2373_v57 = vld [vmem:[%s2715_s1 + $0x4] ss:$0 sm:$0xff]  ;;  %v2382_v31 = vld [vmem:[%s2715_s1 + $0x5] ss:$0 sm:$0xff] }
  0xa5   : > { %v1173_v9 = vadd.f32 %v1141_v24, %v1075_v61  ;;  %v607_v0 = vadd.f32 %v575_v19, %v509_v45  ;;  %v453_v21 = vmul.f32 %v2330_v26, %v2847_v22  ;;  %v2360_v24 = vld [vmem:[%s2715_s1 + $0x2] ss:$0 sm:$0xff]  ;;  %v1060_v30 = vmul.f32 %v2820_v40, %v2848_v4 }
  0xa6   : > { %v551_v33 = vmul.f32 %v2360_v24, %v2084_v29  ;;  %v1083_v20 = vadd.f32 %v1051_v60, %v985_v15  ;;  %v1158_v44 = vmul.f32 %v1747_v46, %v2849_v52  ;;  %v870_v28 = vmul.f32 %v1707_v32, %v2186_v23  ;;  %v2851_v22 = vld [vmem:[#allocation41_spill] sm:$0xff] }
  0xa7   : > { %1247 = vmatmul.f32.gmra.mxu0 %v1173_v9  ;;  %v894_v19 = vadd.f32 %v862_v51, %v796_v27  ;;  %v706_v61 = vadd.f32 %v674_v36, %v607_v0  ;;  %v485_v43 = vadd.f32 %v453_v21, %v355_v41  ;;  %v650_v29 = vmul.f32 %v2373_v57, %v2201_v14  ;;  %v2388_v41 = vld [vmem:[#allocation2 + $0x182] sm:$0xff] }
  0xa8   : > { %v1181_v15 = vadd.f32 %v1149_v17, %v1083_v20  ;;  %v970_v60 = vmul.f32 %v1721_v37, %v2353_v12  ;;  %v748_v36 = vmul.f32 %v2382_v31, %v2067_v47  ;;  %v363_v51 = vmul.f32 %v2349_v58, %v2126_v3  ;;  %v2850_v17 = vld [vmem:[#allocation15_spill] sm:$0xff] }
  0xa9   : > { %v994_v45 = vadd.f32 %v962_v39, %v894_v19  ;;  %v804_v9 = vadd.f32 %v772_v18, %v706_v61  ;;  %v583_v27 = vadd.f32 %v551_v33, %v485_v43  ;;  %v461_v0 = vmul.f32 %v2330_v26, %v2850_v17  ;;  %v436_v19 = vld [vmem:[#allocation2 + $0xf9] sm:$0xff] }
  0xaa   : > { %1271 = vmatmul.f32.gmra.mxu1 %v1181_v15  ;;  %v1068_v21 = vmul.f32 %v2820_v40, %v2851_v22  ;;  %v846_v20 = vmul.f32 %v1707_v32, %v2204_v5  ;;  %v559_v4 = vmul.f32 %v2360_v24, %v2128_v16  ;;  %v658_v3 = vmul.f32 %v2373_v57, %v2220_v10  ;;  %v2852_v43 = vld [vmem:[#allocation36_spill] sm:$0xff] }
  0xab   : > { %v1092_v39 = vadd.f32 %v1060_v30, %v994_v45  ;;  %v902_v18 = vadd.f32 %v870_v28, %v804_v9  ;;  %v682_v52 = vadd.f32 %v650_v29, %v583_v27  ;;  %v493_v33 = vadd.f32 %v461_v0, %v363_v51  ;;  %v2408_v28 = vld [vmem:[#allocation2 + $0xc0] sm:$0xff] }
  0xac   : > { %v1166_v61 = vmul.f32 %v1747_v46, %v2388_v41  ;;  %v946_v15 = vmul.f32 %v1721_v37, %v2852_v43  ;;  %v756_v32 = vmul.f32 %v2382_v31, %v2104_v8  ;;  %v372_v16 = vmul.f32 %v2349_v58, %v2821_v7  ;;  %v2410_v29 = vld [vmem:[#allocation2 + $0xc1] sm:$0xff] }
  0xad   : > { %v1190_v17 = vadd.f32 %v1158_v44, %v1092_v39  ;;  %v1002_v5 = vadd.f32 %v970_v60, %v902_v18  ;;  %v780_v10 = vadd.f32 %v748_v36, %v682_v52  ;;  %v591_v30 = vadd.f32 %v559_v4, %v493_v33  ;;  %v2853_v51 = vld [vmem:[#allocation9_spill] sm:$0xff] }
  0xae   : > { %v1044_v45 = vmul.f32 %v2820_v40, %v2853_v51  ;;  %v2854_v9 = vld [vmem:[#allocation37_spill] sm:$0xff]  ;;  %v470_v27 = vmul.f32 %v2330_v26, %v436_v19  ;;  %v568_v0 = vmul.f32 %v2360_v24, %v2824_v6 }
  0xaf   : > { %v1142_v37 = vmul.f32 %v1747_v46, %v2854_v9  ;;  %1298 = vmatmul.f32.gmra.mxu2 %v1190_v17  ;;  %v1100_v7 = vadd.f32 %v1068_v21, %v1002_v5  ;;  %v878_v44 = vadd.f32 %v846_v20, %v780_v10  ;;  %v690_v60 = vadd.f32 %v658_v3, %v591_v30  ;;  %v2422_v36 = vld [vmem:[%s2715_s1 + $0x6] ss:$0 sm:$0xff]  ;;  %v444_v4 = vld [vmem:[#allocation2 + $0x159] sm:$0xff]  ;;  %v2429_v46 = vld [vmem:[%s2715_s1 + $0x8] ss:$0 sm:$0xff] }
  0xb0   : > { %v854_v40 = vmul.f32 %v2422_v36, %v2239_v56  ;;  %v954_v6 = vmul.f32 %v2429_v46, %v2408_v28  ;;  %v2436_v5 = vld [vmem:[%s2715_s1 + $0x9] ss:$0 sm:$0xff]  ;;  %v502_v20 = vadd.f32 %v470_v27, %v372_v16  ;;  %v667_v3 = vmul.f32 %v2373_v57, %v2233_v38  ;;  %v2855_v33 = vld [vmem:[#allocation29_spill] sm:$0xff] }
  0xb1   : > { %v1052_v10 = vmul.f32 %v2436_v5, %v2410_v29  ;;  %v2440_v21 = vld [vmem:[#allocation2 + $0xc2] sm:$0xff]  ;;  %v1198_v39 = vadd.f32 %v1166_v61, %v1100_v7  ;;  %v978_v18 = vadd.f32 %v946_v15, %v878_v44  ;;  %v788_v52 = vadd.f32 %v756_v32, %v690_v60  ;;  %v2454_v61 = vld [vmem:[%s2715_s1 + $0xa] ss:$0 sm:$0xff] }
  0xb2   : > { %v380_v19 = vmul.f32 %v2349_v58, %v2855_v33  ;;  %v600_v43 = vadd.f32 %v568_v0, %v502_v20  ;;  %v2856_v17 = vld [vmem:[#allocation30_spill] sm:$0xff]  ;;  %v478_v51 = vmul.f32 %v2330_v26, %v444_v4  ;;  %v576_v9 = vmul.f32 %v2360_v24, %v2074_v62  ;;  %v420_v0 = vld [vmem:[#allocation2 + $0x39] sm:$0xff] }
  0xb3   : > { %v765_v30 = vmul.f32 %v2382_v31, %v2856_v17  ;;  %1322 = vmatmul.f32.gmra.mxu3 %v1198_v39  ;;  %v1076_v16 = vadd.f32 %v1044_v45, %v978_v18  ;;  %v886_v27 = vadd.f32 %v854_v40, %v788_v52  ;;  %v1150_v15 = vmul.f32 %v2454_v61, %v2440_v21  ;;  %v2857_v44 = vld [vmem:[#allocation22_spill] sm:$0xff] }
  0xb4   : > { %v863_v32 = vmul.f32 %v2422_v36, %v2252_v34  ;;  %v699_v7 = vadd.f32 %v667_v3, %v600_v43  ;;  %v963_v60 = vmul.f32 %v2429_v46, %v2857_v44  ;;  %v2462_v62 = vld [vmem:[#allocation2 + $0x129] sm:$0xff]  ;;  %v510_v45 = vadd.f32 %v478_v51, %v380_v19 }
  0xb5   : > { %v675_v40 = vmul.f32 %v2373_v57, %v2262_v25  ;;  %v1174_v4 = vadd.f32 %v1142_v37, %v1076_v16  ;;  %v986_v20 = vadd.f32 %v954_v6, %v886_v27  ;;  %v773_v39 = vmul.f32 %v2382_v31, %v2839_v1  ;;  %v2470_v3 = vld [vmem:[#allocation2 + $0x188] sm:$0xff]  ;;  %v2858_v6 = vld [vmem:[#allocation23_spill] sm:$0xff] }
  0xb6   : > { %v356_v18 = vmul.f32 %v2349_v58, %v2836_v59  ;;  %v797_v52 = vadd.f32 %v765_v30, %v699_v7  ;;  %v608_v33 = vadd.f32 %v576_v9, %v510_v45  ;;  %v454_v43 = vmul.f32 %v2330_v26, %v420_v0  ;;  %v428_v30 = vld [vmem:[#allocation2 + $0x99] sm:$0xff] }
  0xb7   : > { %v552_v19 = vmul.f32 %v2360_v24, %v2130_v42  ;;  %1250 = vmatmul.f32.gmra.mxu0 %v1174_v4  ;;  %v1084_v17 = vadd.f32 %v1052_v10, %v986_v20  ;;  %v1061_v37 = vmul.f32 %v2436_v5, %v2462_v62  ;;  %v1159_v1 = vmul.f32 %v2454_v61, %v2858_v6  ;;  %v2489_v4 = vld [vmem:[#allocation2 + $0x18a] sm:$0xff] }
  0xb8   : > { %v871_v59 = vmul.f32 %v2422_v36, %v2280_v35  ;;  %v895_v51 = vadd.f32 %v863_v32, %v797_v52  ;;  %v707_v9 = vadd.f32 %v675_v40, %v608_v33  ;;  %v486_v16 = vadd.f32 %v454_v43, %v356_v18  ;;  %v2859_v20 = vld [vmem:[#allocation43_spill] sm:$0xff] }
  0xb9   : > { %v651_v27 = vmul.f32 %v2373_v57, %v2282_v11  ;;  %v1182_v0 = vadd.f32 %v1150_v15, %v1084_v17  ;;  %v971_v42 = vmul.f32 %v2429_v46, %v2470_v3  ;;  %v749_v10 = vmul.f32 %v2382_v31, %v2081_v13  ;;  %v2500_v33 = vld [vmem:[#allocation2 + $0x69] sm:$0xff] }
  0xba   : > { %v364_v7 = vmul.f32 %v2349_v58, %v2147_v63  ;;  %v995_v44 = vadd.f32 %v963_v60, %v895_v51  ;;  %v805_v45 = vadd.f32 %v773_v39, %v707_v9  ;;  %v584_v32 = vadd.f32 %v552_v19, %v486_v16  ;;  %v2860_v17 = vld [vmem:[#allocation38_spill] sm:$0xff] }
  0xbb   : > { %v462_v40 = vmul.f32 %v2330_v26, %v428_v30  ;;  %1274 = vmatmul.f32.gmra.mxu1 %v1182_v0  ;;  %v1069_v15 = vmul.f32 %v2436_v5, %v2859_v20  ;;  %v847_v18 = vmul.f32 %v2422_v36, %v2300_v55  ;;  %v560_v13 = vmul.f32 %v2360_v24, %v2195_v50  ;;  %v2861_v30 = vld [vmem:[#allocation40_spill] sm:$0xff]  ;;  %v2862_v9 = vld [vmem:[#allocation42_spill] sm:$0xff] }
  0xbc   : > { %v659_v63 = vmul.f32 %v2373_v57, %v2304_v53  ;;  %v1093_v60 = vadd.f32 %v1061_v37, %v995_v44  ;;  %v903_v39 = vadd.f32 %v871_v59, %v805_v45  ;;  %v683_v52 = vadd.f32 %v651_v27, %v584_v32  ;;  %v2510_v27 = vld [vmem:[#allocation2 + $0xc8] sm:$0xff]  ;;  %v2865_v32 = vld [vmem:[#allocation39_spill] sm:$0xff] }
  0xbd   : > { %v494_v43 = vadd.f32 %v462_v40, %v364_v7  ;;  %v1167_v19 = vmul.f32 %v2454_v61, %v2489_v4  ;;  %v947_v6 = vmul.f32 %v2429_v46, %v2860_v17  ;;  %v757_v51 = vmul.f32 %v2382_v31, %v2861_v30  ;;  %2863 = vst [vmem:[#allocation6_spill] sm:$0xff] %v2510_v27  ;;  %v2512_v44 = vld [vmem:[#allocation2 + $0xc9] sm:$0xff]  ;;  %v633_v7 = vld [vmem:[#allocation2 + $0x120] sm:$0xff]  ;;  %v2866_v17 = vld [vmem:[#allocation24_spill] sm:$0xff] }
  0xbe   : > { %v373_v50 = vmul.f32 %v2349_v58, %v2862_v9  ;;  %v1191_v16 = vadd.f32 %v1159_v1, %v1093_v60  ;;  %v1003_v0 = vadd.f32 %v971_v42, %v903_v39  ;;  %v781_v37 = vadd.f32 %v749_v10, %v683_v52  ;;  %2864 = vst [vmem:[#allocation8_spill] sm:$0xff] %v2512_v44  ;;  %v732_v39 = vld [vmem:[#allocation2 + $0x121] sm:$0xff]  ;;  %v2528_v9 = vld [vmem:[#allocation2 + $0xca] sm:$0xff] }
  0xbf   : > { %v592_v59 = vadd.f32 %v560_v13, %v494_v43  ;;  %v1045_v45 = vmul.f32 %v2436_v5, %v2500_v33  ;;  %v1143_v40 = vmul.f32 %v2454_v61, %v2865_v32  ;;  %v471_v30 = vmul.f32 %v2330_v26, %v2866_v17 }
  0xc0   : > { %v569_v1 = vmul.f32 %v2360_v24, %v2163_v49  ;;  %1301 = vmatmul.f32.gmra.mxu2 %v1191_v16  ;;  %v1101_v42 = vadd.f32 %v1069_v15, %v1003_v0  ;;  %v879_v10 = vadd.f32 %v847_v18, %v781_v37  ;;  %v855_v60 = vmul.f32 %v2422_v36, %v2317_v48  ;;  %v830_v49 = vld [vmem:[#allocation2 + $0x122] sm:$0xff] }
  0xc1   : > { %v691_v13 = vadd.f32 %v659_v63, %v592_v59  ;;  %v955_v52 = vmul.f32 %v2429_v46, %v2510_v27  ;;  %v1053_v43 = vmul.f32 %v2436_v5, %v2512_v44  ;;  %v503_v32 = vadd.f32 %v471_v30, %v373_v50  ;;  %v929_v63 = vld [vmem:[#allocation2 + $0x138] sm:$0xff] }
  0xc2   : > { %v668_v17 = vmul.f32 %v2373_v57, %v633_v7  ;;  %v1199_v16 = vadd.f32 %v1167_v19, %v1101_v42  ;;  %v979_v15 = vadd.f32 %v947_v6, %v879_v10  ;;  %v381_v0 = vmul.f32 %v2349_v58, %v2158_v54  ;;  %v1028_v30 = vld [vmem:[#allocation2 + $0x139] sm:$0xff] }
  0xc3   : > { %v789_v18 = vadd.f32 %v757_v51, %v691_v13  ;;  %v601_v37 = vadd.f32 %v569_v1, %v503_v32  ;;  %v766_v59 = vmul.f32 %v2382_v31, %v732_v39  ;;  %v479_v27 = vmul.f32 %v2330_v26, %v2846_v2  ;;  %v1126_v1 = vld [vmem:[#allocation2 + $0x13a] sm:$0xff] }
  0xc4   : > { %v577_v44 = vmul.f32 %v2360_v24, %v2186_v23  ;;  %1325 = vmatmul.f32.gmra.mxu3 %v1199_v16  ;;  %v1077_v50 = vadd.f32 %v1045_v45, %v979_v15  ;;  %v1151_v19 = vmul.f32 %v2454_v61, %v2528_v9  ;;  %v864_v6 = vmul.f32 %v2422_v36, %v830_v49  ;;  %v2867_v49 = vld [vmem:[#allocation44_spill] sm:$0xff]  ;;  %v716_v16 = vld [vmem:[#allocation2 + $0x61] sm:$0xff] }
  0xc5   : > { %v887_v7 = vadd.f32 %v855_v60, %v789_v18  ;;  %v700_v51 = vadd.f32 %v668_v17, %v601_v37  ;;  %v964_v54 = vmul.f32 %v2429_v46, %v929_v63  ;;  %v511_v42 = vadd.f32 %v479_v27, %v381_v0  ;;  %v617_v60 = vld [vmem:[#allocation2 + $0x60] sm:$0xff] }
  0xc6   : > { %v676_v2 = vmul.f32 %v2373_v57, %v2353_v12  ;;  %v1175_v10 = vadd.f32 %v1143_v40, %v1077_v50  ;;  %v774_v23 = vmul.f32 %v2382_v31, %v2851_v22  ;;  %v357_v45 = vmul.f32 %v2349_v58, %v2201_v14  ;;  %v1036_v18 = vld [vmem:[#allocation2 + $0x199] sm:$0xff] }
  0xc7   : > { %v987_v13 = vadd.f32 %v955_v52, %v887_v7  ;;  %v798_v39 = vadd.f32 %v766_v59, %v700_v51  ;;  %v609_v32 = vadd.f32 %v577_v44, %v511_v42  ;;  %v455_v17 = vmul.f32 %v2330_v26, %v2067_v47  ;;  %v814_v47 = vld [vmem:[#allocation2 + $0x62] sm:$0xff] }
  0xc8   : > { %v553_v27 = vmul.f32 %v2360_v24, %v2867_v49  ;;  %1253 = vmatmul.f32.gmra.mxu0 %v1175_v10  ;;  %v1062_v40 = vmul.f32 %v2436_v5, %v1028_v30  ;;  %v1160_v52 = vmul.f32 %v2454_v61, %v1126_v1  ;;  %v872_v22 = vmul.f32 %v2422_v36, %v2388_v41  ;;  %v1549_v37 = vld [vmem:[#allocation2] sm:$0xff]  ;;  %v913_v1 = vld [vmem:[#allocation2 + $0x78] sm:$0xff] }
  0xc9   : > { %v1085_v12 = vadd.f32 %v1053_v43, %v987_v13  ;;  %v896_v14 = vadd.f32 %v864_v6, %v798_v39  ;;  %v708_v15 = vadd.f32 %v676_v2, %v609_v32  ;;  %v487_v44 = vadd.f32 %v455_v17, %v357_v45  ;;  %v2868_v50 = vld [vmem:[#allocation45_spill] sm:$0xff]  ;;  %v438_v17 = vld [vmem:[#allocation2 + $0x111] sm:$0xff] }
  0xca   : > { %v652_v63 = vmul.f32 %v2373_v57, %v617_v60  ;;  %v2558_v59 = vmul.f32 %v1549_v37, %v2429_v46  ;;  %v750_v43 = vmul.f32 %v2382_v31, %v716_v16  ;;  %v365_v7 = vmul.f32 %v2349_v58, %v2868_v50  ;;  %v1134_v41 = vld [vmem:[#allocation2 + $0x19a] sm:$0xff]  ;;  %v446_v37 = vld [vmem:[#allocation2 + $0x171] sm:$0xff] }
  0xcb   : > { %v1183_v0 = vadd.f32 %v1151_v19, %v1085_v12  ;;  %v996_v51 = vadd.f32 %v964_v54, %v896_v14  ;;  %v806_v30 = vadd.f32 %v774_v23, %v708_v15  ;;  %v585_v6 = vadd.f32 %v553_v27, %v487_v44  ;;  %v1012_v60 = vld [vmem:[#allocation2 + $0x79] sm:$0xff]  ;;  %v634_v15 = vld [vmem:[#allocation2 + $0x128] sm:$0xff] }
  0xcc   : > { %v463_v42 = vmul.f32 %v2330_v26, %v2104_v8  ;;  %v1070_v19 = vmul.f32 %v2436_v5, %v1036_v18  ;;  %v848_v2 = vmul.f32 %v2422_v36, %v814_v47  ;;  %v561_v10 = vmul.f32 %v2360_v24, %v2239_v56  ;;  %v1110_v39 = vld [vmem:[#allocation2 + $0x7a] sm:$0xff] }
  0xcd   : > { %1277 = vmatmul.f32.gmra.mxu1 %v1183_v0  ;;  %v660_v13 = vmul.f32 %v2373_v57, %v2408_v28  ;;  %v1094_v45 = vadd.f32 %v1062_v40, %v996_v51  ;;  %v904_v54 = vadd.f32 %v872_v22, %v806_v30  ;;  %v684_v23 = vadd.f32 %v652_v63, %v585_v6  ;;  %v921_v22 = vld [vmem:[#allocation2 + $0xd8] sm:$0xff] }
  0xce   : > { %v495_v32 = vadd.f32 %v463_v42, %v365_v7  ;;  %v1168_v8 = vmul.f32 %v2454_v61, %v1134_v41  ;;  %v948_v49 = vmul.f32 %v2429_v46, %v913_v1  ;;  %v758_v27 = vmul.f32 %v2382_v31, %v2410_v29  ;;  %v1020_v14 = vld [vmem:[#allocation2 + $0xd9] sm:$0xff]  ;;  %v831_v41 = vld [vmem:[#allocation2 + $0x12a] sm:$0xff] }
  0xcf   : > { %v374_v56 = vmul.f32 %v2349_v58, %v2233_v38  ;;  %v1192_v16 = vadd.f32 %v1160_v52, %v1094_v45  ;;  %v1004_v28 = vadd.f32 %v2558_v59, %v904_v54  ;;  %v782_v12 = vadd.f32 %v750_v43, %v684_v23  ;;  %v1118_v7 = vld [vmem:[#allocation2 + $0xda] sm:$0xff]  ;;  %v422_v45 = vld [vmem:[#allocation2 + $0x51] sm:$0xff] }
  0xd0   : > { %v593_v40 = vadd.f32 %v561_v10, %v495_v32  ;;  %v1046_v18 = vmul.f32 %v2436_v5, %v1012_v60  ;;  %v1144_v44 = vmul.f32 %v2454_v61, %v1110_v39  ;;  %v472_v63 = vmul.f32 %v2330_v26, %v438_v17  ;;  %v930_v42 = vld [vmem:[#allocation2 + $0x140] sm:$0xff] }
  0xd1   : > { %v570_v29 = vmul.f32 %v2360_v24, %v2252_v34  ;;  %1304 = vmatmul.f32.gmra.mxu2 %v1192_v16  ;;  %v1102_v47 = vadd.f32 %v1070_v19, %v1004_v28  ;;  %v880_v38 = vadd.f32 %v848_v2, %v782_v12  ;;  %v856_v0 = vmul.f32 %v2422_v36, %v2440_v21  ;;  %v1029_v17 = vld [vmem:[#allocation2 + $0x141] sm:$0xff] }
  0xd2   : > { %v692_v52 = vadd.f32 %v660_v13, %v593_v40  ;;  %v956_v43 = vmul.f32 %v2429_v46, %v921_v22  ;;  %v1054_v50 = vmul.f32 %v2436_v5, %v1020_v14  ;;  %v504_v51 = vadd.f32 %v472_v63, %v374_v56  ;;  %v430_v63 = vld [vmem:[#allocation2 + $0xb1] sm:$0xff] }
  0xd3   : > { %v669_v30 = vmul.f32 %v2373_v57, %v634_v15  ;;  %v1200_v6 = vadd.f32 %v1168_v8, %v1102_v47  ;;  %v980_v1 = vadd.f32 %v948_v49, %v880_v38  ;;  %v382_v19 = vmul.f32 %v2349_v58, %v2262_v25  ;;  %v618_v49 = vld [vmem:[#allocation2 + $0x68] sm:$0xff] }
  0xd4   : > { %v790_v34 = vadd.f32 %v758_v27, %v692_v52  ;;  %v602_v2 = vadd.f32 %v570_v29, %v504_v51  ;;  %v767_v21 = vmul.f32 %v2382_v31, %v2462_v62  ;;  %v480_v10 = vmul.f32 %v2330_v26, %v446_v37  ;;  %v1037_v52 = vld [vmem:[#allocation2 + $0x1a1] sm:$0xff] }
  0xd5   : > { %v578_v13 = vmul.f32 %v2360_v24, %v2280_v35  ;;  %1328 = vmatmul.f32.gmra.mxu3 %v1200_v6  ;;  %v1078_v54 = vadd.f32 %v1046_v18, %v980_v1  ;;  %v1152_v60 = vmul.f32 %v2454_v61, %v1118_v7  ;;  %v865_v39 = vmul.f32 %v2422_v36, %v831_v41  ;;  %v1127_v35 = vld [vmem:[#allocation2 + $0x142] sm:$0xff] }
  0xd6   : > { %v888_v23 = vadd.f32 %v856_v0, %v790_v34  ;;  %v701_v32 = vadd.f32 %v669_v30, %v602_v2  ;;  %v965_v25 = vmul.f32 %v2429_v46, %v930_v42  ;;  %v512_v8 = vadd.f32 %v480_v10, %v382_v19  ;;  %v1135_v51 = vld [vmem:[#allocation2 + $0x1a2] sm:$0xff] }
  0xd7   : > { %v677_v62 = vmul.f32 %v2373_v57, %v2470_v3  ;;  %v1176_v27 = vadd.f32 %v1144_v44, %v1078_v54  ;;  %v358_v16 = vmul.f32 %v2349_v58, %v2282_v11  ;;  %v456_v28 = vmul.f32 %v2330_v26, %v422_v45  ;;  %v914_v30 = vld [vmem:[#allocation2 + $0x80] sm:$0xff]  ;;  %v2870_v54 = vld [vmem:[#allocation8_spill] sm:$0xff] }
  0xd8   : > { %v988_v56 = vadd.f32 %v956_v43, %v888_v23  ;;  %v799_v12 = vadd.f32 %v767_v21, %v701_v32  ;;  %v610_v40 = vadd.f32 %v578_v13, %v512_v8  ;;  %v775_v22 = vmul.f32 %v2382_v31, %v2859_v20  ;;  %v815_v20 = vld [vmem:[#allocation2 + $0x6a] sm:$0xff]  ;;  %v1013_v19 = vld [vmem:[#allocation2 + $0x81] sm:$0xff] }
  0xd9   : > { %v554_v14 = vmul.f32 %v2360_v24, %v2300_v55  ;;  %1256 = vmatmul.f32.gmra.mxu0 %v1176_v27  ;;  %v1063_v3 = vmul.f32 %v2436_v5, %v1029_v17  ;;  %v488_v18 = vadd.f32 %v456_v28, %v358_v16  ;;  %v653_v44 = vmul.f32 %v2373_v57, %v618_v49  ;;  %v922_v32 = vld [vmem:[#allocation2 + $0xe0] sm:$0xff] }
  0xda   : > { %v1086_v15 = vadd.f32 %v1054_v50, %v988_v56  ;;  %v897_v29 = vadd.f32 %v865_v39, %v799_v12  ;;  %v1161_v11 = vmul.f32 %v2454_v61, %v1127_v35  ;;  %v709_v47 = vadd.f32 %v677_v62, %v610_v40  ;;  %v1021_v49 = vld [vmem:[#allocation2 + $0xe1] sm:$0xff] }
  0xdb   : > { %v873_v38 = vmul.f32 %v2422_v36, %v2489_v4  ;;  %v586_v37 = vadd.f32 %v554_v14, %v488_v18  ;;  %v751_v55 = vmul.f32 %v2382_v31, %v2500_v33  ;;  %v366_v43 = vmul.f32 %v2349_v58, %v2304_v53  ;;  %v2869_v53 = vld [vmem:[#allocation6_spill] sm:$0xff] }
  0xdc   : > { %v1184_v0 = vadd.f32 %v1152_v60, %v1086_v15  ;;  %v997_v50 = vadd.f32 %v965_v25, %v897_v29  ;;  %v807_v7 = vadd.f32 %v775_v22, %v709_v47  ;;  %v464_v41 = vmul.f32 %v2330_v26, %v430_v63  ;;  %v1119_v35 = vld [vmem:[#allocation2 + $0xe2] sm:$0xff] }
  0xdd   : > { %v562_v6 = vmul.f32 %v2360_v24, %v2317_v48  ;;  %v1071_v4 = vmul.f32 %v2436_v5, %v1037_v52  ;;  %v685_v1 = vadd.f32 %v653_v44, %v586_v37  ;;  %v849_v34 = vmul.f32 %v2422_v36, %v815_v20  ;;  %v1111_v24 = vld [vmem:[#allocation2 + $0x82] sm:$0xff] }
  0xde   : > { %1280 = vmatmul.f32.gmra.mxu1 %v1184_v0  ;;  %v1095_v42 = vadd.f32 %v1063_v3, %v997_v50  ;;  %v905_v33 = vadd.f32 %v873_v38, %v807_v7  ;;  %v496_v2 = vadd.f32 %v464_v41, %v366_v43  ;;  %v661_v58 = vmul.f32 %v2373_v57, %v2869_v53 }
  0xdf   : > { %v1169_v21 = vmul.f32 %v2454_v61, %v1135_v51  ;;  %v783_v10 = vadd.f32 %v751_v55, %v685_v1  ;;  %v949_v26 = vmul.f32 %v2429_v46, %v914_v30  ;;  %v759_v23 = vmul.f32 %v2382_v31, %v2870_v54 }
  0xe0   : > { %v1193_v13 = vadd.f32 %v1161_v11, %v1095_v42  ;;  %v1005_v48 = vadd.f32 %v2558_v59, %v905_v33  ;;  %v594_v45 = vadd.f32 %v562_v6, %v496_v2  ;;  %v1047_v39 = vmul.f32 %v2436_v5, %v1013_v19 }
  0xe1   : > { %v881_v60 = vadd.f32 %v849_v34, %v783_v10  ;;  %v857_v17 = vmul.f32 %v2422_v36, %v2528_v9  ;;  %v1145_v62 = vmul.f32 %v2454_v61, %v1111_v24  ;;  %v957_v56 = vmul.f32 %v2429_v46, %v922_v32  ;;  %v2638_v9 = vld [vmem:[%s2717_s3] ss:$0 sm:$0xff]  ;;  %v1287_v46 = vpop.f32.mrf.mxu2 }
  0xe2   : > { %1307 = vmatmul.f32.gmra.mxu2 %v1193_v13  ;;  %v1103_v25 = vadd.f32 %v1071_v4, %v1005_v48  ;;  %v693_v57 = vadd.f32 %v661_v58, %v594_v45  ;;  %v1055_v28 = vmul.f32 %v2436_v5, %v1021_v49  ;;  %v1153_v22 = vmul.f32 %v2454_v61, %v1119_v35 }
  0xe3   : > { %v981_v8 = vadd.f32 %v949_v26, %v881_v60  ;;  %v1288_v15 = vadd.f32 %v2638_v9, %v1287_v46 }
  0xe4   : > { %v1201_v59 = vadd.f32 %v1169_v21, %v1103_v25  ;;  %v791_v27 = vadd.f32 %v759_v23, %v693_v57 }
  0xe5   : > { %v1079_v31 = vadd.f32 %v1047_v39, %v981_v8  ;;  %v1351_v5 = vmax.f32 %v1288_v15, 0.0 }
  0xe6   : > { %1331 = vmatmul.f32.gmra.mxu3 %v1201_v59  ;;  %v889_v16 = vadd.f32 %v857_v17, %v791_v27 }
  0xe7   : > { %v1177_v12 = vadd.f32 %v1145_v62, %v1079_v31  ;;  %1383 = vst [vmem:[%s2646_s24 + $0x80] sm:$0xff] %v1351_v5 }
  0xe8   : > { %v989_v40 = vadd.f32 %v957_v56, %v889_v16 }
  0xe9   : > { %1259 = vmatmul.f32.gmra.mxu0 %v1177_v12  ;;  %v1290_v61 = vpop.f32.mrf.mxu2 }
  0xea   : > { %v1087_v36 = vadd.f32 %v1055_v28, %v989_v40  ;;  %v1291_v3 = vadd.f32 %v2638_v9, %v1290_v61 }
  0xec   : > { %v1185_v14 = vadd.f32 %v1153_v22, %v1087_v36  ;;  %v1352_v18 = vmax.f32 %v1291_v3, 0.0 }
  0xee   : > { %1283 = vmatmul.f32.gmra.mxu1 %v1185_v14  ;;  %1384 = vst [vmem:[%s2646_s24 + $0x88] sm:$0xff] %v1352_v18 }
 0x100   : > { %v1239_v44 = vpop.f32.mrf.mxu0 }
 0x101   : > { %v1240_v63 = vadd.f32 %v2638_v9, %v1239_v44 }
 0x102   : > { %v1311_v11 = vpop.f32.mrf.mxu3 }
 0x103   : > { %v1335_v29 = vmax.f32 %v1240_v63, 0.0  ;;  %v1312_v47 = vadd.f32 %v2638_v9, %v1311_v11 }
 0x105   : > { %1367 = vst [vmem:[%s2646_s24] sm:$0xff] %v1335_v29  ;;  %v1359_v38 = vmax.f32 %v1312_v47, 0.0 }
 0x107   : > { %1391 = vst [vmem:[%s2646_s24 + $0xc0] sm:$0xff] %v1359_v38 }
 0x108   : > { %v1242_v20 = vpop.f32.mrf.mxu0 }
 0x109   : > { %v1263_v52 = vpop.f32.mrf.mxu1  ;;  %v1243_v37 = vadd.f32 %v2638_v9, %v1242_v20 }
 0x10a   : > { %v1264_v0 = vadd.f32 %v2638_v9, %v1263_v52  ;;  %v1314_v50 = vpop.f32.mrf.mxu3 }
 0x10b   : > { %v1336_v43 = vmax.f32 %v1243_v37, 0.0  ;;  %v1315_v7 = vadd.f32 %v2638_v9, %v1314_v50 }
 0x10c   : > { %v1343_v55 = vmax.f32 %v1264_v0, 0.0  ;;  %v1293_v51 = vpop.f32.mrf.mxu2 }
 0x10d   : > { %1368 = vst [vmem:[%s2646_s24 + $0x8] sm:$0xff] %v1336_v43  ;;  %v1294_v30 = vadd.f32 %v2638_v9, %v1293_v51  ;;  %v1360_v41 = vmax.f32 %v1315_v7, 0.0 }
 0x10e   : > { %1375 = vst [vmem:[%s2646_s24 + $0x40] sm:$0xff] %v1343_v55 }
 0x10f   : > { %v1353_v4 = vmax.f32 %v1294_v30, 0.0  ;;  %1392 = vst [vmem:[%s2646_s24 + $0xc8] sm:$0xff] %v1360_v41 }
 0x111   : > { %v1266_v6 = vpop.f32.mrf.mxu1  ;;  %1385 = vst [vmem:[%s2646_s24 + $0x90] sm:$0xff] %v1353_v4 }
 0x112   : > { %v1267_v1 = vadd.f32 %v2638_v9, %v1266_v6  ;;  %v1317_v19 = vpop.f32.mrf.mxu3 }
 0x113   : > { %v1318_v2 = vadd.f32 %v2638_v9, %v1317_v19 }
 0x114   : > { %v1344_v34 = vmax.f32 %v1267_v1, 0.0 }
 0x115   : > { %v1245_v42 = vpop.f32.mrf.mxu0  ;;  %v1361_v58 = vmax.f32 %v1318_v2, 0.0 }
 0x116   : > { %v1246_v33 = vadd.f32 %v2638_v9, %v1245_v42  ;;  %1376 = vst [vmem:[%s2646_s24 + $0x48] sm:$0xff] %v1344_v34 }
 0x117   : > { %1393 = vst [vmem:[%s2646_s24 + $0xd0] sm:$0xff] %v1361_v58 }
 0x118   : > { %v1337_v53 = vmax.f32 %v1246_v33, 0.0 }
 0x119   : > { %v1269_v21 = vpop.f32.mrf.mxu1 }
 0x11a   : > { %1369 = vst [vmem:[%s2646_s24 + $0x10] sm:$0xff] %v1337_v53  ;;  %v1270_v10 = vadd.f32 %v2638_v9, %v1269_v21 }
 0x11c   : > { %v1345_v26 = vmax.f32 %v1270_v10, 0.0 }
 0x11e   : > { %1377 = vst [vmem:[%s2646_s24 + $0x50] sm:$0xff] %v1345_v26  ;;  %v1296_v13 = vpop.f32.mrf.mxu2 }
 0x11f   : > { %v1297_v48 = vadd.f32 %v2638_v9, %v1296_v13 }
 0x121   : > { %v1354_v24 = vmax.f32 %v1297_v48, 0.0 }
 0x123   : > { %1386 = vst [vmem:[%s2646_s24 + $0x98] sm:$0xff] %v1354_v24 }
 0x124   : > { %v1248_v45 = vpop.f32.mrf.mxu0  ;;  %v1320_v23 = vpop.f32.mrf.mxu3 }
 0x125   : > { %v1249_v54 = vadd.f32 %v2638_v9, %v1248_v45  ;;  %v1321_v60 = vadd.f32 %v2638_v9, %v1320_v23 }
 0x127   : > { %v1338_v39 = vmax.f32 %v1249_v54, 0.0  ;;  %v1272_v32 = vpop.f32.mrf.mxu1  ;;  %v1362_v25 = vmax.f32 %v1321_v60, 0.0 }
 0x128   : > { %v1273_v57 = vadd.f32 %v2638_v9, %v1272_v32 }
 0x129   : > { %1370 = vst [vmem:[%s2646_s24 + $0x18] sm:$0xff] %v1338_v39 }
 0x12a   : > { %1394 = vst [vmem:[%s2646_s24 + $0xd8] sm:$0xff] %v1362_v25  ;;  %v1346_v17 = vmax.f32 %v1273_v57, 0.0 }
 0x12c   : > { %1378 = vst [vmem:[%s2646_s24 + $0x58] sm:$0xff] %v1346_v17 }
 0x132   : > { %v1299_v8 = vpop.f32.mrf.mxu2 }
 0x133   : > { %v1300_v62 = vadd.f32 %v2638_v9, %v1299_v8 }
 0x134   : > { %v1251_v49 = vpop.f32.mrf.mxu0 }
 0x135   : > { %v1252_v59 = vadd.f32 %v2638_v9, %v1251_v49  ;;  %v1355_v27 = vmax.f32 %v1300_v62, 0.0 }
 0x136   : > { %v1323_v56 = vpop.f32.mrf.mxu3 }
 0x137   : > { %v1339_v31 = vmax.f32 %v1252_v59, 0.0  ;;  %1387 = vst [vmem:[%s2646_s24 + $0xa0] sm:$0xff] %v1355_v27  ;;  %v1324_v35 = vadd.f32 %v2638_v9, %v1323_v56 }
 0x138   : > { %v1275_v16 = vpop.f32.mrf.mxu1 }
 0x139   : > { %1371 = vst [vmem:[%s2646_s24 + $0x20] sm:$0xff] %v1339_v31  ;;  %v1276_v28 = vadd.f32 %v2638_v9, %v1275_v16  ;;  %v1363_v12 = vmax.f32 %v1324_v35, 0.0 }
 0x13b   : > { %v1347_v40 = vmax.f32 %v1276_v28, 0.0  ;;  %1395 = vst [vmem:[%s2646_s24 + $0xe0] sm:$0xff] %v1363_v12 }
 0x13d   : > { %1379 = vst [vmem:[%s2646_s24 + $0x60] sm:$0xff] %v1347_v40 }
 0x143   : > { %v1302_v22 = vpop.f32.mrf.mxu2 }
 0x144   : > { %v1303_v36 = vadd.f32 %v2638_v9, %v1302_v22 }
 0x145   : > { %v1254_v14 = vpop.f32.mrf.mxu0 }
 0x146   : > { %v1255_v46 = vadd.f32 %v2638_v9, %v1254_v14  ;;  %v1356_v15 = vmax.f32 %v1303_v36, 0.0 }
 0x147   : > { %v1326_v5 = vpop.f32.mrf.mxu3 }
 0x148   : > { %v1340_v61 = vmax.f32 %v1255_v46, 0.0  ;;  %1388 = vst [vmem:[%s2646_s24 + $0xa8] sm:$0xff] %v1356_v15  ;;  %v1327_v3 = vadd.f32 %v2638_v9, %v1326_v5 }
 0x14a   : > { %v1278_v18 = vpop.f32.mrf.mxu1  ;;  %1372 = vst [vmem:[%s2646_s24 + $0x28] sm:$0xff] %v1340_v61  ;;  %v1364_v63 = vmax.f32 %v1327_v3, 0.0 }
 0x14b   : > { %v1279_v44 = vadd.f32 %v2638_v9, %v1278_v18 }
 0x14c   : > { %1396 = vst [vmem:[%s2646_s24 + $0xe8] sm:$0xff] %v1364_v63 }
 0x14d   : > { %v1348_v29 = vmax.f32 %v1279_v44, 0.0 }
 0x14f   : > { %1380 = vst [vmem:[%s2646_s24 + $0x68] sm:$0xff] %v1348_v29 }
 0x154   : > { %v1305_v11 = vpop.f32.mrf.mxu2 }
 0x155   : > { %v1306_v47 = vadd.f32 %v2638_v9, %v1305_v11 }
 0x156   : > { %v1257_v38 = vpop.f32.mrf.mxu0 }
 0x157   : > { %v1258_v52 = vadd.f32 %v2638_v9, %v1257_v38  ;;  %v1357_v20 = vmax.f32 %v1306_v47, 0.0 }
 0x158   : > { %v1329_v0 = vpop.f32.mrf.mxu3 }
 0x159   : > { %v1341_v37 = vmax.f32 %v1258_v52, 0.0  ;;  %1389 = vst [vmem:[%s2646_s24 + $0xb0] sm:$0xff] %v1357_v20  ;;  %v1330_v55 = vadd.f32 %v2638_v9, %v1329_v0 }
 0x15b   : > { %v1281_v43 = vpop.f32.mrf.mxu1  ;;  %1373 = vst [vmem:[%s2646_s24 + $0x30] sm:$0xff] %v1341_v37  ;;  %v1365_v7 = vmax.f32 %v1330_v55, 0.0 }
 0x15c   : > { %v1282_v50 = vadd.f32 %v2638_v9, %v1281_v43 }
 0x15d   : > { %1397 = vst [vmem:[%s2646_s24 + $0xf0] sm:$0xff] %v1365_v7 }
 0x15e   : > { %v1349_v51 = vmax.f32 %v1282_v50, 0.0 }
 0x160   : > { %1381 = vst [vmem:[%s2646_s24 + $0x70] sm:$0xff] %v1349_v51 }
 0x165   : > { %v1308_v30 = vpop.f32.mrf.mxu2 }
 0x166   : > { %v1260_v41 = vpop.f32.mrf.mxu0  ;;  %v1309_v6 = vadd.f32 %v2638_v9, %v1308_v30 }
 0x167   : > { %v1261_v4 = vadd.f32 %v2638_v9, %v1260_v41 }
 0x168   : > { %v1358_v1 = vmax.f32 %v1309_v6, 0.0 }
 0x169   : > { %v1342_v34 = vmax.f32 %v1261_v4, 0.0  ;;  %v1332_v42 = vpop.f32.mrf.mxu3 }
 0x16a   : > { %1390 = vst [vmem:[%s2646_s24 + $0xb8] sm:$0xff] %v1358_v1  ;;  %v1333_v33 = vadd.f32 %v2638_v9, %v1332_v42 }
 0x16b   : > { %1374 = vst [vmem:[%s2646_s24 + $0x38] sm:$0xff] %v1342_v34  ;;  %v1284_v19 = vpop.f32.mrf.mxu1 }
 0x16c   : > { %v1285_v2 = vadd.f32 %v2638_v9, %v1284_v19  ;;  %v1366_v53 = vmax.f32 %v1333_v33, 0.0 }
 0x16e   : > { %v1350_v58 = vmax.f32 %v1285_v2, 0.0  ;;  %1398 = vst [vmem:[%s2646_s24 + $0xf8] sm:$0xff] %v1366_v53 }
 0x170   : > { %1382 = vst [vmem:[%s2646_s24 + $0x78] sm:$0xff] %v1350_v58 }
 0x171 PF: > { %s14_s15 = sadd.s32 1, %s1556_s15  }
 0x172   : > { %p11_p4 = scmp.ge.s32.totalorder %s14_s15, 4  }
 0x174   :  { %13 = sbr.rel (!%p11_p4) target bundleno = 1 (0x1), region = 70 }

</bundles_post_ra>
